<compile_context>
chip_gen: v5e
topology: v5e:2x2
jax: 0.10.0
libtpu: 0.0.40
codegen_flags: <defaults>
</compile_context>

<pallas_src>
import jax
import jax.numpy as jnp
from jax.experimental import pallas as pl
from jax.experimental.pallas import tpu as pltpu


# ----------------------------------------------------------------------------
# Weight slab packing (one contiguous fp32 array -> one DMA)
# ----------------------------------------------------------------------------
def _pack_slab(pieces, width):
    """pieces: list of (name, 2-D array). Returns (slab, {name: (row_off, rows)})."""
    offsets = {}
    rows = []
    r = 0
    for name, arr in pieces:
        arr = jnp.asarray(arr, jnp.float32)
        assert arr.ndim == 2 and arr.shape[1] <= width
        pad = width - arr.shape[1]
        if pad:
            arr = jnp.pad(arr, ((0, 0), (0, pad)))
        offsets[name] = (r, arr.shape[0])
        rows.append(arr)
        r += arr.shape[0]
    slab = jnp.concatenate(rows, axis=0)
    pad_r = (-r) % 8
    if pad_r:
        slab = jnp.pad(slab, ((0, pad_r), (0, 0)))
    return slab, offsets


# ----------------------------------------------------------------------------
# Fused Pallas kernel: 2-layer bidirectional LSTM + FC head
# ----------------------------------------------------------------------------
def _make_kernel(T, B, H, O, off):
    f32 = jnp.float32

    def kernel(x_ref, slab_ref, out_ref, gx1f_scr, gx1b_scr, h1_scr, gx2_scr):
        def row(name):
            r0, n = off[name]
            return slab_ref[r0:r0 + n, :]

        def cell(gates, c_prev):
            # Full-width sigmoid/tanh over the whole (n, 4H) gate tile (2 EUP ops),
            # then the i/f/g/o gates are cheap lane slices of the results.
            sig = jax.nn.sigmoid(gates)
            th = jnp.tanh(gates)
            i_g = sig[:, 0 * H:1 * H]
            f_g = sig[:, 1 * H:2 * H]
            g_g = th[:, 2 * H:3 * H]
            o_g = sig[:, 3 * H:4 * H]
            c_new = f_g * c_prev + i_g * g_g
            h_new = o_g * jnp.tanh(c_new)
            return h_new, c_new

        # ---- carve weights out of the slab once (hoisted out of all loops) ------
        whh1_bd = row('whh1_bd')                 # (2H, 4H): rows 0:H fwd, H:2H bwd
        wih1f, b1f = row('wih1f'), row('b1f')    # (1, 4H) each
        wih1b, b1b = row('wih1b'), row('b1b')
        wih2f, b2f = row('wih2f'), row('b2f')    # (2H, 4H), (1, 4H)
        whh2f = row('whh2f')                     # (H, 4H)
        wih2b, b2b = row('wih2b'), row('b2b')    # (2H, 4H), (1, 4H)
        r0, _ = off['wfc1']
        wfc1 = slab_ref[r0:r0 + 2 * H, 0:H]      # (2H, H)
        r0, _ = off['bfc1']
        bfc1 = slab_ref[r0:r0 + 1, 0:H]          # (1, H)
        r0, _ = off['wfc2']
        wfc2 = slab_ref[r0:r0 + H, 0:O]          # (H, O)
        r0, _ = off['bfc2']
        bfc2 = slab_ref[r0:r0 + 1, 0:O]          # (1, O)

        # ---- layer 1: input projection for ALL timesteps, both directions -------
        x_flat = x_ref[...]                              # (T*B, 1), row = t*B + b
        gx1f_scr[...] = x_flat * wih1f + b1f             # (T*B, 4H)
        gx1b_scr[...] = x_flat * wih1b + b1b             # (T*B, 4H)

        # direction-select mask for the block-stacked recurrent matmul (built once)
        rows_i = jax.lax.broadcasted_iota(jnp.int32, (2 * B, 2 * H), 0)
        cols_i = jax.lax.broadcasted_iota(jnp.int32, (2 * B, 2 * H), 1)
        dir_mask = jnp.where((rows_i < B) == (cols_i < H),
                             jnp.float32(1.0), jnp.float32(0.0))

        # ---- layer 1 recurrence: both directions fused into one cell per step ---
        # h1/c1 are SSA loop-carried values (rows 0:B = fwd, rows B:2B = bwd).
        h1 = jnp.zeros((2 * B, H), f32)
        c1 = jnp.zeros((2 * B, H), f32)
        for t in range(T):
            tb = T - 1 - t
            gx = jnp.concatenate(
                [gx1f_scr[t * B:(t + 1) * B, :],
                 gx1b_scr[tb * B:(tb + 1) * B, :]], axis=0)        # (2B, 4H)
            h_in = jnp.concatenate([h1, h1], axis=1) * dir_mask    # (2B, 2H)
            gates = gx + jnp.dot(h_in, whh1_bd, preferred_element_type=f32)
            h1, c1 = cell(gates, c1)
            # layer-1 output sequence, laid out exactly as layer-2's input expects
            h1_scr[t * B:(t + 1) * B, 0:H] = h1[0:B]               # fwd @ time t
            h1_scr[tb * B:(tb + 1) * B, H:2 * H] = h1[B:2 * B]     # bwd @ time T-1-t

        # ---- layer 2 forward: hoist the input projection out of the recurrence --
        h1_all = h1_scr[...]                                       # (T*B, 2H)
        gx2_scr[...] = jnp.dot(h1_all, wih2f, preferred_element_type=f32) + b2f

        h2 = jnp.zeros((B, H), f32)
        c2 = jnp.zeros((B, H), f32)
        for t in range(T):
            gates = gx2_scr[t * B:(t + 1) * B, :] + jnp.dot(
                h2, whh2f, preferred_element_type=f32)
            h2, c2 = cell(gates, c2)
        h2_fwd_last = h2                                           # (B, H) at t=T-1

        # ---- layer 2 backward: hidden aligned to t = T-1 is the FIRST reverse
        #      step from the zero state -> a single cell evaluation is exact ------
        gates_b = jnp.dot(h1_scr[(T - 1) * B:T * B, :], wih2b,
                          preferred_element_type=f32) + b2b
        sig = jax.nn.sigmoid(gates_b)
        th = jnp.tanh(gates_b)
        c_b2 = sig[:, 0:H] * th[:, 2 * H:3 * H]                    # f * c_prev == 0
        h2_bwd_last = sig[:, 3 * H:4 * H] * jnp.tanh(c_b2)         # (B, H)

        # ---- FC head: Linear -> ReLU -> (Dropout = identity) -> Linear ----------
        hid = (jnp.dot(h2_fwd_last, wfc1[0:H, :], preferred_element_type=f32)
               + jnp.dot(h2_bwd_last, wfc1[H:2 * H, :], preferred_element_type=f32)
               + bfc1)
        hid = jnp.maximum(hid, 0.0)
        out_ref[...] = jnp.dot(hid, wfc2, preferred_element_type=f32) + bfc2

    return kernel


# ----------------------------------------------------------------------------
# Pallas wrapper
# ----------------------------------------------------------------------------
def fused_lstm_forward(x_seq, params):
    """x_seq: time-major (T, B, 1) -> (B, output_dim)."""
    T, B, din = x_seq.shape
    assert din == 1, "fused kernel assumes input_dim == 1 (module's reshape path)"

    wih1f, whh1f, b1f = params['lstm'][(0, 0)]
    wih1b, whh1b, b1b = params['lstm'][(0, 1)]
    wih2f, whh2f, b2f = params['lstm'][(1, 0)]
    wih2b, whh2b, b2b = params['lstm'][(1, 1)]
    wfc1, bfc1, wfc2, bfc2 = params['fc']

    H = whh1f.shape[0]
    O = wfc2.shape[1]
    width = 4 * H   # slab lane width (== 128 for H=32)

    pieces = [
        ('whh1_bd', jnp.concatenate([whh1f, whh1b], axis=0)),   # (2H, 4H)
        ('wih1f', wih1f), ('b1f', b1f),
        ('wih1b', wih1b), ('b1b', b1b),
        ('wih2f', wih2f), ('b2f', b2f),
        ('whh2f', whh2f),
        ('wih2b', wih2b), ('b2b', b2b),
        ('wfc1', wfc1), ('bfc1', bfc1),
        ('wfc2', wfc2), ('bfc2', bfc2),
    ]
    slab, off = _pack_slab(pieces, width)

    x2d = x_seq.reshape(T * B, 1).astype(jnp.float32)   # row = t*B + b
    kernel = _make_kernel(T, B, H, O, off)

    return pl.pallas_call(
        kernel,
        out_shape=jax.ShapeDtypeStruct((B, O), jnp.float32),
        grid=(1,),
        in_specs=[
            pl.BlockSpec((T * B, 1), lambda i: (0, 0)),
            pl.BlockSpec(slab.shape, lambda i: (0, 0)),
        ],
        out_specs=pl.BlockSpec((B, O), lambda i: (0, 0)),
        scratch_shapes=[
            pltpu.VMEM((T * B, 4 * H), jnp.float32),   # layer-1 fwd x-gates
            pltpu.VMEM((T * B, 4 * H), jnp.float32),   # layer-1 bwd x-gates
            pltpu.VMEM((T * B, 2 * H), jnp.float32),   # layer-1 output sequence
            pltpu.VMEM((T * B, 4 * H), jnp.float32),   # layer-2 fwd x-gates (hoisted)
        ],
        compiler_params=pltpu.CompilerParams(
            dimension_semantics=("arbitrary",)),
    )(x2d, slab)


def lstm_model_forward(x, params):
    """x: (B, channels=1, seq_len) -> (B, output_dim). Eval-mode forward."""
    # Module forward: 3-D with shape[1] != shape[2] -> transpose(1, 2): (B, T, 1)
    x = jnp.transpose(x, (0, 2, 1)).astype(jnp.float32)   # (B, T, 1)
    x_seq = jnp.transpose(x, (1, 0, 2))                   # time-major (T, B, 1)
    return fused_lstm_forward(x_seq, params)


# ----------------------------------------------------------------------------
# Parameter init (deterministic, mirrors the module's _initialize_weights scheme)
# ----------------------------------------------------------------------------
def _orthogonal(key, rows, cols):
    a = jax.random.normal(key, (rows, cols), dtype=jnp.float32)
    transpose = rows < cols
    if transpose:
        a = a.T
    q, r = jnp.linalg.qr(a)
    q = q * jnp.sign(jnp.diag(r))
    if transpose:
        q = q.T
    return q


def _kaiming_normal(key, out_dim, in_dim):
    # kaiming_normal_(mode='fan_in', nonlinearity='relu'): std = sqrt(2 / fan_in)
    std = jnp.sqrt(2.0 / in_dim)
    return std * jax.random.normal(key, (out_dim, in_dim), dtype=jnp.float32)


def init_params(key, input_dim, hidden_dim, num_layers, num_directions, output_dim):
    params = {'lstm': {}, 'fc': None}
    for l in range(num_layers):
        in_dim = input_dim if l == 0 else hidden_dim * num_directions
        for d in range(num_directions):
            key, k1, k2 = jax.random.split(key, 3)
            w_ih = _orthogonal(k1, 4 * hidden_dim, in_dim)        # (4H, in)
            w_hh = _orthogonal(k2, 4 * hidden_dim, hidden_dim)    # (4H, H)
            bias = jnp.zeros((1, 4 * hidden_dim), jnp.float32)    # b_ih + b_hh = 0
            params['lstm'][(l, d)] = (w_ih.T, w_hh.T, bias)       # store transposed
    key, k1, k2 = jax.random.split(key, 3)
    fc_in = hidden_dim * num_directions
    w1 = _kaiming_normal(k1, hidden_dim, fc_in)                   # (H, 2H)
    w2 = _kaiming_normal(k2, output_dim, hidden_dim)              # (O, H)
    params['fc'] = (w1.T, jnp.zeros((1, hidden_dim), jnp.float32),
                    w2.T, jnp.zeros((1, output_dim), jnp.float32))
    return params


# ----------------------------------------------------------------------------
# Pure-JAX reference (for correctness check)
# ----------------------------------------------------------------------------
def _ref_lstm_dir(x_seq, wih_t, whh_t, bias, reverse, hidden_dim):
    T, B, _ = x_seq.shape
    xs = x_seq[::-1] if reverse else x_seq
    h0 = jnp.zeros((B, hidden_dim), jnp.float32)
    c0 = jnp.zeros((B, hidden_dim), jnp.float32)

    def step(carry, x_t):
        h, c = carry
        gates = x_t @ wih_t + h @ whh_t + bias
        i = jax.nn.sigmoid(gates[:, 0 * hidden_dim:1 * hidden_dim])
        f = jax.nn.sigmoid(gates[:, 1 * hidden_dim:2 * hidden_dim])
        g = jnp.tanh(gates[:, 2 * hidden_dim:3 * hidden_dim])
        o = jax.nn.sigmoid(gates[:, 3 * hidden_dim:4 * hidden_dim])
        c_new = f * c + i * g
        h_new = o * jnp.tanh(c_new)
        return (h_new, c_new), h_new

    _, hs = jax.lax.scan(step, (h0, c0), xs)
    return hs[::-1] if reverse else hs


def ref_forward(x, params, num_layers, num_directions, hidden_dim):
    x = jnp.transpose(x, (0, 2, 1)).astype(jnp.float32)
    seq = jnp.transpose(x, (1, 0, 2))
    layer_in = seq
    for l in range(num_layers):
        outs = []
        for d in range(num_directions):
            wih_t, whh_t, bias = params['lstm'][(l, d)]
            outs.append(_ref_lstm_dir(layer_in, wih_t, whh_t, bias, d == 1, hidden_dim))
        layer_in = jnp.concatenate(outs, axis=-1)
    last = layer_in[-1]
    w1_t, b1, w2_t, b2 = params['fc']
    h = jnp.maximum(last @ w1_t + b1, 0.0)
    return h @ w2_t + b2


# ----------------------------------------------------------------------------
if __name__ == "__main__":
    # Small config consistent with the module (input_dim=1, bidirectional, 2 layers)
    INPUT_DIM = 1
    HIDDEN_DIM = 32
    NUM_LAYERS = 2
    NUM_DIRECTIONS = 2
    OUTPUT_DIM = 3
    BATCH = 2
    SEQ_LEN = 16

    key = jax.random.PRNGKey(0)
    key, pkey, xkey = jax.random.split(key, 3)

    params = init_params(pkey, INPUT_DIM, HIDDEN_DIM, NUM_LAYERS,
                         NUM_DIRECTIONS, OUTPUT_DIM)

    # Input: [batch, channels=1, seq_len]  (module's transpose(1,2) path)
    x = jax.random.normal(xkey, (BATCH, 1, SEQ_LEN), dtype=jnp.float32)

    fwd = jax.jit(lstm_model_forward)
    out = jax.block_until_ready(fwd(x, params))

    ref = ref_forward(x, params, NUM_LAYERS, NUM_DIRECTIONS, HIDDEN_DIM)
    assert out.shape == (BATCH, OUTPUT_DIM)
    # fp32 everywhere; tolerance allows only MXU-vs-XLA dot reassociation noise.
    assert jnp.allclose(out, ref, atol=1e-3, rtol=1e-3), (out, ref)

    print("KERNEL_OK")
</pallas_src>

<mosaic_0001>
module attributes {stable_mosaic.version = 11 : i64} {
  func.func @kernel(%arg0: i32, %arg1: memref<32x1xf32, #tpu.memory_space<vmem>>, %arg2: memref<328x128xf32, #tpu.memory_space<vmem>>, %arg3: memref<2x3xf32, #tpu.memory_space<vmem>>, %arg4: memref<32x128xf32, #tpu.memory_space<vmem>>, %arg5: memref<32x128xf32, #tpu.memory_space<vmem>>, %arg6: memref<32x64xf32, #tpu.memory_space<vmem>>, %arg7: memref<32x128xf32, #tpu.memory_space<vmem>>) attributes {dimension_semantics = [#tpu.dimension_semantics<arbitrary>], iteration_bounds = array<i64: 1>, scalar_prefetch = 0 : i64, scratch_operands = 4 : i64, tpu.core_type = #tpu.core_type<tc>, window_params = [{pipeline_mode = #tpu.pipeline_mode<synchronous>, transform_indices = @transform_0, window_bounds = array<i64: 32, 1>}, {pipeline_mode = #tpu.pipeline_mode<synchronous>, transform_indices = @transform_1, window_bounds = array<i64: 328, 128>}, {pipeline_mode = #tpu.pipeline_mode<synchronous>, transform_indices = @transform_2, window_bounds = array<i64: 2, 3>}]} {
    %c0 = arith.constant 0 : index
    %c0_0 = arith.constant 0 : index
    %0 = vector.load %arg2[%c0, %c0_0] : memref<328x128xf32, #tpu.memory_space<vmem>>, vector<64x128xf32>
    %c64 = arith.constant 64 : index
    %c0_1 = arith.constant 0 : index
    %1 = vector.load %arg2[%c64, %c0_1] : memref<328x128xf32, #tpu.memory_space<vmem>>, vector<1x128xf32>
    %c65 = arith.constant 65 : index
    %c0_2 = arith.constant 0 : index
    %2 = vector.load %arg2[%c65, %c0_2] : memref<328x128xf32, #tpu.memory_space<vmem>>, vector<1x128xf32>
    %c66 = arith.constant 66 : index
    %c0_3 = arith.constant 0 : index
    %3 = vector.load %arg2[%c66, %c0_3] : memref<328x128xf32, #tpu.memory_space<vmem>>, vector<1x128xf32>
    %c67 = arith.constant 67 : index
    %c0_4 = arith.constant 0 : index
    %4 = vector.load %arg2[%c67, %c0_4] : memref<328x128xf32, #tpu.memory_space<vmem>>, vector<1x128xf32>
    %c68 = arith.constant 68 : index
    %c0_5 = arith.constant 0 : index
    %5 = vector.load %arg2[%c68, %c0_5] : memref<328x128xf32, #tpu.memory_space<vmem>>, vector<64x128xf32>
    %c132 = arith.constant 132 : index
    %c0_6 = arith.constant 0 : index
    %6 = vector.load %arg2[%c132, %c0_6] : memref<328x128xf32, #tpu.memory_space<vmem>>, vector<1x128xf32>
    %c133 = arith.constant 133 : index
    %c0_7 = arith.constant 0 : index
    %7 = vector.load %arg2[%c133, %c0_7] : memref<328x128xf32, #tpu.memory_space<vmem>>, vector<32x128xf32>
    %c165 = arith.constant 165 : index
    %c0_8 = arith.constant 0 : index
    %8 = vector.load %arg2[%c165, %c0_8] : memref<328x128xf32, #tpu.memory_space<vmem>>, vector<64x128xf32>
    %c229 = arith.constant 229 : index
    %c0_9 = arith.constant 0 : index
    %9 = vector.load %arg2[%c229, %c0_9] : memref<328x128xf32, #tpu.memory_space<vmem>>, vector<1x128xf32>
    %c230 = arith.constant 230 : index
    %c0_10 = arith.constant 0 : index
    %10 = vector.load %arg2[%c230, %c0_10] : memref<328x128xf32, #tpu.memory_space<vmem>>, vector<64x32xf32>
    %c294 = arith.constant 294 : index
    %c0_11 = arith.constant 0 : index
    %11 = vector.load %arg2[%c294, %c0_11] : memref<328x128xf32, #tpu.memory_space<vmem>>, vector<1x32xf32>
    %c295 = arith.constant 295 : index
    %c0_12 = arith.constant 0 : index
    %12 = vector.load %arg2[%c295, %c0_12] : memref<328x128xf32, #tpu.memory_space<vmem>>, vector<32x3xf32>
    %c327 = arith.constant 327 : index
    %c0_13 = arith.constant 0 : index
    %13 = vector.load %arg2[%c327, %c0_13] : memref<328x128xf32, #tpu.memory_space<vmem>>, vector<1x3xf32>
    %c0_14 = arith.constant 0 : index
    %c0_15 = arith.constant 0 : index
    %14 = vector.load %arg1[%c0_14, %c0_15] : memref<32x1xf32, #tpu.memory_space<vmem>>, vector<32x1xf32>
    %15 = vector.broadcast %14 : vector<32x1xf32> to vector<32x128xf32>
    %16 = vector.broadcast %1 : vector<1x128xf32> to vector<32x128xf32>
    %17 = arith.mulf %15, %16 : vector<32x128xf32>
    %18 = vector.broadcast %2 : vector<1x128xf32> to vector<32x128xf32>
    %19 = arith.addf %17, %18 : vector<32x128xf32>
    %c0_16 = arith.constant 0 : index
    %c0_17 = arith.constant 0 : index
    %20 = vector.load %arg4[%c0_16, %c0_17] : memref<32x128xf32, #tpu.memory_space<vmem>>, vector<32x128xf32>
    tpu.vector_store %arg4[%c0_16, %c0_17], %19 {strides = array<i32>} : memref<32x128xf32, #tpu.memory_space<vmem>>, vector<32x128xf32>,
    %21 = vector.broadcast %14 : vector<32x1xf32> to vector<32x128xf32>
    %22 = vector.broadcast %3 : vector<1x128xf32> to vector<32x128xf32>
    %23 = arith.mulf %21, %22 : vector<32x128xf32>
    %24 = vector.broadcast %4 : vector<1x128xf32> to vector<32x128xf32>
    %25 = arith.addf %23, %24 : vector<32x128xf32>
    %c0_18 = arith.constant 0 : index
    %c0_19 = arith.constant 0 : index
    %26 = vector.load %arg5[%c0_18, %c0_19] : memref<32x128xf32, #tpu.memory_space<vmem>>, vector<32x128xf32>
    tpu.vector_store %arg5[%c0_18, %c0_19], %25 {strides = array<i32>} : memref<32x128xf32, #tpu.memory_space<vmem>>, vector<32x128xf32>,
    %27 = tpu.iota {dimensions = array<i32: 0>} : vector<4x64xi32>
    %28 = tpu.iota {dimensions = array<i32: 1>} : vector<4x64xi32>
    %c2_i32 = arith.constant 2 : i32
    %29 = vector.broadcast %c2_i32 : i32 to vector<4x64xi32>
    %30 = arith.cmpi slt, %27, %29 : vector<4x64xi32>
    %c32_i32 = arith.constant 32 : i32
    %31 = vector.broadcast %c32_i32 : i32 to vector<4x64xi32>
    %32 = arith.cmpi slt, %28, %31 : vector<4x64xi32>
    %33 = arith.xori %30, %32 : vector<4x64xi1>
    %cst = arith.constant dense<true> : vector<4x64xi1>
    %34 = arith.xori %33, %cst : vector<4x64xi1>
    %cst_20 = arith.constant 1.000000e+00 : f32
    %cst_21 = arith.constant 0.000000e+00 : f32
    %35 = vector.broadcast %cst_20 : f32 to vector<4x64xf32>
    %36 = vector.broadcast %cst_21 : f32 to vector<4x64xf32>
    %37 = arith.select %34, %35, %36 : vector<4x64xi1>, vector<4x64xf32>
    %cst_22 = arith.constant 0.000000e+00 : f32
    %38 = vector.broadcast %cst_22 : f32 to vector<4x32xf32>
    %cst_23 = arith.constant 0.000000e+00 : f32
    %39 = vector.broadcast %cst_23 : f32 to vector<4x32xf32>
    %c0_24 = arith.constant 0 : index
    %c0_25 = arith.constant 0 : index
    %40 = vector.load %arg4[%c0_24, %c0_25] : memref<32x128xf32, #tpu.memory_space<vmem>>, vector<2x128xf32>
    %c30 = arith.constant 30 : index
    %c0_26 = arith.constant 0 : index
    %41 = vector.load %arg5[%c30, %c0_26] : memref<32x128xf32, #tpu.memory_space<vmem>>, vector<2x128xf32>
    %42 = tpu.concatenate %40, %41 in 0 : vector<2x128xf32>, vector<2x128xf32> -> vector<4x128xf32>
    %43 = tpu.concatenate %38, %38 in 1 : vector<4x32xf32>, vector<4x32xf32> -> vector<4x64xf32>
    %44 = arith.mulf %43, %37 : vector<4x64xf32>
    %cst_27 = arith.constant dense<0.000000e+00> : vector<4x128xf32>
    %45 = tpu.matmul %44, %0, %cst_27 {dimension_numbers = #tpu.dot_dimension_numbers<[1], [0], [0], [1], [0, 0, 1, 1], [], []>} : vector<4x64xf32>, vector<64x128xf32>, vector<4x128xf32> -> vector<4x128xf32>
    %46 = arith.addf %42, %45 : vector<4x128xf32>
    %47 = arith.negf %46 : vector<4x128xf32>
    %48 = math.exp %47 : vector<4x128xf32>
    %cst_28 = arith.constant 1.000000e+00 : f32
    %49 = vector.broadcast %cst_28 : f32 to vector<4x128xf32>
    %50 = arith.addf %49, %48 : vector<4x128xf32>
    %51 = arith.divf %49, %50 : vector<4x128xf32>
    %52 = math.tanh %46 : vector<4x128xf32>
    %53 = vector.extract_strided_slice %51 {offsets = [0, 0], sizes = [4, 32], strides = [1, 1]} : vector<4x128xf32> to vector<4x32xf32>
    %54 = vector.extract_strided_slice %51 {offsets = [0, 32], sizes = [4, 32], strides = [1, 1]} : vector<4x128xf32> to vector<4x32xf32>
    %55 = vector.extract_strided_slice %52 {offsets = [0, 64], sizes = [4, 32], strides = [1, 1]} : vector<4x128xf32> to vector<4x32xf32>
    %56 = vector.extract_strided_slice %51 {offsets = [0, 96], sizes = [4, 32], strides = [1, 1]} : vector<4x128xf32> to vector<4x32xf32>
    %57 = arith.mulf %54, %39 : vector<4x32xf32>
    %58 = arith.mulf %53, %55 : vector<4x32xf32>
    %59 = arith.addf %57, %58 : vector<4x32xf32>
    %60 = math.tanh %59 : vector<4x32xf32>
    %61 = arith.mulf %56, %60 : vector<4x32xf32>
    %62 = vector.extract_strided_slice %61 {offsets = [0, 0], sizes = [2, 32], strides = [1, 1]} : vector<4x32xf32> to vector<2x32xf32>
    %c0_29 = arith.constant 0 : index
    %c0_30 = arith.constant 0 : index
    %63 = vector.load %arg6[%c0_29, %c0_30] : memref<32x64xf32, #tpu.memory_space<vmem>>, vector<2x32xf32>
    tpu.vector_store %arg6[%c0_29, %c0_30], %62 {strides = array<i32>} : memref<32x64xf32, #tpu.memory_space<vmem>>, vector<2x32xf32>,
    %64 = vector.extract_strided_slice %61 {offsets = [2, 0], sizes = [2, 32], strides = [1, 1]} : vector<4x32xf32> to vector<2x32xf32>
    %c30_31 = arith.constant 30 : index
    %c32 = arith.constant 32 : index
    %65 = vector.load %arg6[%c30_31, %c32] : memref<32x64xf32, #tpu.memory_space<vmem>>, vector<2x32xf32>
    tpu.vector_store %arg6[%c30_31, %c32], %64 {strides = array<i32>} : memref<32x64xf32, #tpu.memory_space<vmem>>, vector<2x32xf32>,
    %c2 = arith.constant 2 : index
    %c0_32 = arith.constant 0 : index
    %66 = vector.load %arg4[%c2, %c0_32] : memref<32x128xf32, #tpu.memory_space<vmem>>, vector<2x128xf32>
    %c28 = arith.constant 28 : index
    %c0_33 = arith.constant 0 : index
    %67 = vector.load %arg5[%c28, %c0_33] : memref<32x128xf32, #tpu.memory_space<vmem>>, vector<2x128xf32>
    %68 = tpu.concatenate %66, %67 in 0 : vector<2x128xf32>, vector<2x128xf32> -> vector<4x128xf32>
    %69 = tpu.concatenate %61, %61 in 1 : vector<4x32xf32>, vector<4x32xf32> -> vector<4x64xf32>
    %70 = arith.mulf %69, %37 : vector<4x64xf32>
    %cst_34 = arith.constant dense<0.000000e+00> : vector<4x128xf32>
    %71 = tpu.matmul %70, %0, %cst_34 {dimension_numbers = #tpu.dot_dimension_numbers<[1], [0], [0], [1], [0, 0, 1, 1], [], []>} : vector<4x64xf32>, vector<64x128xf32>, vector<4x128xf32> -> vector<4x128xf32>
    %72 = arith.addf %68, %71 : vector<4x128xf32>
    %73 = arith.negf %72 : vector<4x128xf32>
    %74 = math.exp %73 : vector<4x128xf32>
    %cst_35 = arith.constant 1.000000e+00 : f32
    %75 = vector.broadcast %cst_35 : f32 to vector<4x128xf32>
    %76 = arith.addf %75, %74 : vector<4x128xf32>
    %77 = arith.divf %75, %76 : vector<4x128xf32>
    %78 = math.tanh %72 : vector<4x128xf32>
    %79 = vector.extract_strided_slice %77 {offsets = [0, 0], sizes = [4, 32], strides = [1, 1]} : vector<4x128xf32> to vector<4x32xf32>
    %80 = vector.extract_strided_slice %77 {offsets = [0, 32], sizes = [4, 32], strides = [1, 1]} : vector<4x128xf32> to vector<4x32xf32>
    %81 = vector.extract_strided_slice %78 {offsets = [0, 64], sizes = [4, 32], strides = [1, 1]} : vector<4x128xf32> to vector<4x32xf32>
    %82 = vector.extract_strided_slice %77 {offsets = [0, 96], sizes = [4, 32], strides = [1, 1]} : vector<4x128xf32> to vector<4x32xf32>
    %83 = arith.mulf %80, %59 : vector<4x32xf32>
    %84 = arith.mulf %79, %81 : vector<4x32xf32>
    %85 = arith.addf %83, %84 : vector<4x32xf32>
    %86 = math.tanh %85 : vector<4x32xf32>
    %87 = arith.mulf %82, %86 : vector<4x32xf32>
    %88 = vector.extract_strided_slice %87 {offsets = [0, 0], sizes = [2, 32], strides = [1, 1]} : vector<4x32xf32> to vector<2x32xf32>
    %c2_36 = arith.constant 2 : index
    %c0_37 = arith.constant 0 : index
    %89 = vector.load %arg6[%c2_36, %c0_37] : memref<32x64xf32, #tpu.memory_space<vmem>>, vector<2x32xf32>
    tpu.vector_store %arg6[%c2_36, %c0_37], %88 {strides = array<i32>} : memref<32x64xf32, #tpu.memory_space<vmem>>, vector<2x32xf32>,
    %90 = vector.extract_strided_slice %87 {offsets = [2, 0], sizes = [2, 32], strides = [1, 1]} : vector<4x32xf32> to vector<2x32xf32>
    %c28_38 = arith.constant 28 : index
    %c32_39 = arith.constant 32 : index
    %91 = vector.load %arg6[%c28_38, %c32_39] : memref<32x64xf32, #tpu.memory_space<vmem>>, vector<2x32xf32>
    tpu.vector_store %arg6[%c28_38, %c32_39], %90 {strides = array<i32>} : memref<32x64xf32, #tpu.memory_space<vmem>>, vector<2x32xf32>,
    %c4 = arith.constant 4 : index
    %c0_40 = arith.constant 0 : index
    %92 = vector.load %arg4[%c4, %c0_40] : memref<32x128xf32, #tpu.memory_space<vmem>>, vector<2x128xf32>
    %c26 = arith.constant 26 : index
    %c0_41 = arith.constant 0 : index
    %93 = vector.load %arg5[%c26, %c0_41] : memref<32x128xf32, #tpu.memory_space<vmem>>, vector<2x128xf32>
    %94 = tpu.concatenate %92, %93 in 0 : vector<2x128xf32>, vector<2x128xf32> -> vector<4x128xf32>
    %95 = tpu.concatenate %87, %87 in 1 : vector<4x32xf32>, vector<4x32xf32> -> vector<4x64xf32>
    %96 = arith.mulf %95, %37 : vector<4x64xf32>
    %cst_42 = arith.constant dense<0.000000e+00> : vector<4x128xf32>
    %97 = tpu.matmul %96, %0, %cst_42 {dimension_numbers = #tpu.dot_dimension_numbers<[1], [0], [0], [1], [0, 0, 1, 1], [], []>} : vector<4x64xf32>, vector<64x128xf32>, vector<4x128xf32> -> vector<4x128xf32>
    %98 = arith.addf %94, %97 : vector<4x128xf32>
    %99 = arith.negf %98 : vector<4x128xf32>
    %100 = math.exp %99 : vector<4x128xf32>
    %cst_43 = arith.constant 1.000000e+00 : f32
    %101 = vector.broadcast %cst_43 : f32 to vector<4x128xf32>
    %102 = arith.addf %101, %100 : vector<4x128xf32>
    %103 = arith.divf %101, %102 : vector<4x128xf32>
    %104 = math.tanh %98 : vector<4x128xf32>
    %105 = vector.extract_strided_slice %103 {offsets = [0, 0], sizes = [4, 32], strides = [1, 1]} : vector<4x128xf32> to vector<4x32xf32>
    %106 = vector.extract_strided_slice %103 {offsets = [0, 32], sizes = [4, 32], strides = [1, 1]} : vector<4x128xf32> to vector<4x32xf32>
    %107 = vector.extract_strided_slice %104 {offsets = [0, 64], sizes = [4, 32], strides = [1, 1]} : vector<4x128xf32> to vector<4x32xf32>
    %108 = vector.extract_strided_slice %103 {offsets = [0, 96], sizes = [4, 32], strides = [1, 1]} : vector<4x128xf32> to vector<4x32xf32>
    %109 = arith.mulf %106, %85 : vector<4x32xf32>
    %110 = arith.mulf %105, %107 : vector<4x32xf32>
    %111 = arith.addf %109, %110 : vector<4x32xf32>
    %112 = math.tanh %111 : vector<4x32xf32>
    %113 = arith.mulf %108, %112 : vector<4x32xf32>
    %114 = vector.extract_strided_slice %113 {offsets = [0, 0], sizes = [2, 32], strides = [1, 1]} : vector<4x32xf32> to vector<2x32xf32>
    %c4_44 = arith.constant 4 : index
    %c0_45 = arith.constant 0 : index
    %115 = vector.load %arg6[%c4_44, %c0_45] : memref<32x64xf32, #tpu.memory_space<vmem>>, vector<2x32xf32>
    tpu.vector_store %arg6[%c4_44, %c0_45], %114 {strides = array<i32>} : memref<32x64xf32, #tpu.memory_space<vmem>>, vector<2x32xf32>,
    %116 = vector.extract_strided_slice %113 {offsets = [2, 0], sizes = [2, 32], strides = [1, 1]} : vector<4x32xf32> to vector<2x32xf32>
    %c26_46 = arith.constant 26 : index
    %c32_47 = arith.constant 32 : index
    %117 = vector.load %arg6[%c26_46, %c32_47] : memref<32x64xf32, #tpu.memory_space<vmem>>, vector<2x32xf32>
    tpu.vector_store %arg6[%c26_46, %c32_47], %116 {strides = array<i32>} : memref<32x64xf32, #tpu.memory_space<vmem>>, vector<2x32xf32>,
    %c6 = arith.constant 6 : index
    %c0_48 = arith.constant 0 : index
    %118 = vector.load %arg4[%c6, %c0_48] : memref<32x128xf32, #tpu.memory_space<vmem>>, vector<2x128xf32>
    %c24 = arith.constant 24 : index
    %c0_49 = arith.constant 0 : index
    %119 = vector.load %arg5[%c24, %c0_49] : memref<32x128xf32, #tpu.memory_space<vmem>>, vector<2x128xf32>
    %120 = tpu.concatenate %118, %119 in 0 : vector<2x128xf32>, vector<2x128xf32> -> vector<4x128xf32>
    %121 = tpu.concatenate %113, %113 in 1 : vector<4x32xf32>, vector<4x32xf32> -> vector<4x64xf32>
    %122 = arith.mulf %121, %37 : vector<4x64xf32>
    %cst_50 = arith.constant dense<0.000000e+00> : vector<4x128xf32>
    %123 = tpu.matmul %122, %0, %cst_50 {dimension_numbers = #tpu.dot_dimension_numbers<[1], [0], [0], [1], [0, 0, 1, 1], [], []>} : vector<4x64xf32>, vector<64x128xf32>, vector<4x128xf32> -> vector<4x128xf32>
    %124 = arith.addf %120, %123 : vector<4x128xf32>
    %125 = arith.negf %124 : vector<4x128xf32>
    %126 = math.exp %125 : vector<4x128xf32>
    %cst_51 = arith.constant 1.000000e+00 : f32
    %127 = vector.broadcast %cst_51 : f32 to vector<4x128xf32>
    %128 = arith.addf %127, %126 : vector<4x128xf32>
    %129 = arith.divf %127, %128 : vector<4x128xf32>
    %130 = math.tanh %124 : vector<4x128xf32>
    %131 = vector.extract_strided_slice %129 {offsets = [0, 0], sizes = [4, 32], strides = [1, 1]} : vector<4x128xf32> to vector<4x32xf32>
    %132 = vector.extract_strided_slice %129 {offsets = [0, 32], sizes = [4, 32], strides = [1, 1]} : vector<4x128xf32> to vector<4x32xf32>
    %133 = vector.extract_strided_slice %130 {offsets = [0, 64], sizes = [4, 32], strides = [1, 1]} : vector<4x128xf32> to vector<4x32xf32>
    %134 = vector.extract_strided_slice %129 {offsets = [0, 96], sizes = [4, 32], strides = [1, 1]} : vector<4x128xf32> to vector<4x32xf32>
    %135 = arith.mulf %132, %111 : vector<4x32xf32>
    %136 = arith.mulf %131, %133 : vector<4x32xf32>
    %137 = arith.addf %135, %136 : vector<4x32xf32>
    %138 = math.tanh %137 : vector<4x32xf32>
    %139 = arith.mulf %134, %138 : vector<4x32xf32>
    %140 = vector.extract_strided_slice %139 {offsets = [0, 0], sizes = [2, 32], strides = [1, 1]} : vector<4x32xf32> to vector<2x32xf32>
    %c6_52 = arith.constant 6 : index
    %c0_53 = arith.constant 0 : index
    %141 = vector.load %arg6[%c6_52, %c0_53] : memref<32x64xf32, #tpu.memory_space<vmem>>, vector<2x32xf32>
    tpu.vector_store %arg6[%c6_52, %c0_53], %140 {strides = array<i32>} : memref<32x64xf32, #tpu.memory_space<vmem>>, vector<2x32xf32>,
    %142 = vector.extract_strided_slice %139 {offsets = [2, 0], sizes = [2, 32], strides = [1, 1]} : vector<4x32xf32> to vector<2x32xf32>
    %c24_54 = arith.constant 24 : index
    %c32_55 = arith.constant 32 : index
    %143 = vector.load %arg6[%c24_54, %c32_55] : memref<32x64xf32, #tpu.memory_space<vmem>>, vector<2x32xf32>
    tpu.vector_store %arg6[%c24_54, %c32_55], %142 {strides = array<i32>} : memref<32x64xf32, #tpu.memory_space<vmem>>, vector<2x32xf32>,
    %c8 = arith.constant 8 : index
    %c0_56 = arith.constant 0 : index
    %144 = vector.load %arg4[%c8, %c0_56] : memref<32x128xf32, #tpu.memory_space<vmem>>, vector<2x128xf32>
    %c22 = arith.constant 22 : index
    %c0_57 = arith.constant 0 : index
    %145 = vector.load %arg5[%c22, %c0_57] : memref<32x128xf32, #tpu.memory_space<vmem>>, vector<2x128xf32>
    %146 = tpu.concatenate %144, %145 in 0 : vector<2x128xf32>, vector<2x128xf32> -> vector<4x128xf32>
    %147 = tpu.concatenate %139, %139 in 1 : vector<4x32xf32>, vector<4x32xf32> -> vector<4x64xf32>
    %148 = arith.mulf %147, %37 : vector<4x64xf32>
    %cst_58 = arith.constant dense<0.000000e+00> : vector<4x128xf32>
    %149 = tpu.matmul %148, %0, %cst_58 {dimension_numbers = #tpu.dot_dimension_numbers<[1], [0], [0], [1], [0, 0, 1, 1], [], []>} : vector<4x64xf32>, vector<64x128xf32>, vector<4x128xf32> -> vector<4x128xf32>
    %150 = arith.addf %146, %149 : vector<4x128xf32>
    %151 = arith.negf %150 : vector<4x128xf32>
    %152 = math.exp %151 : vector<4x128xf32>
    %cst_59 = arith.constant 1.000000e+00 : f32
    %153 = vector.broadcast %cst_59 : f32 to vector<4x128xf32>
    %154 = arith.addf %153, %152 : vector<4x128xf32>
    %155 = arith.divf %153, %154 : vector<4x128xf32>
    %156 = math.tanh %150 : vector<4x128xf32>
    %157 = vector.extract_strided_slice %155 {offsets = [0, 0], sizes = [4, 32], strides = [1, 1]} : vector<4x128xf32> to vector<4x32xf32>
    %158 = vector.extract_strided_slice %155 {offsets = [0, 32], sizes = [4, 32], strides = [1, 1]} : vector<4x128xf32> to vector<4x32xf32>
    %159 = vector.extract_strided_slice %156 {offsets = [0, 64], sizes = [4, 32], strides = [1, 1]} : vector<4x128xf32> to vector<4x32xf32>
    %160 = vector.extract_strided_slice %155 {offsets = [0, 96], sizes = [4, 32], strides = [1, 1]} : vector<4x128xf32> to vector<4x32xf32>
    %161 = arith.mulf %158, %137 : vector<4x32xf32>
    %162 = arith.mulf %157, %159 : vector<4x32xf32>
    %163 = arith.addf %161, %162 : vector<4x32xf32>
    %164 = math.tanh %163 : vector<4x32xf32>
    %165 = arith.mulf %160, %164 : vector<4x32xf32>
    %166 = vector.extract_strided_slice %165 {offsets = [0, 0], sizes = [2, 32], strides = [1, 1]} : vector<4x32xf32> to vector<2x32xf32>
    %c8_60 = arith.constant 8 : index
    %c0_61 = arith.constant 0 : index
    %167 = vector.load %arg6[%c8_60, %c0_61] : memref<32x64xf32, #tpu.memory_space<vmem>>, vector<2x32xf32>
    tpu.vector_store %arg6[%c8_60, %c0_61], %166 {strides = array<i32>} : memref<32x64xf32, #tpu.memory_space<vmem>>, vector<2x32xf32>,
    %168 = vector.extract_strided_slice %165 {offsets = [2, 0], sizes = [2, 32], strides = [1, 1]} : vector<4x32xf32> to vector<2x32xf32>
    %c22_62 = arith.constant 22 : index
    %c32_63 = arith.constant 32 : index
    %169 = vector.load %arg6[%c22_62, %c32_63] : memref<32x64xf32, #tpu.memory_space<vmem>>, vector<2x32xf32>
    tpu.vector_store %arg6[%c22_62, %c32_63], %168 {strides = array<i32>} : memref<32x64xf32, #tpu.memory_space<vmem>>, vector<2x32xf32>,
    %c10 = arith.constant 10 : index
    %c0_64 = arith.constant 0 : index
    %170 = vector.load %arg4[%c10, %c0_64] : memref<32x128xf32, #tpu.memory_space<vmem>>, vector<2x128xf32>
    %c20 = arith.constant 20 : index
    %c0_65 = arith.constant 0 : index
    %171 = vector.load %arg5[%c20, %c0_65] : memref<32x128xf32, #tpu.memory_space<vmem>>, vector<2x128xf32>
    %172 = tpu.concatenate %170, %171 in 0 : vector<2x128xf32>, vector<2x128xf32> -> vector<4x128xf32>
    %173 = tpu.concatenate %165, %165 in 1 : vector<4x32xf32>, vector<4x32xf32> -> vector<4x64xf32>
    %174 = arith.mulf %173, %37 : vector<4x64xf32>
    %cst_66 = arith.constant dense<0.000000e+00> : vector<4x128xf32>
    %175 = tpu.matmul %174, %0, %cst_66 {dimension_numbers = #tpu.dot_dimension_numbers<[1], [0], [0], [1], [0, 0, 1, 1], [], []>} : vector<4x64xf32>, vector<64x128xf32>, vector<4x128xf32> -> vector<4x128xf32>
    %176 = arith.addf %172, %175 : vector<4x128xf32>
    %177 = arith.negf %176 : vector<4x128xf32>
    %178 = math.exp %177 : vector<4x128xf32>
    %cst_67 = arith.constant 1.000000e+00 : f32
    %179 = vector.broadcast %cst_67 : f32 to vector<4x128xf32>
    %180 = arith.addf %179, %178 : vector<4x128xf32>
    %181 = arith.divf %179, %180 : vector<4x128xf32>
    %182 = math.tanh %176 : vector<4x128xf32>
    %183 = vector.extract_strided_slice %181 {offsets = [0, 0], sizes = [4, 32], strides = [1, 1]} : vector<4x128xf32> to vector<4x32xf32>
    %184 = vector.extract_strided_slice %181 {offsets = [0, 32], sizes = [4, 32], strides = [1, 1]} : vector<4x128xf32> to vector<4x32xf32>
    %185 = vector.extract_strided_slice %182 {offsets = [0, 64], sizes = [4, 32], strides = [1, 1]} : vector<4x128xf32> to vector<4x32xf32>
    %186 = vector.extract_strided_slice %181 {offsets = [0, 96], sizes = [4, 32], strides = [1, 1]} : vector<4x128xf32> to vector<4x32xf32>
    %187 = arith.mulf %184, %163 : vector<4x32xf32>
    %188 = arith.mulf %183, %185 : vector<4x32xf32>
    %189 = arith.addf %187, %188 : vector<4x32xf32>
    %190 = math.tanh %189 : vector<4x32xf32>
    %191 = arith.mulf %186, %190 : vector<4x32xf32>
    %192 = vector.extract_strided_slice %191 {offsets = [0, 0], sizes = [2, 32], strides = [1, 1]} : vector<4x32xf32> to vector<2x32xf32>
    %c10_68 = arith.constant 10 : index
    %c0_69 = arith.constant 0 : index
    %193 = vector.load %arg6[%c10_68, %c0_69] : memref<32x64xf32, #tpu.memory_space<vmem>>, vector<2x32xf32>
    tpu.vector_store %arg6[%c10_68, %c0_69], %192 {strides = array<i32>} : memref<32x64xf32, #tpu.memory_space<vmem>>, vector<2x32xf32>,
    %194 = vector.extract_strided_slice %191 {offsets = [2, 0], sizes = [2, 32], strides = [1, 1]} : vector<4x32xf32> to vector<2x32xf32>
    %c20_70 = arith.constant 20 : index
    %c32_71 = arith.constant 32 : index
    %195 = vector.load %arg6[%c20_70, %c32_71] : memref<32x64xf32, #tpu.memory_space<vmem>>, vector<2x32xf32>
    tpu.vector_store %arg6[%c20_70, %c32_71], %194 {strides = array<i32>} : memref<32x64xf32, #tpu.memory_space<vmem>>, vector<2x32xf32>,
    %c12 = arith.constant 12 : index
    %c0_72 = arith.constant 0 : index
    %196 = vector.load %arg4[%c12, %c0_72] : memref<32x128xf32, #tpu.memory_space<vmem>>, vector<2x128xf32>
    %c18 = arith.constant 18 : index
    %c0_73 = arith.constant 0 : index
    %197 = vector.load %arg5[%c18, %c0_73] : memref<32x128xf32, #tpu.memory_space<vmem>>, vector<2x128xf32>
    %198 = tpu.concatenate %196, %197 in 0 : vector<2x128xf32>, vector<2x128xf32> -> vector<4x128xf32>
    %199 = tpu.concatenate %191, %191 in 1 : vector<4x32xf32>, vector<4x32xf32> -> vector<4x64xf32>
    %200 = arith.mulf %199, %37 : vector<4x64xf32>
    %cst_74 = arith.constant dense<0.000000e+00> : vector<4x128xf32>
    %201 = tpu.matmul %200, %0, %cst_74 {dimension_numbers = #tpu.dot_dimension_numbers<[1], [0], [0], [1], [0, 0, 1, 1], [], []>} : vector<4x64xf32>, vector<64x128xf32>, vector<4x128xf32> -> vector<4x128xf32>
    %202 = arith.addf %198, %201 : vector<4x128xf32>
    %203 = arith.negf %202 : vector<4x128xf32>
    %204 = math.exp %203 : vector<4x128xf32>
    %cst_75 = arith.constant 1.000000e+00 : f32
    %205 = vector.broadcast %cst_75 : f32 to vector<4x128xf32>
    %206 = arith.addf %205, %204 : vector<4x128xf32>
    %207 = arith.divf %205, %206 : vector<4x128xf32>
    %208 = math.tanh %202 : vector<4x128xf32>
    %209 = vector.extract_strided_slice %207 {offsets = [0, 0], sizes = [4, 32], strides = [1, 1]} : vector<4x128xf32> to vector<4x32xf32>
    %210 = vector.extract_strided_slice %207 {offsets = [0, 32], sizes = [4, 32], strides = [1, 1]} : vector<4x128xf32> to vector<4x32xf32>
    %211 = vector.extract_strided_slice %208 {offsets = [0, 64], sizes = [4, 32], strides = [1, 1]} : vector<4x128xf32> to vector<4x32xf32>
    %212 = vector.extract_strided_slice %207 {offsets = [0, 96], sizes = [4, 32], strides = [1, 1]} : vector<4x128xf32> to vector<4x32xf32>
    %213 = arith.mulf %210, %189 : vector<4x32xf32>
    %214 = arith.mulf %209, %211 : vector<4x32xf32>
    %215 = arith.addf %213, %214 : vector<4x32xf32>
    %216 = math.tanh %215 : vector<4x32xf32>
    %217 = arith.mulf %212, %216 : vector<4x32xf32>
    %218 = vector.extract_strided_slice %217 {offsets = [0, 0], sizes = [2, 32], strides = [1, 1]} : vector<4x32xf32> to vector<2x32xf32>
    %c12_76 = arith.constant 12 : index
    %c0_77 = arith.constant 0 : index
    %219 = vector.load %arg6[%c12_76, %c0_77] : memref<32x64xf32, #tpu.memory_space<vmem>>, vector<2x32xf32>
    tpu.vector_store %arg6[%c12_76, %c0_77], %218 {strides = array<i32>} : memref<32x64xf32, #tpu.memory_space<vmem>>, vector<2x32xf32>,
    %220 = vector.extract_strided_slice %217 {offsets = [2, 0], sizes = [2, 32], strides = [1, 1]} : vector<4x32xf32> to vector<2x32xf32>
    %c18_78 = arith.constant 18 : index
    %c32_79 = arith.constant 32 : index
    %221 = vector.load %arg6[%c18_78, %c32_79] : memref<32x64xf32, #tpu.memory_space<vmem>>, vector<2x32xf32>
    tpu.vector_store %arg6[%c18_78, %c32_79], %220 {strides = array<i32>} : memref<32x64xf32, #tpu.memory_space<vmem>>, vector<2x32xf32>,
    %c14 = arith.constant 14 : index
    %c0_80 = arith.constant 0 : index
    %222 = vector.load %arg4[%c14, %c0_80] : memref<32x128xf32, #tpu.memory_space<vmem>>, vector<2x128xf32>
    %c16 = arith.constant 16 : index
    %c0_81 = arith.constant 0 : index
    %223 = vector.load %arg5[%c16, %c0_81] : memref<32x128xf32, #tpu.memory_space<vmem>>, vector<2x128xf32>
    %224 = tpu.concatenate %222, %223 in 0 : vector<2x128xf32>, vector<2x128xf32> -> vector<4x128xf32>
    %225 = tpu.concatenate %217, %217 in 1 : vector<4x32xf32>, vector<4x32xf32> -> vector<4x64xf32>
    %226 = arith.mulf %225, %37 : vector<4x64xf32>
    %cst_82 = arith.constant dense<0.000000e+00> : vector<4x128xf32>
    %227 = tpu.matmul %226, %0, %cst_82 {dimension_numbers = #tpu.dot_dimension_numbers<[1], [0], [0], [1], [0, 0, 1, 1], [], []>} : vector<4x64xf32>, vector<64x128xf32>, vector<4x128xf32> -> vector<4x128xf32>
    %228 = arith.addf %224, %227 : vector<4x128xf32>
    %229 = arith.negf %228 : vector<4x128xf32>
    %230 = math.exp %229 : vector<4x128xf32>
    %cst_83 = arith.constant 1.000000e+00 : f32
    %231 = vector.broadcast %cst_83 : f32 to vector<4x128xf32>
    %232 = arith.addf %231, %230 : vector<4x128xf32>
    %233 = arith.divf %231, %232 : vector<4x128xf32>
    %234 = math.tanh %228 : vector<4x128xf32>
    %235 = vector.extract_strided_slice %233 {offsets = [0, 0], sizes = [4, 32], strides = [1, 1]} : vector<4x128xf32> to vector<4x32xf32>
    %236 = vector.extract_strided_slice %233 {offsets = [0, 32], sizes = [4, 32], strides = [1, 1]} : vector<4x128xf32> to vector<4x32xf32>
    %237 = vector.extract_strided_slice %234 {offsets = [0, 64], sizes = [4, 32], strides = [1, 1]} : vector<4x128xf32> to vector<4x32xf32>
    %238 = vector.extract_strided_slice %233 {offsets = [0, 96], sizes = [4, 32], strides = [1, 1]} : vector<4x128xf32> to vector<4x32xf32>
    %239 = arith.mulf %236, %215 : vector<4x32xf32>
    %240 = arith.mulf %235, %237 : vector<4x32xf32>
    %241 = arith.addf %239, %240 : vector<4x32xf32>
    %242 = math.tanh %241 : vector<4x32xf32>
    %243 = arith.mulf %238, %242 : vector<4x32xf32>
    %244 = vector.extract_strided_slice %243 {offsets = [0, 0], sizes = [2, 32], strides = [1, 1]} : vector<4x32xf32> to vector<2x32xf32>
    %c14_84 = arith.constant 14 : index
    %c0_85 = arith.constant 0 : index
    %245 = vector.load %arg6[%c14_84, %c0_85] : memref<32x64xf32, #tpu.memory_space<vmem>>, vector<2x32xf32>
    tpu.vector_store %arg6[%c14_84, %c0_85], %244 {strides = array<i32>} : memref<32x64xf32, #tpu.memory_space<vmem>>, vector<2x32xf32>,
    %246 = vector.extract_strided_slice %243 {offsets = [2, 0], sizes = [2, 32], strides = [1, 1]} : vector<4x32xf32> to vector<2x32xf32>
    %c16_86 = arith.constant 16 : index
    %c32_87 = arith.constant 32 : index
    %247 = vector.load %arg6[%c16_86, %c32_87] : memref<32x64xf32, #tpu.memory_space<vmem>>, vector<2x32xf32>
    tpu.vector_store %arg6[%c16_86, %c32_87], %246 {strides = array<i32>} : memref<32x64xf32, #tpu.memory_space<vmem>>, vector<2x32xf32>,
    %c16_88 = arith.constant 16 : index
    %c0_89 = arith.constant 0 : index
    %248 = vector.load %arg4[%c16_88, %c0_89] : memref<32x128xf32, #tpu.memory_space<vmem>>, vector<2x128xf32>
    %c14_90 = arith.constant 14 : index
    %c0_91 = arith.constant 0 : index
    %249 = vector.load %arg5[%c14_90, %c0_91] : memref<32x128xf32, #tpu.memory_space<vmem>>, vector<2x128xf32>
    %250 = tpu.concatenate %248, %249 in 0 : vector<2x128xf32>, vector<2x128xf32> -> vector<4x128xf32>
    %251 = tpu.concatenate %243, %243 in 1 : vector<4x32xf32>, vector<4x32xf32> -> vector<4x64xf32>
    %252 = arith.mulf %251, %37 : vector<4x64xf32>
    %cst_92 = arith.constant dense<0.000000e+00> : vector<4x128xf32>
    %253 = tpu.matmul %252, %0, %cst_92 {dimension_numbers = #tpu.dot_dimension_numbers<[1], [0], [0], [1], [0, 0, 1, 1], [], []>} : vector<4x64xf32>, vector<64x128xf32>, vector<4x128xf32> -> vector<4x128xf32>
    %254 = arith.addf %250, %253 : vector<4x128xf32>
    %255 = arith.negf %254 : vector<4x128xf32>
    %256 = math.exp %255 : vector<4x128xf32>
    %cst_93 = arith.constant 1.000000e+00 : f32
    %257 = vector.broadcast %cst_93 : f32 to vector<4x128xf32>
    %258 = arith.addf %257, %256 : vector<4x128xf32>
    %259 = arith.divf %257, %258 : vector<4x128xf32>
    %260 = math.tanh %254 : vector<4x128xf32>
    %261 = vector.extract_strided_slice %259 {offsets = [0, 0], sizes = [4, 32], strides = [1, 1]} : vector<4x128xf32> to vector<4x32xf32>
    %262 = vector.extract_strided_slice %259 {offsets = [0, 32], sizes = [4, 32], strides = [1, 1]} : vector<4x128xf32> to vector<4x32xf32>
    %263 = vector.extract_strided_slice %260 {offsets = [0, 64], sizes = [4, 32], strides = [1, 1]} : vector<4x128xf32> to vector<4x32xf32>
    %264 = vector.extract_strided_slice %259 {offsets = [0, 96], sizes = [4, 32], strides = [1, 1]} : vector<4x128xf32> to vector<4x32xf32>
    %265 = arith.mulf %262, %241 : vector<4x32xf32>
    %266 = arith.mulf %261, %263 : vector<4x32xf32>
    %267 = arith.addf %265, %266 : vector<4x32xf32>
    %268 = math.tanh %267 : vector<4x32xf32>
    %269 = arith.mulf %264, %268 : vector<4x32xf32>
    %270 = vector.extract_strided_slice %269 {offsets = [0, 0], sizes = [2, 32], strides = [1, 1]} : vector<4x32xf32> to vector<2x32xf32>
    %c16_94 = arith.constant 16 : index
    %c0_95 = arith.constant 0 : index
    %271 = vector.load %arg6[%c16_94, %c0_95] : memref<32x64xf32, #tpu.memory_space<vmem>>, vector<2x32xf32>
    tpu.vector_store %arg6[%c16_94, %c0_95], %270 {strides = array<i32>} : memref<32x64xf32, #tpu.memory_space<vmem>>, vector<2x32xf32>,
    %272 = vector.extract_strided_slice %269 {offsets = [2, 0], sizes = [2, 32], strides = [1, 1]} : vector<4x32xf32> to vector<2x32xf32>
    %c14_96 = arith.constant 14 : index
    %c32_97 = arith.constant 32 : index
    %273 = vector.load %arg6[%c14_96, %c32_97] : memref<32x64xf32, #tpu.memory_space<vmem>>, vector<2x32xf32>
    tpu.vector_store %arg6[%c14_96, %c32_97], %272 {strides = array<i32>} : memref<32x64xf32, #tpu.memory_space<vmem>>, vector<2x32xf32>,
    %c18_98 = arith.constant 18 : index
    %c0_99 = arith.constant 0 : index
    %274 = vector.load %arg4[%c18_98, %c0_99] : memref<32x128xf32, #tpu.memory_space<vmem>>, vector<2x128xf32>
    %c12_100 = arith.constant 12 : index
    %c0_101 = arith.constant 0 : index
    %275 = vector.load %arg5[%c12_100, %c0_101] : memref<32x128xf32, #tpu.memory_space<vmem>>, vector<2x128xf32>
    %276 = tpu.concatenate %274, %275 in 0 : vector<2x128xf32>, vector<2x128xf32> -> vector<4x128xf32>
    %277 = tpu.concatenate %269, %269 in 1 : vector<4x32xf32>, vector<4x32xf32> -> vector<4x64xf32>
    %278 = arith.mulf %277, %37 : vector<4x64xf32>
    %cst_102 = arith.constant dense<0.000000e+00> : vector<4x128xf32>
    %279 = tpu.matmul %278, %0, %cst_102 {dimension_numbers = #tpu.dot_dimension_numbers<[1], [0], [0], [1], [0, 0, 1, 1], [], []>} : vector<4x64xf32>, vector<64x128xf32>, vector<4x128xf32> -> vector<4x128xf32>
    %280 = arith.addf %276, %279 : vector<4x128xf32>
    %281 = arith.negf %280 : vector<4x128xf32>
    %282 = math.exp %281 : vector<4x128xf32>
    %cst_103 = arith.constant 1.000000e+00 : f32
    %283 = vector.broadcast %cst_103 : f32 to vector<4x128xf32>
    %284 = arith.addf %283, %282 : vector<4x128xf32>
    %285 = arith.divf %283, %284 : vector<4x128xf32>
    %286 = math.tanh %280 : vector<4x128xf32>
    %287 = vector.extract_strided_slice %285 {offsets = [0, 0], sizes = [4, 32], strides = [1, 1]} : vector<4x128xf32> to vector<4x32xf32>
    %288 = vector.extract_strided_slice %285 {offsets = [0, 32], sizes = [4, 32], strides = [1, 1]} : vector<4x128xf32> to vector<4x32xf32>
    %289 = vector.extract_strided_slice %286 {offsets = [0, 64], sizes = [4, 32], strides = [1, 1]} : vector<4x128xf32> to vector<4x32xf32>
    %290 = vector.extract_strided_slice %285 {offsets = [0, 96], sizes = [4, 32], strides = [1, 1]} : vector<4x128xf32> to vector<4x32xf32>
    %291 = arith.mulf %288, %267 : vector<4x32xf32>
    %292 = arith.mulf %287, %289 : vector<4x32xf32>
    %293 = arith.addf %291, %292 : vector<4x32xf32>
    %294 = math.tanh %293 : vector<4x32xf32>
    %295 = arith.mulf %290, %294 : vector<4x32xf32>
    %296 = vector.extract_strided_slice %295 {offsets = [0, 0], sizes = [2, 32], strides = [1, 1]} : vector<4x32xf32> to vector<2x32xf32>
    %c18_104 = arith.constant 18 : index
    %c0_105 = arith.constant 0 : index
    %297 = vector.load %arg6[%c18_104, %c0_105] : memref<32x64xf32, #tpu.memory_space<vmem>>, vector<2x32xf32>
    tpu.vector_store %arg6[%c18_104, %c0_105], %296 {strides = array<i32>} : memref<32x64xf32, #tpu.memory_space<vmem>>, vector<2x32xf32>,
    %298 = vector.extract_strided_slice %295 {offsets = [2, 0], sizes = [2, 32], strides = [1, 1]} : vector<4x32xf32> to vector<2x32xf32>
    %c12_106 = arith.constant 12 : index
    %c32_107 = arith.constant 32 : index
    %299 = vector.load %arg6[%c12_106, %c32_107] : memref<32x64xf32, #tpu.memory_space<vmem>>, vector<2x32xf32>
    tpu.vector_store %arg6[%c12_106, %c32_107], %298 {strides = array<i32>} : memref<32x64xf32, #tpu.memory_space<vmem>>, vector<2x32xf32>,
    %c20_108 = arith.constant 20 : index
    %c0_109 = arith.constant 0 : index
    %300 = vector.load %arg4[%c20_108, %c0_109] : memref<32x128xf32, #tpu.memory_space<vmem>>, vector<2x128xf32>
    %c10_110 = arith.constant 10 : index
    %c0_111 = arith.constant 0 : index
    %301 = vector.load %arg5[%c10_110, %c0_111] : memref<32x128xf32, #tpu.memory_space<vmem>>, vector<2x128xf32>
    %302 = tpu.concatenate %300, %301 in 0 : vector<2x128xf32>, vector<2x128xf32> -> vector<4x128xf32>
    %303 = tpu.concatenate %295, %295 in 1 : vector<4x32xf32>, vector<4x32xf32> -> vector<4x64xf32>
    %304 = arith.mulf %303, %37 : vector<4x64xf32>
    %cst_112 = arith.constant dense<0.000000e+00> : vector<4x128xf32>
    %305 = tpu.matmul %304, %0, %cst_112 {dimension_numbers = #tpu.dot_dimension_numbers<[1], [0], [0], [1], [0, 0, 1, 1], [], []>} : vector<4x64xf32>, vector<64x128xf32>, vector<4x128xf32> -> vector<4x128xf32>
    %306 = arith.addf %302, %305 : vector<4x128xf32>
    %307 = arith.negf %306 : vector<4x128xf32>
    %308 = math.exp %307 : vector<4x128xf32>
    %cst_113 = arith.constant 1.000000e+00 : f32
    %309 = vector.broadcast %cst_113 : f32 to vector<4x128xf32>
    %310 = arith.addf %309, %308 : vector<4x128xf32>
    %311 = arith.divf %309, %310 : vector<4x128xf32>
    %312 = math.tanh %306 : vector<4x128xf32>
    %313 = vector.extract_strided_slice %311 {offsets = [0, 0], sizes = [4, 32], strides = [1, 1]} : vector<4x128xf32> to vector<4x32xf32>
    %314 = vector.extract_strided_slice %311 {offsets = [0, 32], sizes = [4, 32], strides = [1, 1]} : vector<4x128xf32> to vector<4x32xf32>
    %315 = vector.extract_strided_slice %312 {offsets = [0, 64], sizes = [4, 32], strides = [1, 1]} : vector<4x128xf32> to vector<4x32xf32>
    %316 = vector.extract_strided_slice %311 {offsets = [0, 96], sizes = [4, 32], strides = [1, 1]} : vector<4x128xf32> to vector<4x32xf32>
    %317 = arith.mulf %314, %293 : vector<4x32xf32>
    %318 = arith.mulf %313, %315 : vector<4x32xf32>
    %319 = arith.addf %317, %318 : vector<4x32xf32>
    %320 = math.tanh %319 : vector<4x32xf32>
    %321 = arith.mulf %316, %320 : vector<4x32xf32>
    %322 = vector.extract_strided_slice %321 {offsets = [0, 0], sizes = [2, 32], strides = [1, 1]} : vector<4x32xf32> to vector<2x32xf32>
    %c20_114 = arith.constant 20 : index
    %c0_115 = arith.constant 0 : index
    %323 = vector.load %arg6[%c20_114, %c0_115] : memref<32x64xf32, #tpu.memory_space<vmem>>, vector<2x32xf32>
    tpu.vector_store %arg6[%c20_114, %c0_115], %322 {strides = array<i32>} : memref<32x64xf32, #tpu.memory_space<vmem>>, vector<2x32xf32>,
    %324 = vector.extract_strided_slice %321 {offsets = [2, 0], sizes = [2, 32], strides = [1, 1]} : vector<4x32xf32> to vector<2x32xf32>
    %c10_116 = arith.constant 10 : index
    %c32_117 = arith.constant 32 : index
    %325 = vector.load %arg6[%c10_116, %c32_117] : memref<32x64xf32, #tpu.memory_space<vmem>>, vector<2x32xf32>
    tpu.vector_store %arg6[%c10_116, %c32_117], %324 {strides = array<i32>} : memref<32x64xf32, #tpu.memory_space<vmem>>, vector<2x32xf32>,
    %c22_118 = arith.constant 22 : index
    %c0_119 = arith.constant 0 : index
    %326 = vector.load %arg4[%c22_118, %c0_119] : memref<32x128xf32, #tpu.memory_space<vmem>>, vector<2x128xf32>
    %c8_120 = arith.constant 8 : index
    %c0_121 = arith.constant 0 : index
    %327 = vector.load %arg5[%c8_120, %c0_121] : memref<32x128xf32, #tpu.memory_space<vmem>>, vector<2x128xf32>
    %328 = tpu.concatenate %326, %327 in 0 : vector<2x128xf32>, vector<2x128xf32> -> vector<4x128xf32>
    %329 = tpu.concatenate %321, %321 in 1 : vector<4x32xf32>, vector<4x32xf32> -> vector<4x64xf32>
    %330 = arith.mulf %329, %37 : vector<4x64xf32>
    %cst_122 = arith.constant dense<0.000000e+00> : vector<4x128xf32>
    %331 = tpu.matmul %330, %0, %cst_122 {dimension_numbers = #tpu.dot_dimension_numbers<[1], [0], [0], [1], [0, 0, 1, 1], [], []>} : vector<4x64xf32>, vector<64x128xf32>, vector<4x128xf32> -> vector<4x128xf32>
    %332 = arith.addf %328, %331 : vector<4x128xf32>
    %333 = arith.negf %332 : vector<4x128xf32>
    %334 = math.exp %333 : vector<4x128xf32>
    %cst_123 = arith.constant 1.000000e+00 : f32
    %335 = vector.broadcast %cst_123 : f32 to vector<4x128xf32>
    %336 = arith.addf %335, %334 : vector<4x128xf32>
    %337 = arith.divf %335, %336 : vector<4x128xf32>
    %338 = math.tanh %332 : vector<4x128xf32>
    %339 = vector.extract_strided_slice %337 {offsets = [0, 0], sizes = [4, 32], strides = [1, 1]} : vector<4x128xf32> to vector<4x32xf32>
    %340 = vector.extract_strided_slice %337 {offsets = [0, 32], sizes = [4, 32], strides = [1, 1]} : vector<4x128xf32> to vector<4x32xf32>
    %341 = vector.extract_strided_slice %338 {offsets = [0, 64], sizes = [4, 32], strides = [1, 1]} : vector<4x128xf32> to vector<4x32xf32>
    %342 = vector.extract_strided_slice %337 {offsets = [0, 96], sizes = [4, 32], strides = [1, 1]} : vector<4x128xf32> to vector<4x32xf32>
    %343 = arith.mulf %340, %319 : vector<4x32xf32>
    %344 = arith.mulf %339, %341 : vector<4x32xf32>
    %345 = arith.addf %343, %344 : vector<4x32xf32>
    %346 = math.tanh %345 : vector<4x32xf32>
    %347 = arith.mulf %342, %346 : vector<4x32xf32>
    %348 = vector.extract_strided_slice %347 {offsets = [0, 0], sizes = [2, 32], strides = [1, 1]} : vector<4x32xf32> to vector<2x32xf32>
    %c22_124 = arith.constant 22 : index
    %c0_125 = arith.constant 0 : index
    %349 = vector.load %arg6[%c22_124, %c0_125] : memref<32x64xf32, #tpu.memory_space<vmem>>, vector<2x32xf32>
    tpu.vector_store %arg6[%c22_124, %c0_125], %348 {strides = array<i32>} : memref<32x64xf32, #tpu.memory_space<vmem>>, vector<2x32xf32>,
    %350 = vector.extract_strided_slice %347 {offsets = [2, 0], sizes = [2, 32], strides = [1, 1]} : vector<4x32xf32> to vector<2x32xf32>
    %c8_126 = arith.constant 8 : index
    %c32_127 = arith.constant 32 : index
    %351 = vector.load %arg6[%c8_126, %c32_127] : memref<32x64xf32, #tpu.memory_space<vmem>>, vector<2x32xf32>
    tpu.vector_store %arg6[%c8_126, %c32_127], %350 {strides = array<i32>} : memref<32x64xf32, #tpu.memory_space<vmem>>, vector<2x32xf32>,
    %c24_128 = arith.constant 24 : index
    %c0_129 = arith.constant 0 : index
    %352 = vector.load %arg4[%c24_128, %c0_129] : memref<32x128xf32, #tpu.memory_space<vmem>>, vector<2x128xf32>
    %c6_130 = arith.constant 6 : index
    %c0_131 = arith.constant 0 : index
    %353 = vector.load %arg5[%c6_130, %c0_131] : memref<32x128xf32, #tpu.memory_space<vmem>>, vector<2x128xf32>
    %354 = tpu.concatenate %352, %353 in 0 : vector<2x128xf32>, vector<2x128xf32> -> vector<4x128xf32>
    %355 = tpu.concatenate %347, %347 in 1 : vector<4x32xf32>, vector<4x32xf32> -> vector<4x64xf32>
    %356 = arith.mulf %355, %37 : vector<4x64xf32>
    %cst_132 = arith.constant dense<0.000000e+00> : vector<4x128xf32>
    %357 = tpu.matmul %356, %0, %cst_132 {dimension_numbers = #tpu.dot_dimension_numbers<[1], [0], [0], [1], [0, 0, 1, 1], [], []>} : vector<4x64xf32>, vector<64x128xf32>, vector<4x128xf32> -> vector<4x128xf32>
    %358 = arith.addf %354, %357 : vector<4x128xf32>
    %359 = arith.negf %358 : vector<4x128xf32>
    %360 = math.exp %359 : vector<4x128xf32>
    %cst_133 = arith.constant 1.000000e+00 : f32
    %361 = vector.broadcast %cst_133 : f32 to vector<4x128xf32>
    %362 = arith.addf %361, %360 : vector<4x128xf32>
    %363 = arith.divf %361, %362 : vector<4x128xf32>
    %364 = math.tanh %358 : vector<4x128xf32>
    %365 = vector.extract_strided_slice %363 {offsets = [0, 0], sizes = [4, 32], strides = [1, 1]} : vector<4x128xf32> to vector<4x32xf32>
    %366 = vector.extract_strided_slice %363 {offsets = [0, 32], sizes = [4, 32], strides = [1, 1]} : vector<4x128xf32> to vector<4x32xf32>
    %367 = vector.extract_strided_slice %364 {offsets = [0, 64], sizes = [4, 32], strides = [1, 1]} : vector<4x128xf32> to vector<4x32xf32>
    %368 = vector.extract_strided_slice %363 {offsets = [0, 96], sizes = [4, 32], strides = [1, 1]} : vector<4x128xf32> to vector<4x32xf32>
    %369 = arith.mulf %366, %345 : vector<4x32xf32>
    %370 = arith.mulf %365, %367 : vector<4x32xf32>
    %371 = arith.addf %369, %370 : vector<4x32xf32>
    %372 = math.tanh %371 : vector<4x32xf32>
    %373 = arith.mulf %368, %372 : vector<4x32xf32>
    %374 = vector.extract_strided_slice %373 {offsets = [0, 0], sizes = [2, 32], strides = [1, 1]} : vector<4x32xf32> to vector<2x32xf32>
    %c24_134 = arith.constant 24 : index
    %c0_135 = arith.constant 0 : index
    %375 = vector.load %arg6[%c24_134, %c0_135] : memref<32x64xf32, #tpu.memory_space<vmem>>, vector<2x32xf32>
    tpu.vector_store %arg6[%c24_134, %c0_135], %374 {strides = array<i32>} : memref<32x64xf32, #tpu.memory_space<vmem>>, vector<2x32xf32>,
    %376 = vector.extract_strided_slice %373 {offsets = [2, 0], sizes = [2, 32], strides = [1, 1]} : vector<4x32xf32> to vector<2x32xf32>
    %c6_136 = arith.constant 6 : index
    %c32_137 = arith.constant 32 : index
    %377 = vector.load %arg6[%c6_136, %c32_137] : memref<32x64xf32, #tpu.memory_space<vmem>>, vector<2x32xf32>
    tpu.vector_store %arg6[%c6_136, %c32_137], %376 {strides = array<i32>} : memref<32x64xf32, #tpu.memory_space<vmem>>, vector<2x32xf32>,
    %c26_138 = arith.constant 26 : index
    %c0_139 = arith.constant 0 : index
    %378 = vector.load %arg4[%c26_138, %c0_139] : memref<32x128xf32, #tpu.memory_space<vmem>>, vector<2x128xf32>
    %c4_140 = arith.constant 4 : index
    %c0_141 = arith.constant 0 : index
    %379 = vector.load %arg5[%c4_140, %c0_141] : memref<32x128xf32, #tpu.memory_space<vmem>>, vector<2x128xf32>
    %380 = tpu.concatenate %378, %379 in 0 : vector<2x128xf32>, vector<2x128xf32> -> vector<4x128xf32>
    %381 = tpu.concatenate %373, %373 in 1 : vector<4x32xf32>, vector<4x32xf32> -> vector<4x64xf32>
    %382 = arith.mulf %381, %37 : vector<4x64xf32>
    %cst_142 = arith.constant dense<0.000000e+00> : vector<4x128xf32>
    %383 = tpu.matmul %382, %0, %cst_142 {dimension_numbers = #tpu.dot_dimension_numbers<[1], [0], [0], [1], [0, 0, 1, 1], [], []>} : vector<4x64xf32>, vector<64x128xf32>, vector<4x128xf32> -> vector<4x128xf32>
    %384 = arith.addf %380, %383 : vector<4x128xf32>
    %385 = arith.negf %384 : vector<4x128xf32>
    %386 = math.exp %385 : vector<4x128xf32>
    %cst_143 = arith.constant 1.000000e+00 : f32
    %387 = vector.broadcast %cst_143 : f32 to vector<4x128xf32>
    %388 = arith.addf %387, %386 : vector<4x128xf32>
    %389 = arith.divf %387, %388 : vector<4x128xf32>
    %390 = math.tanh %384 : vector<4x128xf32>
    %391 = vector.extract_strided_slice %389 {offsets = [0, 0], sizes = [4, 32], strides = [1, 1]} : vector<4x128xf32> to vector<4x32xf32>
    %392 = vector.extract_strided_slice %389 {offsets = [0, 32], sizes = [4, 32], strides = [1, 1]} : vector<4x128xf32> to vector<4x32xf32>
    %393 = vector.extract_strided_slice %390 {offsets = [0, 64], sizes = [4, 32], strides = [1, 1]} : vector<4x128xf32> to vector<4x32xf32>
    %394 = vector.extract_strided_slice %389 {offsets = [0, 96], sizes = [4, 32], strides = [1, 1]} : vector<4x128xf32> to vector<4x32xf32>
    %395 = arith.mulf %392, %371 : vector<4x32xf32>
    %396 = arith.mulf %391, %393 : vector<4x32xf32>
    %397 = arith.addf %395, %396 : vector<4x32xf32>
    %398 = math.tanh %397 : vector<4x32xf32>
    %399 = arith.mulf %394, %398 : vector<4x32xf32>
    %400 = vector.extract_strided_slice %399 {offsets = [0, 0], sizes = [2, 32], strides = [1, 1]} : vector<4x32xf32> to vector<2x32xf32>
    %c26_144 = arith.constant 26 : index
    %c0_145 = arith.constant 0 : index
    %401 = vector.load %arg6[%c26_144, %c0_145] : memref<32x64xf32, #tpu.memory_space<vmem>>, vector<2x32xf32>
    tpu.vector_store %arg6[%c26_144, %c0_145], %400 {strides = array<i32>} : memref<32x64xf32, #tpu.memory_space<vmem>>, vector<2x32xf32>,
    %402 = vector.extract_strided_slice %399 {offsets = [2, 0], sizes = [2, 32], strides = [1, 1]} : vector<4x32xf32> to vector<2x32xf32>
    %c4_146 = arith.constant 4 : index
    %c32_147 = arith.constant 32 : index
    %403 = vector.load %arg6[%c4_146, %c32_147] : memref<32x64xf32, #tpu.memory_space<vmem>>, vector<2x32xf32>
    tpu.vector_store %arg6[%c4_146, %c32_147], %402 {strides = array<i32>} : memref<32x64xf32, #tpu.memory_space<vmem>>, vector<2x32xf32>,
    %c28_148 = arith.constant 28 : index
    %c0_149 = arith.constant 0 : index
    %404 = vector.load %arg4[%c28_148, %c0_149] : memref<32x128xf32, #tpu.memory_space<vmem>>, vector<2x128xf32>
    %c2_150 = arith.constant 2 : index
    %c0_151 = arith.constant 0 : index
    %405 = vector.load %arg5[%c2_150, %c0_151] : memref<32x128xf32, #tpu.memory_space<vmem>>, vector<2x128xf32>
    %406 = tpu.concatenate %404, %405 in 0 : vector<2x128xf32>, vector<2x128xf32> -> vector<4x128xf32>
    %407 = tpu.concatenate %399, %399 in 1 : vector<4x32xf32>, vector<4x32xf32> -> vector<4x64xf32>
    %408 = arith.mulf %407, %37 : vector<4x64xf32>
    %cst_152 = arith.constant dense<0.000000e+00> : vector<4x128xf32>
    %409 = tpu.matmul %408, %0, %cst_152 {dimension_numbers = #tpu.dot_dimension_numbers<[1], [0], [0], [1], [0, 0, 1, 1], [], []>} : vector<4x64xf32>, vector<64x128xf32>, vector<4x128xf32> -> vector<4x128xf32>
    %410 = arith.addf %406, %409 : vector<4x128xf32>
    %411 = arith.negf %410 : vector<4x128xf32>
    %412 = math.exp %411 : vector<4x128xf32>
    %cst_153 = arith.constant 1.000000e+00 : f32
    %413 = vector.broadcast %cst_153 : f32 to vector<4x128xf32>
    %414 = arith.addf %413, %412 : vector<4x128xf32>
    %415 = arith.divf %413, %414 : vector<4x128xf32>
    %416 = math.tanh %410 : vector<4x128xf32>
    %417 = vector.extract_strided_slice %415 {offsets = [0, 0], sizes = [4, 32], strides = [1, 1]} : vector<4x128xf32> to vector<4x32xf32>
    %418 = vector.extract_strided_slice %415 {offsets = [0, 32], sizes = [4, 32], strides = [1, 1]} : vector<4x128xf32> to vector<4x32xf32>
    %419 = vector.extract_strided_slice %416 {offsets = [0, 64], sizes = [4, 32], strides = [1, 1]} : vector<4x128xf32> to vector<4x32xf32>
    %420 = vector.extract_strided_slice %415 {offsets = [0, 96], sizes = [4, 32], strides = [1, 1]} : vector<4x128xf32> to vector<4x32xf32>
    %421 = arith.mulf %418, %397 : vector<4x32xf32>
    %422 = arith.mulf %417, %419 : vector<4x32xf32>
    %423 = arith.addf %421, %422 : vector<4x32xf32>
    %424 = math.tanh %423 : vector<4x32xf32>
    %425 = arith.mulf %420, %424 : vector<4x32xf32>
    %426 = vector.extract_strided_slice %425 {offsets = [0, 0], sizes = [2, 32], strides = [1, 1]} : vector<4x32xf32> to vector<2x32xf32>
    %c28_154 = arith.constant 28 : index
    %c0_155 = arith.constant 0 : index
    %427 = vector.load %arg6[%c28_154, %c0_155] : memref<32x64xf32, #tpu.memory_space<vmem>>, vector<2x32xf32>
    tpu.vector_store %arg6[%c28_154, %c0_155], %426 {strides = array<i32>} : memref<32x64xf32, #tpu.memory_space<vmem>>, vector<2x32xf32>,
    %428 = vector.extract_strided_slice %425 {offsets = [2, 0], sizes = [2, 32], strides = [1, 1]} : vector<4x32xf32> to vector<2x32xf32>
    %c2_156 = arith.constant 2 : index
    %c32_157 = arith.constant 32 : index
    %429 = vector.load %arg6[%c2_156, %c32_157] : memref<32x64xf32, #tpu.memory_space<vmem>>, vector<2x32xf32>
    tpu.vector_store %arg6[%c2_156, %c32_157], %428 {strides = array<i32>} : memref<32x64xf32, #tpu.memory_space<vmem>>, vector<2x32xf32>,
    %c30_158 = arith.constant 30 : index
    %c0_159 = arith.constant 0 : index
    %430 = vector.load %arg4[%c30_158, %c0_159] : memref<32x128xf32, #tpu.memory_space<vmem>>, vector<2x128xf32>
    %c0_160 = arith.constant 0 : index
    %c0_161 = arith.constant 0 : index
    %431 = vector.load %arg5[%c0_160, %c0_161] : memref<32x128xf32, #tpu.memory_space<vmem>>, vector<2x128xf32>
    %432 = tpu.concatenate %430, %431 in 0 : vector<2x128xf32>, vector<2x128xf32> -> vector<4x128xf32>
    %433 = tpu.concatenate %425, %425 in 1 : vector<4x32xf32>, vector<4x32xf32> -> vector<4x64xf32>
    %434 = arith.mulf %433, %37 : vector<4x64xf32>
    %cst_162 = arith.constant dense<0.000000e+00> : vector<4x128xf32>
    %435 = tpu.matmul %434, %0, %cst_162 {dimension_numbers = #tpu.dot_dimension_numbers<[1], [0], [0], [1], [0, 0, 1, 1], [], []>} : vector<4x64xf32>, vector<64x128xf32>, vector<4x128xf32> -> vector<4x128xf32>
    %436 = arith.addf %432, %435 : vector<4x128xf32>
    %437 = arith.negf %436 : vector<4x128xf32>
    %438 = math.exp %437 : vector<4x128xf32>
    %cst_163 = arith.constant 1.000000e+00 : f32
    %439 = vector.broadcast %cst_163 : f32 to vector<4x128xf32>
    %440 = arith.addf %439, %438 : vector<4x128xf32>
    %441 = arith.divf %439, %440 : vector<4x128xf32>
    %442 = math.tanh %436 : vector<4x128xf32>
    %443 = vector.extract_strided_slice %441 {offsets = [0, 0], sizes = [4, 32], strides = [1, 1]} : vector<4x128xf32> to vector<4x32xf32>
    %444 = vector.extract_strided_slice %441 {offsets = [0, 32], sizes = [4, 32], strides = [1, 1]} : vector<4x128xf32> to vector<4x32xf32>
    %445 = vector.extract_strided_slice %442 {offsets = [0, 64], sizes = [4, 32], strides = [1, 1]} : vector<4x128xf32> to vector<4x32xf32>
    %446 = vector.extract_strided_slice %441 {offsets = [0, 96], sizes = [4, 32], strides = [1, 1]} : vector<4x128xf32> to vector<4x32xf32>
    %447 = arith.mulf %444, %423 : vector<4x32xf32>
    %448 = arith.mulf %443, %445 : vector<4x32xf32>
    %449 = arith.addf %447, %448 : vector<4x32xf32>
    %450 = math.tanh %449 : vector<4x32xf32>
    %451 = arith.mulf %446, %450 : vector<4x32xf32>
    %452 = vector.extract_strided_slice %451 {offsets = [0, 0], sizes = [2, 32], strides = [1, 1]} : vector<4x32xf32> to vector<2x32xf32>
    %c30_164 = arith.constant 30 : index
    %c0_165 = arith.constant 0 : index
    %453 = vector.load %arg6[%c30_164, %c0_165] : memref<32x64xf32, #tpu.memory_space<vmem>>, vector<2x32xf32>
    tpu.vector_store %arg6[%c30_164, %c0_165], %452 {strides = array<i32>} : memref<32x64xf32, #tpu.memory_space<vmem>>, vector<2x32xf32>,
    %454 = vector.extract_strided_slice %451 {offsets = [2, 0], sizes = [2, 32], strides = [1, 1]} : vector<4x32xf32> to vector<2x32xf32>
    %c0_166 = arith.constant 0 : index
    %c32_167 = arith.constant 32 : index
    %455 = vector.load %arg6[%c0_166, %c32_167] : memref<32x64xf32, #tpu.memory_space<vmem>>, vector<2x32xf32>
    tpu.vector_store %arg6[%c0_166, %c32_167], %454 {strides = array<i32>} : memref<32x64xf32, #tpu.memory_space<vmem>>, vector<2x32xf32>,
    %c0_168 = arith.constant 0 : index
    %c0_169 = arith.constant 0 : index
    %456 = vector.load %arg6[%c0_168, %c0_169] : memref<32x64xf32, #tpu.memory_space<vmem>>, vector<32x64xf32>
    %cst_170 = arith.constant dense<0.000000e+00> : vector<32x128xf32>
    %457 = tpu.matmul %456, %5, %cst_170 {dimension_numbers = #tpu.dot_dimension_numbers<[1], [0], [0], [1], [0, 0, 1, 1], [], []>} : vector<32x64xf32>, vector<64x128xf32>, vector<32x128xf32> -> vector<32x128xf32>
    %458 = vector.broadcast %6 : vector<1x128xf32> to vector<32x128xf32>
    %459 = arith.addf %457, %458 : vector<32x128xf32>
    %c0_171 = arith.constant 0 : index
    %c0_172 = arith.constant 0 : index
    %460 = vector.load %arg7[%c0_171, %c0_172] : memref<32x128xf32, #tpu.memory_space<vmem>>, vector<32x128xf32>
    tpu.vector_store %arg7[%c0_171, %c0_172], %459 {strides = array<i32>} : memref<32x128xf32, #tpu.memory_space<vmem>>, vector<32x128xf32>,
    %cst_173 = arith.constant 0.000000e+00 : f32
    %461 = vector.broadcast %cst_173 : f32 to vector<2x32xf32>
    %cst_174 = arith.constant 0.000000e+00 : f32
    %462 = vector.broadcast %cst_174 : f32 to vector<2x32xf32>
    %c0_175 = arith.constant 0 : index
    %c0_176 = arith.constant 0 : index
    %463 = vector.load %arg7[%c0_175, %c0_176] : memref<32x128xf32, #tpu.memory_space<vmem>>, vector<2x128xf32>
    %cst_177 = arith.constant dense<0.000000e+00> : vector<2x128xf32>
    %464 = tpu.matmul %461, %7, %cst_177 {dimension_numbers = #tpu.dot_dimension_numbers<[1], [0], [0], [1], [0, 0, 1, 1], [], []>} : vector<2x32xf32>, vector<32x128xf32>, vector<2x128xf32> -> vector<2x128xf32>
    %465 = arith.addf %463, %464 : vector<2x128xf32>
    %466 = arith.negf %465 : vector<2x128xf32>
    %467 = math.exp %466 : vector<2x128xf32>
    %cst_178 = arith.constant 1.000000e+00 : f32
    %468 = vector.broadcast %cst_178 : f32 to vector<2x128xf32>
    %469 = arith.addf %468, %467 : vector<2x128xf32>
    %470 = arith.divf %468, %469 : vector<2x128xf32>
    %471 = math.tanh %465 : vector<2x128xf32>
    %472 = vector.extract_strided_slice %470 {offsets = [0, 0], sizes = [2, 32], strides = [1, 1]} : vector<2x128xf32> to vector<2x32xf32>
    %473 = vector.extract_strided_slice %470 {offsets = [0, 32], sizes = [2, 32], strides = [1, 1]} : vector<2x128xf32> to vector<2x32xf32>
    %474 = vector.extract_strided_slice %471 {offsets = [0, 64], sizes = [2, 32], strides = [1, 1]} : vector<2x128xf32> to vector<2x32xf32>
    %475 = vector.extract_strided_slice %470 {offsets = [0, 96], sizes = [2, 32], strides = [1, 1]} : vector<2x128xf32> to vector<2x32xf32>
    %476 = arith.mulf %473, %462 : vector<2x32xf32>
    %477 = arith.mulf %472, %474 : vector<2x32xf32>
    %478 = arith.addf %476, %477 : vector<2x32xf32>
    %479 = math.tanh %478 : vector<2x32xf32>
    %480 = arith.mulf %475, %479 : vector<2x32xf32>
    %c2_179 = arith.constant 2 : index
    %c0_180 = arith.constant 0 : index
    %481 = vector.load %arg7[%c2_179, %c0_180] : memref<32x128xf32, #tpu.memory_space<vmem>>, vector<2x128xf32>
    %cst_181 = arith.constant dense<0.000000e+00> : vector<2x128xf32>
    %482 = tpu.matmul %480, %7, %cst_181 {dimension_numbers = #tpu.dot_dimension_numbers<[1], [0], [0], [1], [0, 0, 1, 1], [], []>} : vector<2x32xf32>, vector<32x128xf32>, vector<2x128xf32> -> vector<2x128xf32>
    %483 = arith.addf %481, %482 : vector<2x128xf32>
    %484 = arith.negf %483 : vector<2x128xf32>
    %485 = math.exp %484 : vector<2x128xf32>
    %cst_182 = arith.constant 1.000000e+00 : f32
    %486 = vector.broadcast %cst_182 : f32 to vector<2x128xf32>
    %487 = arith.addf %486, %485 : vector<2x128xf32>
    %488 = arith.divf %486, %487 : vector<2x128xf32>
    %489 = math.tanh %483 : vector<2x128xf32>
    %490 = vector.extract_strided_slice %488 {offsets = [0, 0], sizes = [2, 32], strides = [1, 1]} : vector<2x128xf32> to vector<2x32xf32>
    %491 = vector.extract_strided_slice %488 {offsets = [0, 32], sizes = [2, 32], strides = [1, 1]} : vector<2x128xf32> to vector<2x32xf32>
    %492 = vector.extract_strided_slice %489 {offsets = [0, 64], sizes = [2, 32], strides = [1, 1]} : vector<2x128xf32> to vector<2x32xf32>
    %493 = vector.extract_strided_slice %488 {offsets = [0, 96], sizes = [2, 32], strides = [1, 1]} : vector<2x128xf32> to vector<2x32xf32>
    %494 = arith.mulf %491, %478 : vector<2x32xf32>
    %495 = arith.mulf %490, %492 : vector<2x32xf32>
    %496 = arith.addf %494, %495 : vector<2x32xf32>
    %497 = math.tanh %496 : vector<2x32xf32>
    %498 = arith.mulf %493, %497 : vector<2x32xf32>
    %c4_183 = arith.constant 4 : index
    %c0_184 = arith.constant 0 : index
    %499 = vector.load %arg7[%c4_183, %c0_184] : memref<32x128xf32, #tpu.memory_space<vmem>>, vector<2x128xf32>
    %cst_185 = arith.constant dense<0.000000e+00> : vector<2x128xf32>
    %500 = tpu.matmul %498, %7, %cst_185 {dimension_numbers = #tpu.dot_dimension_numbers<[1], [0], [0], [1], [0, 0, 1, 1], [], []>} : vector<2x32xf32>, vector<32x128xf32>, vector<2x128xf32> -> vector<2x128xf32>
    %501 = arith.addf %499, %500 : vector<2x128xf32>
    %502 = arith.negf %501 : vector<2x128xf32>
    %503 = math.exp %502 : vector<2x128xf32>
    %cst_186 = arith.constant 1.000000e+00 : f32
    %504 = vector.broadcast %cst_186 : f32 to vector<2x128xf32>
    %505 = arith.addf %504, %503 : vector<2x128xf32>
    %506 = arith.divf %504, %505 : vector<2x128xf32>
    %507 = math.tanh %501 : vector<2x128xf32>
    %508 = vector.extract_strided_slice %506 {offsets = [0, 0], sizes = [2, 32], strides = [1, 1]} : vector<2x128xf32> to vector<2x32xf32>
    %509 = vector.extract_strided_slice %506 {offsets = [0, 32], sizes = [2, 32], strides = [1, 1]} : vector<2x128xf32> to vector<2x32xf32>
    %510 = vector.extract_strided_slice %507 {offsets = [0, 64], sizes = [2, 32], strides = [1, 1]} : vector<2x128xf32> to vector<2x32xf32>
    %511 = vector.extract_strided_slice %506 {offsets = [0, 96], sizes = [2, 32], strides = [1, 1]} : vector<2x128xf32> to vector<2x32xf32>
    %512 = arith.mulf %509, %496 : vector<2x32xf32>
    %513 = arith.mulf %508, %510 : vector<2x32xf32>
    %514 = arith.addf %512, %513 : vector<2x32xf32>
    %515 = math.tanh %514 : vector<2x32xf32>
    %516 = arith.mulf %511, %515 : vector<2x32xf32>
    %c6_187 = arith.constant 6 : index
    %c0_188 = arith.constant 0 : index
    %517 = vector.load %arg7[%c6_187, %c0_188] : memref<32x128xf32, #tpu.memory_space<vmem>>, vector<2x128xf32>
    %cst_189 = arith.constant dense<0.000000e+00> : vector<2x128xf32>
    %518 = tpu.matmul %516, %7, %cst_189 {dimension_numbers = #tpu.dot_dimension_numbers<[1], [0], [0], [1], [0, 0, 1, 1], [], []>} : vector<2x32xf32>, vector<32x128xf32>, vector<2x128xf32> -> vector<2x128xf32>
    %519 = arith.addf %517, %518 : vector<2x128xf32>
    %520 = arith.negf %519 : vector<2x128xf32>
    %521 = math.exp %520 : vector<2x128xf32>
    %cst_190 = arith.constant 1.000000e+00 : f32
    %522 = vector.broadcast %cst_190 : f32 to vector<2x128xf32>
    %523 = arith.addf %522, %521 : vector<2x128xf32>
    %524 = arith.divf %522, %523 : vector<2x128xf32>
    %525 = math.tanh %519 : vector<2x128xf32>
    %526 = vector.extract_strided_slice %524 {offsets = [0, 0], sizes = [2, 32], strides = [1, 1]} : vector<2x128xf32> to vector<2x32xf32>
    %527 = vector.extract_strided_slice %524 {offsets = [0, 32], sizes = [2, 32], strides = [1, 1]} : vector<2x128xf32> to vector<2x32xf32>
    %528 = vector.extract_strided_slice %525 {offsets = [0, 64], sizes = [2, 32], strides = [1, 1]} : vector<2x128xf32> to vector<2x32xf32>
    %529 = vector.extract_strided_slice %524 {offsets = [0, 96], sizes = [2, 32], strides = [1, 1]} : vector<2x128xf32> to vector<2x32xf32>
    %530 = arith.mulf %527, %514 : vector<2x32xf32>
    %531 = arith.mulf %526, %528 : vector<2x32xf32>
    %532 = arith.addf %530, %531 : vector<2x32xf32>
    %533 = math.tanh %532 : vector<2x32xf32>
    %534 = arith.mulf %529, %533 : vector<2x32xf32>
    %c8_191 = arith.constant 8 : index
    %c0_192 = arith.constant 0 : index
    %535 = vector.load %arg7[%c8_191, %c0_192] : memref<32x128xf32, #tpu.memory_space<vmem>>, vector<2x128xf32>
    %cst_193 = arith.constant dense<0.000000e+00> : vector<2x128xf32>
    %536 = tpu.matmul %534, %7, %cst_193 {dimension_numbers = #tpu.dot_dimension_numbers<[1], [0], [0], [1], [0, 0, 1, 1], [], []>} : vector<2x32xf32>, vector<32x128xf32>, vector<2x128xf32> -> vector<2x128xf32>
    %537 = arith.addf %535, %536 : vector<2x128xf32>
    %538 = arith.negf %537 : vector<2x128xf32>
    %539 = math.exp %538 : vector<2x128xf32>
    %cst_194 = arith.constant 1.000000e+00 : f32
    %540 = vector.broadcast %cst_194 : f32 to vector<2x128xf32>
    %541 = arith.addf %540, %539 : vector<2x128xf32>
    %542 = arith.divf %540, %541 : vector<2x128xf32>
    %543 = math.tanh %537 : vector<2x128xf32>
    %544 = vector.extract_strided_slice %542 {offsets = [0, 0], sizes = [2, 32], strides = [1, 1]} : vector<2x128xf32> to vector<2x32xf32>
    %545 = vector.extract_strided_slice %542 {offsets = [0, 32], sizes = [2, 32], strides = [1, 1]} : vector<2x128xf32> to vector<2x32xf32>
    %546 = vector.extract_strided_slice %543 {offsets = [0, 64], sizes = [2, 32], strides = [1, 1]} : vector<2x128xf32> to vector<2x32xf32>
    %547 = vector.extract_strided_slice %542 {offsets = [0, 96], sizes = [2, 32], strides = [1, 1]} : vector<2x128xf32> to vector<2x32xf32>
    %548 = arith.mulf %545, %532 : vector<2x32xf32>
    %549 = arith.mulf %544, %546 : vector<2x32xf32>
    %550 = arith.addf %548, %549 : vector<2x32xf32>
    %551 = math.tanh %550 : vector<2x32xf32>
    %552 = arith.mulf %547, %551 : vector<2x32xf32>
    %c10_195 = arith.constant 10 : index
    %c0_196 = arith.constant 0 : index
    %553 = vector.load %arg7[%c10_195, %c0_196] : memref<32x128xf32, #tpu.memory_space<vmem>>, vector<2x128xf32>
    %cst_197 = arith.constant dense<0.000000e+00> : vector<2x128xf32>
    %554 = tpu.matmul %552, %7, %cst_197 {dimension_numbers = #tpu.dot_dimension_numbers<[1], [0], [0], [1], [0, 0, 1, 1], [], []>} : vector<2x32xf32>, vector<32x128xf32>, vector<2x128xf32> -> vector<2x128xf32>
    %555 = arith.addf %553, %554 : vector<2x128xf32>
    %556 = arith.negf %555 : vector<2x128xf32>
    %557 = math.exp %556 : vector<2x128xf32>
    %cst_198 = arith.constant 1.000000e+00 : f32
    %558 = vector.broadcast %cst_198 : f32 to vector<2x128xf32>
    %559 = arith.addf %558, %557 : vector<2x128xf32>
    %560 = arith.divf %558, %559 : vector<2x128xf32>
    %561 = math.tanh %555 : vector<2x128xf32>
    %562 = vector.extract_strided_slice %560 {offsets = [0, 0], sizes = [2, 32], strides = [1, 1]} : vector<2x128xf32> to vector<2x32xf32>
    %563 = vector.extract_strided_slice %560 {offsets = [0, 32], sizes = [2, 32], strides = [1, 1]} : vector<2x128xf32> to vector<2x32xf32>
    %564 = vector.extract_strided_slice %561 {offsets = [0, 64], sizes = [2, 32], strides = [1, 1]} : vector<2x128xf32> to vector<2x32xf32>
    %565 = vector.extract_strided_slice %560 {offsets = [0, 96], sizes = [2, 32], strides = [1, 1]} : vector<2x128xf32> to vector<2x32xf32>
    %566 = arith.mulf %563, %550 : vector<2x32xf32>
    %567 = arith.mulf %562, %564 : vector<2x32xf32>
    %568 = arith.addf %566, %567 : vector<2x32xf32>
    %569 = math.tanh %568 : vector<2x32xf32>
    %570 = arith.mulf %565, %569 : vector<2x32xf32>
    %c12_199 = arith.constant 12 : index
    %c0_200 = arith.constant 0 : index
    %571 = vector.load %arg7[%c12_199, %c0_200] : memref<32x128xf32, #tpu.memory_space<vmem>>, vector<2x128xf32>
    %cst_201 = arith.constant dense<0.000000e+00> : vector<2x128xf32>
    %572 = tpu.matmul %570, %7, %cst_201 {dimension_numbers = #tpu.dot_dimension_numbers<[1], [0], [0], [1], [0, 0, 1, 1], [], []>} : vector<2x32xf32>, vector<32x128xf32>, vector<2x128xf32> -> vector<2x128xf32>
    %573 = arith.addf %571, %572 : vector<2x128xf32>
    %574 = arith.negf %573 : vector<2x128xf32>
    %575 = math.exp %574 : vector<2x128xf32>
    %cst_202 = arith.constant 1.000000e+00 : f32
    %576 = vector.broadcast %cst_202 : f32 to vector<2x128xf32>
    %577 = arith.addf %576, %575 : vector<2x128xf32>
    %578 = arith.divf %576, %577 : vector<2x128xf32>
    %579 = math.tanh %573 : vector<2x128xf32>
    %580 = vector.extract_strided_slice %578 {offsets = [0, 0], sizes = [2, 32], strides = [1, 1]} : vector<2x128xf32> to vector<2x32xf32>
    %581 = vector.extract_strided_slice %578 {offsets = [0, 32], sizes = [2, 32], strides = [1, 1]} : vector<2x128xf32> to vector<2x32xf32>
    %582 = vector.extract_strided_slice %579 {offsets = [0, 64], sizes = [2, 32], strides = [1, 1]} : vector<2x128xf32> to vector<2x32xf32>
    %583 = vector.extract_strided_slice %578 {offsets = [0, 96], sizes = [2, 32], strides = [1, 1]} : vector<2x128xf32> to vector<2x32xf32>
    %584 = arith.mulf %581, %568 : vector<2x32xf32>
    %585 = arith.mulf %580, %582 : vector<2x32xf32>
    %586 = arith.addf %584, %585 : vector<2x32xf32>
    %587 = math.tanh %586 : vector<2x32xf32>
    %588 = arith.mulf %583, %587 : vector<2x32xf32>
    %c14_203 = arith.constant 14 : index
    %c0_204 = arith.constant 0 : index
    %589 = vector.load %arg7[%c14_203, %c0_204] : memref<32x128xf32, #tpu.memory_space<vmem>>, vector<2x128xf32>
    %cst_205 = arith.constant dense<0.000000e+00> : vector<2x128xf32>
    %590 = tpu.matmul %588, %7, %cst_205 {dimension_numbers = #tpu.dot_dimension_numbers<[1], [0], [0], [1], [0, 0, 1, 1], [], []>} : vector<2x32xf32>, vector<32x128xf32>, vector<2x128xf32> -> vector<2x128xf32>
    %591 = arith.addf %589, %590 : vector<2x128xf32>
    %592 = arith.negf %591 : vector<2x128xf32>
    %593 = math.exp %592 : vector<2x128xf32>
    %cst_206 = arith.constant 1.000000e+00 : f32
    %594 = vector.broadcast %cst_206 : f32 to vector<2x128xf32>
    %595 = arith.addf %594, %593 : vector<2x128xf32>
    %596 = arith.divf %594, %595 : vector<2x128xf32>
    %597 = math.tanh %591 : vector<2x128xf32>
    %598 = vector.extract_strided_slice %596 {offsets = [0, 0], sizes = [2, 32], strides = [1, 1]} : vector<2x128xf32> to vector<2x32xf32>
    %599 = vector.extract_strided_slice %596 {offsets = [0, 32], sizes = [2, 32], strides = [1, 1]} : vector<2x128xf32> to vector<2x32xf32>
    %600 = vector.extract_strided_slice %597 {offsets = [0, 64], sizes = [2, 32], strides = [1, 1]} : vector<2x128xf32> to vector<2x32xf32>
    %601 = vector.extract_strided_slice %596 {offsets = [0, 96], sizes = [2, 32], strides = [1, 1]} : vector<2x128xf32> to vector<2x32xf32>
    %602 = arith.mulf %599, %586 : vector<2x32xf32>
    %603 = arith.mulf %598, %600 : vector<2x32xf32>
    %604 = arith.addf %602, %603 : vector<2x32xf32>
    %605 = math.tanh %604 : vector<2x32xf32>
    %606 = arith.mulf %601, %605 : vector<2x32xf32>
    %c16_207 = arith.constant 16 : index
    %c0_208 = arith.constant 0 : index
    %607 = vector.load %arg7[%c16_207, %c0_208] : memref<32x128xf32, #tpu.memory_space<vmem>>, vector<2x128xf32>
    %cst_209 = arith.constant dense<0.000000e+00> : vector<2x128xf32>
    %608 = tpu.matmul %606, %7, %cst_209 {dimension_numbers = #tpu.dot_dimension_numbers<[1], [0], [0], [1], [0, 0, 1, 1], [], []>} : vector<2x32xf32>, vector<32x128xf32>, vector<2x128xf32> -> vector<2x128xf32>
    %609 = arith.addf %607, %608 : vector<2x128xf32>
    %610 = arith.negf %609 : vector<2x128xf32>
    %611 = math.exp %610 : vector<2x128xf32>
    %cst_210 = arith.constant 1.000000e+00 : f32
    %612 = vector.broadcast %cst_210 : f32 to vector<2x128xf32>
    %613 = arith.addf %612, %611 : vector<2x128xf32>
    %614 = arith.divf %612, %613 : vector<2x128xf32>
    %615 = math.tanh %609 : vector<2x128xf32>
    %616 = vector.extract_strided_slice %614 {offsets = [0, 0], sizes = [2, 32], strides = [1, 1]} : vector<2x128xf32> to vector<2x32xf32>
    %617 = vector.extract_strided_slice %614 {offsets = [0, 32], sizes = [2, 32], strides = [1, 1]} : vector<2x128xf32> to vector<2x32xf32>
    %618 = vector.extract_strided_slice %615 {offsets = [0, 64], sizes = [2, 32], strides = [1, 1]} : vector<2x128xf32> to vector<2x32xf32>
    %619 = vector.extract_strided_slice %614 {offsets = [0, 96], sizes = [2, 32], strides = [1, 1]} : vector<2x128xf32> to vector<2x32xf32>
    %620 = arith.mulf %617, %604 : vector<2x32xf32>
    %621 = arith.mulf %616, %618 : vector<2x32xf32>
    %622 = arith.addf %620, %621 : vector<2x32xf32>
    %623 = math.tanh %622 : vector<2x32xf32>
    %624 = arith.mulf %619, %623 : vector<2x32xf32>
    %c18_211 = arith.constant 18 : index
    %c0_212 = arith.constant 0 : index
    %625 = vector.load %arg7[%c18_211, %c0_212] : memref<32x128xf32, #tpu.memory_space<vmem>>, vector<2x128xf32>
    %cst_213 = arith.constant dense<0.000000e+00> : vector<2x128xf32>
    %626 = tpu.matmul %624, %7, %cst_213 {dimension_numbers = #tpu.dot_dimension_numbers<[1], [0], [0], [1], [0, 0, 1, 1], [], []>} : vector<2x32xf32>, vector<32x128xf32>, vector<2x128xf32> -> vector<2x128xf32>
    %627 = arith.addf %625, %626 : vector<2x128xf32>
    %628 = arith.negf %627 : vector<2x128xf32>
    %629 = math.exp %628 : vector<2x128xf32>
    %cst_214 = arith.constant 1.000000e+00 : f32
    %630 = vector.broadcast %cst_214 : f32 to vector<2x128xf32>
    %631 = arith.addf %630, %629 : vector<2x128xf32>
    %632 = arith.divf %630, %631 : vector<2x128xf32>
    %633 = math.tanh %627 : vector<2x128xf32>
    %634 = vector.extract_strided_slice %632 {offsets = [0, 0], sizes = [2, 32], strides = [1, 1]} : vector<2x128xf32> to vector<2x32xf32>
    %635 = vector.extract_strided_slice %632 {offsets = [0, 32], sizes = [2, 32], strides = [1, 1]} : vector<2x128xf32> to vector<2x32xf32>
    %636 = vector.extract_strided_slice %633 {offsets = [0, 64], sizes = [2, 32], strides = [1, 1]} : vector<2x128xf32> to vector<2x32xf32>
    %637 = vector.extract_strided_slice %632 {offsets = [0, 96], sizes = [2, 32], strides = [1, 1]} : vector<2x128xf32> to vector<2x32xf32>
    %638 = arith.mulf %635, %622 : vector<2x32xf32>
    %639 = arith.mulf %634, %636 : vector<2x32xf32>
    %640 = arith.addf %638, %639 : vector<2x32xf32>
    %641 = math.tanh %640 : vector<2x32xf32>
    %642 = arith.mulf %637, %641 : vector<2x32xf32>
    %c20_215 = arith.constant 20 : index
    %c0_216 = arith.constant 0 : index
    %643 = vector.load %arg7[%c20_215, %c0_216] : memref<32x128xf32, #tpu.memory_space<vmem>>, vector<2x128xf32>
    %cst_217 = arith.constant dense<0.000000e+00> : vector<2x128xf32>
    %644 = tpu.matmul %642, %7, %cst_217 {dimension_numbers = #tpu.dot_dimension_numbers<[1], [0], [0], [1], [0, 0, 1, 1], [], []>} : vector<2x32xf32>, vector<32x128xf32>, vector<2x128xf32> -> vector<2x128xf32>
    %645 = arith.addf %643, %644 : vector<2x128xf32>
    %646 = arith.negf %645 : vector<2x128xf32>
    %647 = math.exp %646 : vector<2x128xf32>
    %cst_218 = arith.constant 1.000000e+00 : f32
    %648 = vector.broadcast %cst_218 : f32 to vector<2x128xf32>
    %649 = arith.addf %648, %647 : vector<2x128xf32>
    %650 = arith.divf %648, %649 : vector<2x128xf32>
    %651 = math.tanh %645 : vector<2x128xf32>
    %652 = vector.extract_strided_slice %650 {offsets = [0, 0], sizes = [2, 32], strides = [1, 1]} : vector<2x128xf32> to vector<2x32xf32>
    %653 = vector.extract_strided_slice %650 {offsets = [0, 32], sizes = [2, 32], strides = [1, 1]} : vector<2x128xf32> to vector<2x32xf32>
    %654 = vector.extract_strided_slice %651 {offsets = [0, 64], sizes = [2, 32], strides = [1, 1]} : vector<2x128xf32> to vector<2x32xf32>
    %655 = vector.extract_strided_slice %650 {offsets = [0, 96], sizes = [2, 32], strides = [1, 1]} : vector<2x128xf32> to vector<2x32xf32>
    %656 = arith.mulf %653, %640 : vector<2x32xf32>
    %657 = arith.mulf %652, %654 : vector<2x32xf32>
    %658 = arith.addf %656, %657 : vector<2x32xf32>
    %659 = math.tanh %658 : vector<2x32xf32>
    %660 = arith.mulf %655, %659 : vector<2x32xf32>
    %c22_219 = arith.constant 22 : index
    %c0_220 = arith.constant 0 : index
    %661 = vector.load %arg7[%c22_219, %c0_220] : memref<32x128xf32, #tpu.memory_space<vmem>>, vector<2x128xf32>
    %cst_221 = arith.constant dense<0.000000e+00> : vector<2x128xf32>
    %662 = tpu.matmul %660, %7, %cst_221 {dimension_numbers = #tpu.dot_dimension_numbers<[1], [0], [0], [1], [0, 0, 1, 1], [], []>} : vector<2x32xf32>, vector<32x128xf32>, vector<2x128xf32> -> vector<2x128xf32>
    %663 = arith.addf %661, %662 : vector<2x128xf32>
    %664 = arith.negf %663 : vector<2x128xf32>
    %665 = math.exp %664 : vector<2x128xf32>
    %cst_222 = arith.constant 1.000000e+00 : f32
    %666 = vector.broadcast %cst_222 : f32 to vector<2x128xf32>
    %667 = arith.addf %666, %665 : vector<2x128xf32>
    %668 = arith.divf %666, %667 : vector<2x128xf32>
    %669 = math.tanh %663 : vector<2x128xf32>
    %670 = vector.extract_strided_slice %668 {offsets = [0, 0], sizes = [2, 32], strides = [1, 1]} : vector<2x128xf32> to vector<2x32xf32>
    %671 = vector.extract_strided_slice %668 {offsets = [0, 32], sizes = [2, 32], strides = [1, 1]} : vector<2x128xf32> to vector<2x32xf32>
    %672 = vector.extract_strided_slice %669 {offsets = [0, 64], sizes = [2, 32], strides = [1, 1]} : vector<2x128xf32> to vector<2x32xf32>
    %673 = vector.extract_strided_slice %668 {offsets = [0, 96], sizes = [2, 32], strides = [1, 1]} : vector<2x128xf32> to vector<2x32xf32>
    %674 = arith.mulf %671, %658 : vector<2x32xf32>
    %675 = arith.mulf %670, %672 : vector<2x32xf32>
    %676 = arith.addf %674, %675 : vector<2x32xf32>
    %677 = math.tanh %676 : vector<2x32xf32>
    %678 = arith.mulf %673, %677 : vector<2x32xf32>
    %c24_223 = arith.constant 24 : index
    %c0_224 = arith.constant 0 : index
    %679 = vector.load %arg7[%c24_223, %c0_224] : memref<32x128xf32, #tpu.memory_space<vmem>>, vector<2x128xf32>
    %cst_225 = arith.constant dense<0.000000e+00> : vector<2x128xf32>
    %680 = tpu.matmul %678, %7, %cst_225 {dimension_numbers = #tpu.dot_dimension_numbers<[1], [0], [0], [1], [0, 0, 1, 1], [], []>} : vector<2x32xf32>, vector<32x128xf32>, vector<2x128xf32> -> vector<2x128xf32>
    %681 = arith.addf %679, %680 : vector<2x128xf32>
    %682 = arith.negf %681 : vector<2x128xf32>
    %683 = math.exp %682 : vector<2x128xf32>
    %cst_226 = arith.constant 1.000000e+00 : f32
    %684 = vector.broadcast %cst_226 : f32 to vector<2x128xf32>
    %685 = arith.addf %684, %683 : vector<2x128xf32>
    %686 = arith.divf %684, %685 : vector<2x128xf32>
    %687 = math.tanh %681 : vector<2x128xf32>
    %688 = vector.extract_strided_slice %686 {offsets = [0, 0], sizes = [2, 32], strides = [1, 1]} : vector<2x128xf32> to vector<2x32xf32>
    %689 = vector.extract_strided_slice %686 {offsets = [0, 32], sizes = [2, 32], strides = [1, 1]} : vector<2x128xf32> to vector<2x32xf32>
    %690 = vector.extract_strided_slice %687 {offsets = [0, 64], sizes = [2, 32], strides = [1, 1]} : vector<2x128xf32> to vector<2x32xf32>
    %691 = vector.extract_strided_slice %686 {offsets = [0, 96], sizes = [2, 32], strides = [1, 1]} : vector<2x128xf32> to vector<2x32xf32>
    %692 = arith.mulf %689, %676 : vector<2x32xf32>
    %693 = arith.mulf %688, %690 : vector<2x32xf32>
    %694 = arith.addf %692, %693 : vector<2x32xf32>
    %695 = math.tanh %694 : vector<2x32xf32>
    %696 = arith.mulf %691, %695 : vector<2x32xf32>
    %c26_227 = arith.constant 26 : index
    %c0_228 = arith.constant 0 : index
    %697 = vector.load %arg7[%c26_227, %c0_228] : memref<32x128xf32, #tpu.memory_space<vmem>>, vector<2x128xf32>
    %cst_229 = arith.constant dense<0.000000e+00> : vector<2x128xf32>
    %698 = tpu.matmul %696, %7, %cst_229 {dimension_numbers = #tpu.dot_dimension_numbers<[1], [0], [0], [1], [0, 0, 1, 1], [], []>} : vector<2x32xf32>, vector<32x128xf32>, vector<2x128xf32> -> vector<2x128xf32>
    %699 = arith.addf %697, %698 : vector<2x128xf32>
    %700 = arith.negf %699 : vector<2x128xf32>
    %701 = math.exp %700 : vector<2x128xf32>
    %cst_230 = arith.constant 1.000000e+00 : f32
    %702 = vector.broadcast %cst_230 : f32 to vector<2x128xf32>
    %703 = arith.addf %702, %701 : vector<2x128xf32>
    %704 = arith.divf %702, %703 : vector<2x128xf32>
    %705 = math.tanh %699 : vector<2x128xf32>
    %706 = vector.extract_strided_slice %704 {offsets = [0, 0], sizes = [2, 32], strides = [1, 1]} : vector<2x128xf32> to vector<2x32xf32>
    %707 = vector.extract_strided_slice %704 {offsets = [0, 32], sizes = [2, 32], strides = [1, 1]} : vector<2x128xf32> to vector<2x32xf32>
    %708 = vector.extract_strided_slice %705 {offsets = [0, 64], sizes = [2, 32], strides = [1, 1]} : vector<2x128xf32> to vector<2x32xf32>
    %709 = vector.extract_strided_slice %704 {offsets = [0, 96], sizes = [2, 32], strides = [1, 1]} : vector<2x128xf32> to vector<2x32xf32>
    %710 = arith.mulf %707, %694 : vector<2x32xf32>
    %711 = arith.mulf %706, %708 : vector<2x32xf32>
    %712 = arith.addf %710, %711 : vector<2x32xf32>
    %713 = math.tanh %712 : vector<2x32xf32>
    %714 = arith.mulf %709, %713 : vector<2x32xf32>
    %c28_231 = arith.constant 28 : index
    %c0_232 = arith.constant 0 : index
    %715 = vector.load %arg7[%c28_231, %c0_232] : memref<32x128xf32, #tpu.memory_space<vmem>>, vector<2x128xf32>
    %cst_233 = arith.constant dense<0.000000e+00> : vector<2x128xf32>
    %716 = tpu.matmul %714, %7, %cst_233 {dimension_numbers = #tpu.dot_dimension_numbers<[1], [0], [0], [1], [0, 0, 1, 1], [], []>} : vector<2x32xf32>, vector<32x128xf32>, vector<2x128xf32> -> vector<2x128xf32>
    %717 = arith.addf %715, %716 : vector<2x128xf32>
    %718 = arith.negf %717 : vector<2x128xf32>
    %719 = math.exp %718 : vector<2x128xf32>
    %cst_234 = arith.constant 1.000000e+00 : f32
    %720 = vector.broadcast %cst_234 : f32 to vector<2x128xf32>
    %721 = arith.addf %720, %719 : vector<2x128xf32>
    %722 = arith.divf %720, %721 : vector<2x128xf32>
    %723 = math.tanh %717 : vector<2x128xf32>
    %724 = vector.extract_strided_slice %722 {offsets = [0, 0], sizes = [2, 32], strides = [1, 1]} : vector<2x128xf32> to vector<2x32xf32>
    %725 = vector.extract_strided_slice %722 {offsets = [0, 32], sizes = [2, 32], strides = [1, 1]} : vector<2x128xf32> to vector<2x32xf32>
    %726 = vector.extract_strided_slice %723 {offsets = [0, 64], sizes = [2, 32], strides = [1, 1]} : vector<2x128xf32> to vector<2x32xf32>
    %727 = vector.extract_strided_slice %722 {offsets = [0, 96], sizes = [2, 32], strides = [1, 1]} : vector<2x128xf32> to vector<2x32xf32>
    %728 = arith.mulf %725, %712 : vector<2x32xf32>
    %729 = arith.mulf %724, %726 : vector<2x32xf32>
    %730 = arith.addf %728, %729 : vector<2x32xf32>
    %731 = math.tanh %730 : vector<2x32xf32>
    %732 = arith.mulf %727, %731 : vector<2x32xf32>
    %c30_235 = arith.constant 30 : index
    %c0_236 = arith.constant 0 : index
    %733 = vector.load %arg7[%c30_235, %c0_236] : memref<32x128xf32, #tpu.memory_space<vmem>>, vector<2x128xf32>
    %cst_237 = arith.constant dense<0.000000e+00> : vector<2x128xf32>
    %734 = tpu.matmul %732, %7, %cst_237 {dimension_numbers = #tpu.dot_dimension_numbers<[1], [0], [0], [1], [0, 0, 1, 1], [], []>} : vector<2x32xf32>, vector<32x128xf32>, vector<2x128xf32> -> vector<2x128xf32>
    %735 = arith.addf %733, %734 : vector<2x128xf32>
    %736 = arith.negf %735 : vector<2x128xf32>
    %737 = math.exp %736 : vector<2x128xf32>
    %cst_238 = arith.constant 1.000000e+00 : f32
    %738 = vector.broadcast %cst_238 : f32 to vector<2x128xf32>
    %739 = arith.addf %738, %737 : vector<2x128xf32>
    %740 = arith.divf %738, %739 : vector<2x128xf32>
    %741 = math.tanh %735 : vector<2x128xf32>
    %742 = vector.extract_strided_slice %740 {offsets = [0, 0], sizes = [2, 32], strides = [1, 1]} : vector<2x128xf32> to vector<2x32xf32>
    %743 = vector.extract_strided_slice %740 {offsets = [0, 32], sizes = [2, 32], strides = [1, 1]} : vector<2x128xf32> to vector<2x32xf32>
    %744 = vector.extract_strided_slice %741 {offsets = [0, 64], sizes = [2, 32], strides = [1, 1]} : vector<2x128xf32> to vector<2x32xf32>
    %745 = vector.extract_strided_slice %740 {offsets = [0, 96], sizes = [2, 32], strides = [1, 1]} : vector<2x128xf32> to vector<2x32xf32>
    %746 = arith.mulf %743, %730 : vector<2x32xf32>
    %747 = arith.mulf %742, %744 : vector<2x32xf32>
    %748 = arith.addf %746, %747 : vector<2x32xf32>
    %749 = math.tanh %748 : vector<2x32xf32>
    %750 = arith.mulf %745, %749 : vector<2x32xf32>
    %c30_239 = arith.constant 30 : index
    %c0_240 = arith.constant 0 : index
    %751 = vector.load %arg6[%c30_239, %c0_240] : memref<32x64xf32, #tpu.memory_space<vmem>>, vector<2x64xf32>
    %cst_241 = arith.constant dense<0.000000e+00> : vector<2x128xf32>
    %752 = tpu.matmul %751, %8, %cst_241 {dimension_numbers = #tpu.dot_dimension_numbers<[1], [0], [0], [1], [0, 0, 1, 1], [], []>} : vector<2x64xf32>, vector<64x128xf32>, vector<2x128xf32> -> vector<2x128xf32>
    %753 = vector.broadcast %9 : vector<1x128xf32> to vector<2x128xf32>
    %754 = arith.addf %752, %753 : vector<2x128xf32>
    %755 = arith.negf %754 : vector<2x128xf32>
    %756 = math.exp %755 : vector<2x128xf32>
    %cst_242 = arith.constant 1.000000e+00 : f32
    %757 = vector.broadcast %cst_242 : f32 to vector<2x128xf32>
    %758 = arith.addf %757, %756 : vector<2x128xf32>
    %759 = arith.divf %757, %758 : vector<2x128xf32>
    %760 = math.tanh %754 : vector<2x128xf32>
    %761 = vector.extract_strided_slice %759 {offsets = [0, 0], sizes = [2, 32], strides = [1, 1]} : vector<2x128xf32> to vector<2x32xf32>
    %762 = vector.extract_strided_slice %760 {offsets = [0, 64], sizes = [2, 32], strides = [1, 1]} : vector<2x128xf32> to vector<2x32xf32>
    %763 = arith.mulf %761, %762 : vector<2x32xf32>
    %764 = vector.extract_strided_slice %759 {offsets = [0, 96], sizes = [2, 32], strides = [1, 1]} : vector<2x128xf32> to vector<2x32xf32>
    %765 = math.tanh %763 : vector<2x32xf32>
    %766 = arith.mulf %764, %765 : vector<2x32xf32>
    %767 = vector.extract_strided_slice %10 {offsets = [0, 0], sizes = [32, 32], strides = [1, 1]} : vector<64x32xf32> to vector<32x32xf32>
    %cst_243 = arith.constant dense<0.000000e+00> : vector<2x32xf32>
    %768 = tpu.matmul %750, %767, %cst_243 {dimension_numbers = #tpu.dot_dimension_numbers<[1], [0], [0], [1], [0, 0, 1, 1], [], []>} : vector<2x32xf32>, vector<32x32xf32>, vector<2x32xf32> -> vector<2x32xf32>
    %769 = vector.extract_strided_slice %10 {offsets = [32, 0], sizes = [32, 32], strides = [1, 1]} : vector<64x32xf32> to vector<32x32xf32>
    %cst_244 = arith.constant dense<0.000000e+00> : vector<2x32xf32>
    %770 = tpu.matmul %766, %769, %cst_244 {dimension_numbers = #tpu.dot_dimension_numbers<[1], [0], [0], [1], [0, 0, 1, 1], [], []>} : vector<2x32xf32>, vector<32x32xf32>, vector<2x32xf32> -> vector<2x32xf32>
    %771 = arith.addf %768, %770 : vector<2x32xf32>
    %772 = vector.broadcast %11 : vector<1x32xf32> to vector<2x32xf32>
    %773 = arith.addf %771, %772 : vector<2x32xf32>
    %cst_245 = arith.constant 0.000000e+00 : f32
    %774 = vector.broadcast %cst_245 : f32 to vector<2x32xf32>
    %775 = arith.maximumf %773, %774 : vector<2x32xf32>
    %cst_246 = arith.constant dense<0.000000e+00> : vector<2x3xf32>
    %776 = tpu.matmul %775, %12, %cst_246 {dimension_numbers = #tpu.dot_dimension_numbers<[1], [0], [0], [1], [0, 0, 1, 1], [], []>} : vector<2x32xf32>, vector<32x3xf32>, vector<2x3xf32> -> vector<2x3xf32>
    %777 = vector.broadcast %13 : vector<1x3xf32> to vector<2x3xf32>
    %778 = arith.addf %776, %777 : vector<2x3xf32>
    %c0_247 = arith.constant 0 : index
    %c0_248 = arith.constant 0 : index
    %779 = vector.load %arg3[%c0_247, %c0_248] : memref<2x3xf32, #tpu.memory_space<vmem>>, vector<2x3xf32>
    tpu.vector_store %arg3[%c0_247, %c0_248], %778 {strides = array<i32>} : memref<2x3xf32, #tpu.memory_space<vmem>>, vector<2x3xf32>,
    return
  }
  func.func @transform_0(%arg0: i32) -> (i32, i32) {
    %c0_i32 = arith.constant 0 : i32
    %c0_i32_0 = arith.constant 0 : i32
    %c0_i32_1 = arith.constant 0 : i32
    return %c0_i32, %c0_i32_0 : i32, i32
  }
  func.func @transform_1(%arg0: i32) -> (i32, i32) {
    %c0_i32 = arith.constant 0 : i32
    %c0_i32_0 = arith.constant 0 : i32
    %c0_i32_1 = arith.constant 0 : i32
    return %c0_i32, %c0_i32_0 : i32, i32
  }
  func.func @transform_2(%arg0: i32) -> (i32, i32) {
    %c0_i32 = arith.constant 0 : i32
    %c0_i32_0 = arith.constant 0 : i32
    %c0_i32_1 = arith.constant 0 : i32
    return %c0_i32, %c0_i32_0 : i32, i32
  }
}

</mosaic_0001>

<bundles_post_ra>
// kernel: lstm_model_forward.1
= control target key start
LH: loop header
LB: loop body
LE: loop exit
PB: predicated region body
PF: predicated region fallthrough
CT: control target
= control target key end

     0   :  { %v112_v3 = vlaneseq  ;;  %v2981_v4 = vmov 0   ;;  %vm2982_vm3 = vmmov 1   ;;  %s3698_s0 = inlined_call_operand.vmem [shape: f32[32,1], index: 0, kind: input, shape index: {}]   ;;  %s3699_s1 = inlined_call_operand.vmem [shape: f32[328,128], index: 1, kind: input, shape index: {}]   ;;  %s3700_s2 = inlined_call_operand.hbm [shape: f32[2,3], index: 2, kind: output, shape index: {}]  }
   0x1   :  { %v3006_v0 = vld [vmem:[%s3699_s1 + $0x38] sm:$0xff]  ;;  %v3014_v2 = vld [vmem:[%s3699_s1 + $0x30] sm:$0xff]  ;;  %2675 = vset.pattern.permute.xlu0 %v2981_v4  ;;  %v3020_v5 = vld [vmem:[%s3699_s1 + $0x28] sm:$0xff] }
   0x2   :  { %v63_v1 = vld [vmem:[%s3698_s0 + $0x18] sm:$0xff]  ;;  %141 = vmatpush.msra.mxu0 %v3006_v0  ;;  %v113_v6 = vshrl.u32 %v112_v3, 7  ;;  %v115_v7 = vand.u32 127, %v112_v3  ;;  %222 = vmatpush.msra.mxu1 %v3006_v0  ;;  %v3027_v8 = vld [vmem:[%s3699_s1 + $0x20] sm:$0xff] }
   0x3   :  { %81 = vperm.xlu0 %2675, %v63_v1   ;;  %300 = vmatpush.msra.mxu2 %v3006_v0  ;;  %v3033_v9 = vld [vmem:[%s3699_s1 + $0x18] sm:$0xff]  ;;  %v60_v10 = vld [vmem:[%s3698_s0] sm:$0xff] }
   0x4   :  { %142 = vmatpush.msra.mxu0 %v3014_v2  ;;  %vm116_vm0 = vcmp.lt.s32.totalorder %v113_v6, 2  ;;  %vm117_vm1 = vcmp.lt.s32.totalorder %v115_v7, 32  ;;  %223 = vmatpush.msra.mxu1 %v3014_v2 }
   0x5   :  { %378 = vmatpush.msra.mxu3 %v3006_v0  ;;  %vm118_vm2 = vmxor %vm116_vm0, %vm117_vm1  ;;  %301 = vmatpush.msra.mxu2 %v3014_v2 }
   0x6   :  { %143 = vmatpush.msra.mxu0 %v3020_v5  ;;  %vm119_vm4 = vmxor %vm118_vm2, %vm2982_vm3  ;;  %224 = vmatpush.msra.mxu1 %v3020_v5 }
   0x7   :  { %379 = vmatpush.msra.mxu3 %v3014_v2  ;;  %302 = vmatpush.msra.mxu2 %v3020_v5 }
   0x8   :  { %144 = vmatpush.msra.mxu0 %v3027_v8 }
   0x9   :  { %7 = vsyncpa [#allocation7], 0  ;;  %v3049_v11 = vld [vmem:[%s3699_s1 + $0x10] sm:$0xff]  ;;  %225 = vmatpush.msra.mxu1 %v3027_v8  ;;  %380 = vmatpush.msra.mxu3 %v3020_v5  ;;  %v2983_v12 = vmov 0.0   ;;  %v3061_v14 = vld [vmem:[%s3699_s1 + $0x8] sm:$0xff]  ;;  %vm129_vm5 = vcmask 523264  }
   0xa   :  { %145 = vmatpush.msra.mxu0 %v3033_v9  ;;  %v3055_v13 = vsel %vm119_vm4, 1.0, %v2983_v12  ;;  %303 = vmatpush.msra.mxu2 %v3027_v8  ;;  %v3069_v15 = vld [vmem:[%s3699_s1] sm:$0xff]  ;;  %vm126_vm6 = vcmask 1041408   ;;  %s2984_s9 = smov 64   ;;  %s2985_s10 = smov 32   ;;  %vm195_vm11 = vcmask 254976  }
   0xb   :  { %66 = vperm.xlu0 %2675, %v60_v10   ;;  %226 = vmatpush.msra.mxu1 %v3033_v9  ;;  %v128_v16 = vmul.f32 0.0, %v3055_v13  ;;  %v3129_v17 = vld [vmem:[%s3699_s1 + $0x40] ss:$0 sm:$0xff]  ;;  %v3134_v18 = vld [vmem:[%s3699_s1 + $0x42] ss:$0 sm:$0xff]  ;;  %vm200_vm12 = vcmask 519426  }
   0xc   :  { %146 = vmatpush.msra.mxu0 %v3049_v11  ;;  %304 = vmatpush.msra.mxu2 %v3033_v9  ;;  %v3139_v19 = vld [vmem:[%s3699_s1 + $0x41] ss:$0 sm:$0xff]  ;;  %v3144_v20 = vld [vmem:[%s3699_s1 + $0x43] ss:$0 sm:$0xff]  ;;  %vm208_vm13 = vcmask 261120   ;;  %s2587_s18 = sshll.u32 %s3700_s2, 4  ;;  %s2588_s18 = int_to_ptr.hbm [resolvable:$true] %s2587_s18 }
   0xd   :  { %227 = vmatpush.msra.mxu1 %v3049_v11  ;;  %381 = vmatpush.msra.mxu3 %v3027_v8 }
   0xe   :  { %147 = vmatpush.msra.mxu0 %v3061_v14  ;;  %305 = vmatpush.msra.mxu2 %v3049_v11 }
   0xf   :  { %228 = vmatpush.msra.mxu1 %v3061_v14  ;;  %382 = vmatpush.msra.mxu3 %v3033_v9 }
  0x10   :  { %148 = vmatpush.msra.mxu0 %v3069_v15  ;;  %306 = vmatpush.msra.mxu2 %v3061_v14 }
  0x11   :  { %2596 = vmatmul.msk.f32.vlgmr.msra.gmra.mxu0 %vm129_vm5, %v128_v16  ;;  %229 = vmatpush.msra.mxu1 %v3069_v15 }
  0x12   :  { %307 = vmatpush.msra.mxu2 %v3069_v15  ;;  %383 = vmatpush.msra.mxu3 %v3049_v11 }
  0x13   :  { %456 = vmatpush.msrb.mxu0 %v3006_v0  ;;  %2676 = vset.pattern.permute.xlu1 %v2981_v4 }
  0x14   :  { %384 = vmatpush.msra.mxu3 %v3061_v14  ;;  %2677 = vset.pattern.permute.xlu2 %v2981_v4 }
  0x15   :  { %457 = vmatpush.msrb.mxu0 %v3014_v2  ;;  %534 = vmatpush.msrb.mxu1 %v3006_v0 }
  0x16   :  { %385 = vmatpush.msra.mxu3 %v3069_v15  ;;  %612 = vmatpush.msrb.mxu2 %v3006_v0 }
  0x17   :  { %458 = vmatpush.msrb.mxu0 %v3020_v5  ;;  %535 = vmatpush.msrb.mxu1 %v3014_v2 }
  0x18   :  { %613 = vmatpush.msrb.mxu2 %v3014_v2  ;;  %690 = vmatpush.msrb.mxu3 %v3006_v0 }
  0x19   :  { %459 = vmatpush.msrb.mxu0 %v3027_v8  ;;  %536 = vmatpush.msrb.mxu1 %v3020_v5 }
  0x1a   :  { %614 = vmatpush.msrb.mxu2 %v3020_v5  ;;  %691 = vmatpush.msrb.mxu3 %v3014_v2 }
  0x1b   :  { %460 = vmatpush.msrb.mxu0 %v3033_v9  ;;  %537 = vmatpush.msrb.mxu1 %v3027_v8 }
  0x1c   :  { %615 = vmatpush.msrb.mxu2 %v3027_v8  ;;  %692 = vmatpush.msrb.mxu3 %v3020_v5 }
  0x1d   :  { %461 = vmatpush.msrb.mxu0 %v3049_v11  ;;  %538 = vmatpush.msrb.mxu1 %v3033_v9 }
  0x1e   :  { %616 = vmatpush.msrb.mxu2 %v3033_v9  ;;  %693 = vmatpush.msrb.mxu3 %v3027_v8 }
  0x1f   :  { %462 = vmatpush.msrb.mxu0 %v3061_v14  ;;  %539 = vmatpush.msrb.mxu1 %v3049_v11 }
  0x20   :  { %617 = vmatpush.msrb.mxu2 %v3049_v11  ;;  %694 = vmatpush.msrb.mxu3 %v3033_v9 }
  0x21   :  { %463 = vmatpush.msrb.mxu0 %v3069_v15  ;;  %540 = vmatpush.msrb.mxu1 %v3061_v14 }
  0x22   :  { %618 = vmatpush.msrb.mxu2 %v3061_v14  ;;  %695 = vmatpush.msrb.mxu3 %v3049_v11 }
  0x23   :  { %541 = vmatpush.msrb.mxu1 %v3069_v15  ;;  %768 = vmatpush.msra.mxu0 %v3006_v0 }
  0x24   :  { %619 = vmatpush.msrb.mxu2 %v3069_v15  ;;  %696 = vmatpush.msrb.mxu3 %v3061_v14 }
  0x25   :  { %769 = vmatpush.msra.mxu0 %v3014_v2 }
  0x26   :  { %697 = vmatpush.msrb.mxu3 %v3069_v15 }
  0x27   :  { %770 = vmatpush.msra.mxu0 %v3020_v5 }
  0x29   :  { %771 = vmatpush.msra.mxu0 %v3027_v8 }
  0x2b   :  { %772 = vmatpush.msra.mxu0 %v3033_v9 }
  0x2d   :  { %773 = vmatpush.msra.mxu0 %v3049_v11 }
  0x2f   :  { %774 = vmatpush.msra.mxu0 %v3061_v14 }
  0x31   :  { %775 = vmatpush.msra.mxu0 %v3069_v15 }
  0x75   :  { %v82_v21 = vpop.permute.xlu0 %81 }
  0x76   :  { %v88_v22 = vmul.f32 %v3129_v17, %v82_v21  ;;  %v102_v23 = vmul.f32 %v3134_v18, %v82_v21 }
  0x78   :  { %v93_v24 = vadd.f32 %v3139_v19, %v88_v22  ;;  %v107_v25 = vadd.f32 %v3144_v20, %v102_v23 }
  0x7a   :  { %97 = vst [vmem:[#allocation2 + $0x18] sm:$0xff] %v93_v24 }
  0x7b   :  { %111 = vst [vmem:[#allocation3 + $0x18] sm:$0xff] %v107_v25 }
  0x7d   :  { %v67_v26 = vpop.permute.xlu0 %66 }
  0x7e   :  { %v85_v27 = vmul.f32 %v3129_v17, %v67_v26  ;;  %v99_v28 = vmul.f32 %v3134_v18, %v67_v26 }
  0x80   :  { %v90_v29 = vadd.f32 %v3139_v19, %v85_v27  ;;  %v104_v30 = vadd.f32 %v3144_v20, %v99_v28 }
  0x82   :  { %94 = vst [vmem:[#allocation2] sm:$0xff] %v90_v29  ;;  %v122_v31 = vld [vmem:[#allocation3 + $0x1e] sm:$0x3]  ;;  %v203_v63 = vld [vmem:[#allocation3 + $0x1c] sm:$0x3] }
  0x83   :  { %108 = vst [vmem:[#allocation3] sm:$0xff] %v104_v30  ;;  %v124_v33 = vrot.slane %v122_v31, 6  ;;  %v205_v3 = vrot.slane %v203_v63, 6 }
  0x89   :  { %v121_v32 = vld [vmem:[#allocation2] sm:$0x3]  ;;  %v202_v1 = vld [vmem:[#allocation2 + $0x2] sm:$0x3] }
  0x8a   :  { %v127_v34 = vsel %vm126_vm6, %v121_v32, %v124_v33  ;;  %v207_v4 = vsel %vm126_vm6, %v202_v1, %v205_v3 }
  0x8e   :  { %v150_v35 = vpop.f32.mrf.mxu0 }
  0x8f   :  { %v153_v36 = vadd.f32 %v150_v35, %v127_v34 }
  0x91   :  { %2686 = vtanh.f32 %v153_v36  ;;  %v2597_v38 = vmul.f32 -1.442695, %v153_v36 }
  0x93   :  { %2688 = vpow2.f32 %v2597_v38 }
  0x97   :  { %v2687_v37 = vpop.eup %2686 }
  0x98   :  { %176 = vrot.lane.b32.xlu1 %v2687_v37, %s2984_s9 }
  0x99   :  { %v2689_v39 = vpop.eup %2688 }
  0x9a   :  { %v157_v40 = vadd.f32 1.0, %v2689_v39 }
  0x9c   :  { %2690 = vrcp.f32 %v157_v40  ;;  %v169_v46 = vand.u32 2147483648, %v157_v40  ;;  %vm163_vm8 = vweird.f32 %v157_v40  ;;  %v167_v47 = vand.u32 2147483647, %v157_v40 }
  0x9e   :  { %v170_v49 = vor.u32 1.1754944e-38, %v169_v46  ;;  %vm168_vm10 = vcmp.eq.f32.partialorder %v167_v47, 8.507059e+37  ;;  %v281_v46 = vld [vmem:[#allocation2 + $0x4] sm:$0x3] }
  0xa2   :  { %v2691_v41 = vpop.eup %2690 }
  0xa3   :  { %v159_v42 = vmul.f32 %v2691_v41, %v157_v40  ;;  %vm164_vm7 = vweird.f32 %v2691_v41 }
  0xa4   :  { %vm165_vm9 = vmor %vm163_vm8, %vm164_vm7 }
  0xa5   :  { %v160_v43 = vsub.f32 1.0, %v159_v42 }
  0xa7   :  { %v161_v44 = vmul.f32 %v2691_v41, %v160_v43 }
  0xa9   :  { %v162_v45 = vadd.f32 %v2691_v41, %v161_v44 }
  0xab   :  { %v166_v48 = vsel %vm165_vm9, %v2691_v41, %v162_v45  ;;  %v282_v45 = vld [vmem:[#allocation3 + $0x1a] sm:$0x3] }
  0xac   :  { %v171_v51 = vsel %vm168_vm10, %v170_v49, %v166_v48  ;;  %v284_v47 = vrot.slane %v282_v45, 6 }
  0xad   :  { %v174_v53 = vmul.f32 0.0, %v171_v51 }
  0xae   :  { %v286_v48 = vsel %vm126_vm6, %v281_v46, %v284_v47 }
 0x10a   :  { %v177_v50 = vpop.permute.xlu1 %176 }
 0x10b   :  { %v179_v52 = vmul.f32 %v177_v50, %v171_v51 }
 0x10d   :  { %181 = vrot.lane.b32.xlu1 %v179_v52, %s2985_s10 }
 0x17f   :  { %v182_v54 = vpop.permute.xlu1 %181 }
 0x180   :  { %v184_v55 = vadd.f32 %v182_v54, %v174_v53 }
 0x182   :  { %2692 = vtanh.f32 %v184_v55 }
 0x188   :  { %v2693_v56 = vpop.eup %2692 }
 0x189   :  { %187 = vrot.lane.b32.xlu2 %v2693_v56, %s2984_s9 }
 0x1e3   :  { %v188_v57 = vpop.permute.xlu2 %187 }
 0x1e4   :  { %v190_v58 = vmul.f32 %v188_v57, %v171_v51 }
 0x1e6   :  { %197 = vrot.lane.b32.xlu0 %v190_v58, %s2984_s9  ;;  %192 = vrot.lane.b32.xlu2 %v190_v58, %s2985_s10 }
 0x240   :  { %v193_v59 = vpop.permute.xlu2 %192 }
 0x241   :  { %196 = vst.msk [vmem:[#allocation4] sm:$0x3] %vm195_vm11, %v193_v59 }
 0x258   :  { %v198_v60 = vpop.permute.xlu0 %197 }
 0x259   :  { %201 = vst.msk [vmem:[#allocation4 + $0x1c] sm:$0xc] %vm200_vm12, %v198_v60  ;;  %v209_v61 = vsel %vm208_vm13, %v193_v59, %v198_v60 }
 0x25a   :  { %v210_v62 = vmul.f32 %v209_v61, %v3055_v13 }
 0x25c   :  { %2598 = vmatmul.msk.f32.vlgmr.msra.gmra.mxu1 %vm129_vm5, %v210_v62 }
 0x25d   :  { %846 = vmatpush.msra.mxu1 %v3006_v0 }
 0x25f   :  { %847 = vmatpush.msra.mxu1 %v3014_v2 }
 0x261   :  { %848 = vmatpush.msra.mxu1 %v3020_v5 }
 0x263   :  { %849 = vmatpush.msra.mxu1 %v3027_v8 }
 0x265   :  { %850 = vmatpush.msra.mxu1 %v3033_v9 }
 0x267   :  { %851 = vmatpush.msra.mxu1 %v3049_v11 }
 0x269   :  { %852 = vmatpush.msra.mxu1 %v3061_v14 }
 0x26b   :  { %853 = vmatpush.msra.mxu1 %v3069_v15 }
 0x2d9   :  { %v231_v6 = vpop.f32.mrf.mxu1 }
 0x2da   :  { %v234_v7 = vadd.f32 %v231_v6, %v207_v4 }
 0x2dc   :  { %2694 = vtanh.f32 %v234_v7  ;;  %v2599_v16 = vmul.f32 -1.442695, %v234_v7 }
 0x2de   :  { %2696 = vpow2.f32 %v2599_v16 }
 0x2e2   :  { %v2695_v10 = vpop.eup %2694 }
 0x2e3   :  { %257 = vrot.lane.b32.xlu1 %v2695_v10, %s2984_s9 }
 0x2e4   :  { %v2697_v21 = vpop.eup %2696 }
 0x2e5   :  { %v238_v22 = vadd.f32 1.0, %v2697_v21 }
 0x2e7   :  { %2698 = vrcp.f32 %v238_v22  ;;  %v250_v28 = vand.u32 2147483648, %v238_v22  ;;  %vm244_vm15 = vweird.f32 %v238_v22  ;;  %v248_v29 = vand.u32 2147483647, %v238_v22 }
 0x2e9   :  { %v251_v31 = vor.u32 1.1754944e-38, %v250_v28  ;;  %vm249_vm1 = vcmp.eq.f32.partialorder %v248_v29, 8.507059e+37  ;;  %v359_v28 = vld [vmem:[#allocation2 + $0x6] sm:$0x3] }
 0x2ed   :  { %v2699_v23 = vpop.eup %2698 }
 0x2ee   :  { %v240_v24 = vmul.f32 %v2699_v23, %v238_v22  ;;  %vm245_vm14 = vweird.f32 %v2699_v23 }
 0x2ef   :  { %vm246_vm0 = vmor %vm244_vm15, %vm245_vm14 }
 0x2f0   :  { %v241_v25 = vsub.f32 1.0, %v240_v24 }
 0x2f2   :  { %v242_v26 = vmul.f32 %v2699_v23, %v241_v25 }
 0x2f4   :  { %v243_v27 = vadd.f32 %v2699_v23, %v242_v26 }
 0x2f6   :  { %v247_v30 = vsel %vm246_vm0, %v2699_v23, %v243_v27  ;;  %v360_v27 = vld [vmem:[#allocation3 + $0x18] sm:$0x3] }
 0x2f7   :  { %v252_v33 = vsel %vm249_vm1, %v251_v31, %v247_v30  ;;  %v362_v29 = vrot.slane %v360_v27, 6 }
 0x2f8   :  { %v255_v35 = vmul.f32 %v252_v33, %v184_v55 }
 0x2f9   :  { %v364_v30 = vsel %vm126_vm6, %v359_v28, %v362_v29 }
 0x355   :  { %v258_v32 = vpop.permute.xlu1 %257 }
 0x356   :  { %v260_v34 = vmul.f32 %v258_v32, %v252_v33 }
 0x358   :  { %262 = vrot.lane.b32.xlu2 %v260_v34, %s2985_s10 }
 0x3b2   :  { %v263_v36 = vpop.permute.xlu2 %262 }
 0x3b3   :  { %v265_v37 = vadd.f32 %v263_v36, %v255_v35 }
 0x3b5   :  { %2700 = vtanh.f32 %v265_v37 }
 0x3bb   :  { %v2701_v38 = vpop.eup %2700 }
 0x3bc   :  { %268 = vrot.lane.b32.xlu0 %v2701_v38, %s2984_s9 }
 0x42e   :  { %v269_v39 = vpop.permute.xlu0 %268 }
 0x42f   :  { %v271_v40 = vmul.f32 %v269_v39, %v252_v33 }
 0x431   :  { %277 = vrot.lane.b32.xlu2 %v271_v40, %s2984_s9  ;;  %273 = vrot.lane.b32.xlu1 %v271_v40, %s2985_s10 }
 0x48b   :  { %v278_v41 = vpop.permute.xlu2 %277 }
 0x48c   :  { %280 = vst.msk [vmem:[#allocation4 + $0x1a] sm:$0xc] %vm200_vm12, %v278_v41 }
 0x4a3   :  { %v274_v42 = vpop.permute.xlu1 %273 }
 0x4a4   :  { %276 = vst.msk [vmem:[#allocation4 + $0x2] sm:$0x3] %vm195_vm11, %v274_v42  ;;  %v287_v43 = vsel %vm208_vm13, %v274_v42, %v278_v41 }
 0x4a5   :  { %v288_v44 = vmul.f32 %v287_v43, %v3055_v13 }
 0x4a7   :  { %2600 = vmatmul.msk.f32.vlgmr.msra.gmra.mxu2 %vm129_vm5, %v288_v44 }
 0x4a8   :  { %924 = vmatpush.msra.mxu2 %v3006_v0 }
 0x4aa   :  { %925 = vmatpush.msra.mxu2 %v3014_v2 }
 0x4ac   :  { %926 = vmatpush.msra.mxu2 %v3020_v5 }
 0x4ae   :  { %927 = vmatpush.msra.mxu2 %v3027_v8 }
 0x4b0   :  { %928 = vmatpush.msra.mxu2 %v3033_v9 }
 0x4b2   :  { %929 = vmatpush.msra.mxu2 %v3049_v11 }
 0x4b4   :  { %930 = vmatpush.msra.mxu2 %v3061_v14 }
 0x4b6   :  { %931 = vmatpush.msra.mxu2 %v3069_v15 }
 0x52a   :  { %v309_v49 = vpop.f32.mrf.mxu2 }
 0x52b   :  { %v312_v50 = vadd.f32 %v309_v49, %v286_v48 }
 0x52d   :  { %2702 = vtanh.f32 %v312_v50  ;;  %v2601_v52 = vmul.f32 -1.442695, %v312_v50 }
 0x52f   :  { %2704 = vpow2.f32 %v2601_v52 }
 0x533   :  { %v2703_v51 = vpop.eup %2702 }
 0x534   :  { %335 = vrot.lane.b32.xlu0 %v2703_v51, %s2984_s9 }
 0x535   :  { %v2705_v53 = vpop.eup %2704 }
 0x536   :  { %v316_v54 = vadd.f32 1.0, %v2705_v53 }
 0x538   :  { %2706 = vrcp.f32 %v316_v54  ;;  %v328_v60 = vand.u32 2147483648, %v316_v54  ;;  %vm322_vm3 = vweird.f32 %v316_v54  ;;  %v326_v61 = vand.u32 2147483647, %v316_v54 }
 0x53a   :  { %v329_v63 = vor.u32 1.1754944e-38, %v328_v60  ;;  %vm327_vm7 = vcmp.eq.f32.partialorder %v326_v61, 8.507059e+37 }
 0x53e   :  { %v2707_v55 = vpop.eup %2706 }
 0x53f   :  { %v318_v56 = vmul.f32 %v2707_v55, %v316_v54  ;;  %vm323_vm2 = vweird.f32 %v2707_v55 }
 0x540   :  { %vm324_vm4 = vmor %vm322_vm3, %vm323_vm2 }
 0x541   :  { %v319_v57 = vsub.f32 1.0, %v318_v56  ;;  %v61_v56 = vld [vmem:[%s3698_s0 + $0x8] sm:$0xff] }
 0x543   :  { %v320_v58 = vmul.f32 %v2707_v55, %v319_v57 }
 0x545   :  { %v321_v59 = vadd.f32 %v2707_v55, %v320_v58 }
 0x547   :  { %v325_v62 = vsel %vm324_vm4, %v2707_v55, %v321_v59  ;;  %v62_v55 = vld [vmem:[%s3698_s0 + $0x10] sm:$0xff]  ;;  %s2986_s0 = smov 96  }
 0x548   :  { %v330_v3 = vsel %vm327_vm7, %v329_v63, %v325_v62 }
 0x549   :  { %v333_v6 = vmul.f32 %v330_v3, %v265_v37 }
 0x5a6   :  { %v336_v1 = vpop.permute.xlu0 %335 }
 0x5a7   :  { %v338_v4 = vmul.f32 %v336_v1, %v330_v3 }
 0x5a9   :  { %340 = vrot.lane.b32.xlu1 %v338_v4, %s2985_s10 }
 0x61b   :  { %v341_v7 = vpop.permute.xlu1 %340 }
 0x61c   :  { %v343_v10 = vadd.f32 %v341_v7, %v333_v6 }
 0x61e   :  { %2708 = vtanh.f32 %v343_v10 }
 0x624   :  { %v2709_v16 = vpop.eup %2708 }
 0x625   :  { %346 = vrot.lane.b32.xlu2 %v2709_v16, %s2984_s9 }
 0x67f   :  { %v347_v21 = vpop.permute.xlu2 %346 }
 0x680   :  { %v349_v22 = vmul.f32 %v347_v21, %v330_v3 }
 0x682   :  { %355 = vrot.lane.b32.xlu1 %v349_v22, %s2984_s9  ;;  %351 = vrot.lane.b32.xlu0 %v349_v22, %s2985_s10 }
 0x6f4   :  { %v356_v23 = vpop.permute.xlu1 %355  ;;  %v352_v24 = vpop.permute.xlu0 %351 }
 0x6f5   :  { %358 = vst.msk [vmem:[#allocation4 + $0x18] sm:$0xc] %vm200_vm12, %v356_v23  ;;  %v365_v25 = vsel %vm208_vm13, %v352_v24, %v356_v23 }
 0x6f6   :  { %354 = vst.msk [vmem:[#allocation4 + $0x4] sm:$0x3] %vm195_vm11, %v352_v24  ;;  %v366_v26 = vmul.f32 %v365_v25, %v3055_v13 }
 0x6f8   :  { %2602 = vmatmul.msk.f32.vlgmr.msra.gmra.mxu3 %vm129_vm5, %v366_v26 }
 0x6f9   :  { %1002 = vmatpush.msra.mxu3 %v3006_v0 }
 0x6fb   :  { %1003 = vmatpush.msra.mxu3 %v3014_v2 }
 0x6fd   :  { %1004 = vmatpush.msra.mxu3 %v3020_v5 }
 0x6ff   :  { %1005 = vmatpush.msra.mxu3 %v3027_v8 }
 0x701   :  { %1006 = vmatpush.msra.mxu3 %v3033_v9 }
 0x703   :  { %1007 = vmatpush.msra.mxu3 %v3049_v11 }
 0x705   :  { %1008 = vmatpush.msra.mxu3 %v3061_v14 }
 0x707   :  { %1009 = vmatpush.msra.mxu3 %v3069_v15 }
 0x77b   :  { %v387_v31 = vpop.f32.mrf.mxu3 }
 0x77c   :  { %v390_v32 = vadd.f32 %v387_v31, %v364_v30 }
 0x77e   :  { %2710 = vtanh.f32 %v390_v32  ;;  %v2603_v34 = vmul.f32 -1.442695, %v390_v32 }
 0x780   :  { %2712 = vpow2.f32 %v2603_v34 }
 0x784   :  { %v2711_v33 = vpop.eup %2710 }
 0x785   :  { %413 = vrot.lane.b32.xlu2 %v2711_v33, %s2984_s9 }
 0x786   :  { %v2713_v35 = vpop.eup %2712 }
 0x787   :  { %v394_v36 = vadd.f32 1.0, %v2713_v35 }
 0x789   :  { %2714 = vrcp.f32 %v394_v36  ;;  %v406_v42 = vand.u32 2147483648, %v394_v36  ;;  %vm400_vm9 = vweird.f32 %v394_v36  ;;  %v404_v43 = vand.u32 2147483647, %v394_v36 }
 0x78b   :  { %v407_v45 = vor.u32 1.1754944e-38, %v406_v42  ;;  %vm405_vm14 = vcmp.eq.f32.partialorder %v404_v43, 8.507059e+37 }
 0x78f   :  { %v2715_v37 = vpop.eup %2714 }
 0x790   :  { %v396_v38 = vmul.f32 %v2715_v37, %v394_v36  ;;  %vm401_vm8 = vweird.f32 %v2715_v37 }
 0x791   :  { %vm402_vm10 = vmor %vm400_vm9, %vm401_vm8 }
 0x792   :  { %v397_v39 = vsub.f32 1.0, %v396_v38 }
 0x794   :  { %v398_v40 = vmul.f32 %v2715_v37, %v397_v39 }
 0x796   :  { %v399_v41 = vadd.f32 %v2715_v37, %v398_v40 }
 0x798   :  { %v403_v44 = vsel %vm402_vm10, %v2715_v37, %v399_v41 }
 0x799   :  { %v408_v47 = vsel %vm405_vm14, %v407_v45, %v403_v44 }
 0x79a   :  { %v411_v49 = vmul.f32 %v408_v47, %v343_v10 }
 0x7df   :  { %v414_v46 = vpop.permute.xlu2 %413 }
 0x7e0   :  { %v416_v48 = vmul.f32 %v414_v46, %v408_v47 }
 0x7e2   :  { %418 = vrot.lane.b32.xlu0 %v416_v48, %s2985_s10 }
 0x854   :  { %v419_v50 = vpop.permute.xlu0 %418 }
 0x855   :  { %v3214_v51 = vadd.f32 %v419_v50, %v411_v49 }
 0x857   :  { %2716 = vtanh.f32 %v3214_v51 }
 0x85d   :  { %v2717_v52 = vpop.eup %2716 }
 0x85e   :  { %424 = vrot.lane.b32.xlu1 %v2717_v52, %s2984_s9 }
 0x866   :  { %76 = vperm.xlu1 %2676, %v62_v55  }
 0x8d0   :  { %v425_v53 = vpop.permute.xlu1 %424 }
 0x8d1   :  { %v427_v54 = vmul.f32 %v425_v53, %v408_v47 }
 0x8d3   :  { %433 = vrot.lane.b32.xlu0 %v427_v54, %s2984_s9  ;;  %429 = vrot.lane.b32.xlu2 %v427_v54, %s2985_s10 }
 0x8d8   :  { %v77_v61 = vpop.permute.xlu1 %76 }
 0x8d9   :  { %v87_v62 = vmul.f32 %v3129_v17, %v77_v61  ;;  %v101_v63 = vmul.f32 %v3134_v18, %v77_v61 }
 0x8db   :  { %71 = vperm.xlu2 %2677, %v61_v56   ;;  %v92_v3 = vadd.f32 %v3139_v19, %v87_v62  ;;  %v106_v4 = vadd.f32 %v3144_v20, %v101_v63 }
 0x8dd   :  { %96 = vst [vmem:[#allocation2 + $0x10] sm:$0xff] %v92_v3 }
 0x8de   :  { %110 = vst [vmem:[#allocation3 + $0x10] sm:$0xff] %v106_v4 }
 0x8e5   :  { %v438_v21 = vld [vmem:[#allocation3 + $0x16] sm:$0x3]  ;;  %v516_v49 = vld [vmem:[#allocation3 + $0x14] sm:$0x3] }
 0x8e6   :  { %v440_v22 = vrot.slane %v438_v21, 6  ;;  %v518_v50 = vrot.slane %v516_v49, 6 }
 0x92d   :  { %v430_v57 = vpop.permute.xlu2 %429 }
 0x92e   :  { %432 = vst.msk [vmem:[#allocation4 + $0x6] sm:$0x3] %vm195_vm11, %v430_v57 }
 0x935   :  { %v72_v1 = vpop.permute.xlu2 %71 }
 0x936   :  { %v86_v6 = vmul.f32 %v3129_v17, %v72_v1  ;;  %v100_v7 = vmul.f32 %v3134_v18, %v72_v1 }
 0x938   :  { %v91_v10 = vadd.f32 %v3139_v19, %v86_v6  ;;  %v105_v16 = vadd.f32 %v3144_v20, %v100_v7 }
 0x93a   :  { %95 = vst [vmem:[#allocation2 + $0x8] sm:$0xff] %v91_v10 }
 0x93b   :  { %109 = vst [vmem:[#allocation3 + $0x8] sm:$0xff] %v105_v16 }
 0x941   :  { %v437_v23 = vld [vmem:[#allocation2 + $0x8] sm:$0x3] }
 0x942   :  { %v442_v24 = vsel %vm126_vm6, %v437_v23, %v440_v22 }
 0x945   :  { %v434_v58 = vpop.permute.xlu0 %433 }
 0x946   :  { %436 = vst.msk [vmem:[#allocation4 + $0x16] sm:$0xc] %vm200_vm12, %v434_v58  ;;  %v443_v59 = vsel %vm208_vm13, %v430_v57, %v434_v58 }
 0x947   :  { %v444_v60 = vmul.f32 %v443_v59, %v3055_v13 }
 0x949   :  { %2604 = vmatmul.msk.f32.vlgmr.msrb.gmra.mxu0 %vm129_vm5, %v444_v60 }
 0x94a   :  { %1080 = vmatpush.msrb.mxu0 %v3006_v0 }
 0x94c   :  { %1081 = vmatpush.msrb.mxu0 %v3014_v2 }
 0x94e   :  { %1082 = vmatpush.msrb.mxu0 %v3020_v5 }
 0x950   :  { %1083 = vmatpush.msrb.mxu0 %v3027_v8 }
 0x952   :  { %1084 = vmatpush.msrb.mxu0 %v3033_v9 }
 0x954   :  { %1085 = vmatpush.msrb.mxu0 %v3049_v11 }
 0x956   :  { %1086 = vmatpush.msrb.mxu0 %v3061_v14 }
 0x958   :  { %1087 = vmatpush.msrb.mxu0 %v3069_v15 }
 0x9c6   :  { %v465_v25 = vpop.f32.mrf.mxu0 }
 0x9c7   :  { %v468_v26 = vadd.f32 %v465_v25, %v442_v24 }
 0x9c9   :  { %2718 = vtanh.f32 %v468_v26  ;;  %v2605_v17 = vmul.f32 -1.442695, %v468_v26 }
 0x9cb   :  { %2720 = vpow2.f32 %v2605_v17 }
 0x9cf   :  { %v2719_v27 = vpop.eup %2718 }
 0x9d0   :  { %491 = vrot.lane.b32.xlu0 %v2719_v27, %s2984_s9 }
 0x9d1   :  { %v2721_v18 = vpop.eup %2720 }
 0x9d2   :  { %v472_v19 = vadd.f32 1.0, %v2721_v18 }
 0x9d4   :  { %2722 = vrcp.f32 %v472_v19  ;;  %v484_v32 = vand.u32 2147483648, %v472_v19  ;;  %vm478_vm0 = vweird.f32 %v472_v19  ;;  %v482_v33 = vand.u32 2147483647, %v472_v19 }
 0x9d6   :  { %v485_v35 = vor.u32 1.1754944e-38, %v484_v32  ;;  %vm483_vm2 = vcmp.eq.f32.partialorder %v482_v33, 8.507059e+37 }
 0x9da   :  { %v2723_v20 = vpop.eup %2722 }
 0x9db   :  { %v474_v28 = vmul.f32 %v2723_v20, %v472_v19  ;;  %vm479_vm15 = vweird.f32 %v2723_v20 }
 0x9dc   :  { %vm480_vm1 = vmor %vm478_vm0, %vm479_vm15 }
 0x9dd   :  { %v475_v29 = vsub.f32 1.0, %v474_v28 }
 0x9df   :  { %v476_v30 = vmul.f32 %v2723_v20, %v475_v29  ;;  %v593_v29 = vld [vmem:[#allocation2 + $0xc] sm:$0x3] }
 0x9e1   :  { %v477_v31 = vadd.f32 %v2723_v20, %v476_v30 }
 0x9e3   :  { %v481_v34 = vsel %vm480_vm1, %v2723_v20, %v477_v31  ;;  %v594_v20 = vld [vmem:[#allocation3 + $0x12] sm:$0x3] }
 0x9e4   :  { %v486_v37 = vsel %vm483_vm2, %v485_v35, %v481_v34  ;;  %v596_v28 = vrot.slane %v594_v20, 6 }
 0x9e5   :  { %v489_v39 = vmul.f32 %v486_v37, %v3214_v51  ;;  %v515_v51 = vld [vmem:[#allocation2 + $0xa] sm:$0x3] }
 0x9e6   :  { %v520_v52 = vsel %vm126_vm6, %v515_v51, %v518_v50  ;;  %v598_v30 = vsel %vm126_vm6, %v593_v29, %v596_v28 }
 0xa42   :  { %v492_v36 = vpop.permute.xlu0 %491 }
 0xa43   :  { %v494_v38 = vmul.f32 %v492_v36, %v486_v37 }
 0xa45   :  { %496 = vrot.lane.b32.xlu1 %v494_v38, %s2985_s10 }
 0xab7   :  { %v497_v40 = vpop.permute.xlu1 %496 }
 0xab8   :  { %v499_v41 = vadd.f32 %v497_v40, %v489_v39 }
 0xaba   :  { %2724 = vtanh.f32 %v499_v41 }
 0xac0   :  { %v2725_v42 = vpop.eup %2724 }
 0xac1   :  { %502 = vrot.lane.b32.xlu2 %v2725_v42, %s2984_s9 }
 0xb1b   :  { %v503_v43 = vpop.permute.xlu2 %502 }
 0xb1c   :  { %v505_v44 = vmul.f32 %v503_v43, %v486_v37 }
 0xb1e   :  { %511 = vrot.lane.b32.xlu1 %v505_v44, %s2984_s9  ;;  %507 = vrot.lane.b32.xlu0 %v505_v44, %s2985_s10 }
 0xb90   :  { %v512_v45 = vpop.permute.xlu1 %511  ;;  %v508_v46 = vpop.permute.xlu0 %507 }
 0xb91   :  { %514 = vst.msk [vmem:[#allocation4 + $0x14] sm:$0xc] %vm200_vm12, %v512_v45  ;;  %v521_v47 = vsel %vm208_vm13, %v508_v46, %v512_v45 }
 0xb92   :  { %510 = vst.msk [vmem:[#allocation4 + $0x8] sm:$0x3] %vm195_vm11, %v508_v46  ;;  %v522_v48 = vmul.f32 %v521_v47, %v3055_v13 }
 0xb94   :  { %2606 = vmatmul.msk.f32.vlgmr.msrb.gmra.mxu1 %vm129_vm5, %v522_v48 }
 0xb95   :  { %1158 = vmatpush.msrb.mxu1 %v3006_v0 }
 0xb97   :  { %1159 = vmatpush.msrb.mxu1 %v3014_v2 }
 0xb99   :  { %1160 = vmatpush.msrb.mxu1 %v3020_v5 }
 0xb9b   :  { %1161 = vmatpush.msrb.mxu1 %v3027_v8 }
 0xb9d   :  { %1162 = vmatpush.msrb.mxu1 %v3033_v9 }
 0xb9f   :  { %1163 = vmatpush.msrb.mxu1 %v3049_v11 }
 0xba1   :  { %1164 = vmatpush.msrb.mxu1 %v3061_v14 }
 0xba3   :  { %1165 = vmatpush.msrb.mxu1 %v3069_v15 }
 0xc11   :  { %v543_v53 = vpop.f32.mrf.mxu1 }
 0xc12   :  { %v546_v54 = vadd.f32 %v543_v53, %v520_v52 }
 0xc14   :  { %2726 = vtanh.f32 %v546_v54  ;;  %v2607_v56 = vmul.f32 -1.442695, %v546_v54  ;;  %v2950_v54 = vld [vmem:[%s3699_s1 + $0x38] sm:$0xff] }
 0xc16   :  { %2728 = vpow2.f32 %v2607_v56  ;;  %v2952_v56 = vld [vmem:[%s3699_s1 + $0x28] sm:$0xff] }
 0xc1a   :  { %v2727_v55 = vpop.eup %2726 }
 0xc1b   :  { %569 = vrot.lane.b32.xlu2 %v2727_v55, %s2984_s9  ;;  %v2951_v55 = vld [vmem:[%s3699_s1 + $0x30] sm:$0xff] }
 0xc1c   :  { %v2729_v57 = vpop.eup %2728 }
 0xc1d   :  { %v550_v58 = vadd.f32 1.0, %v2729_v57  ;;  %v2953_v57 = vld [vmem:[%s3699_s1 + $0x20] sm:$0xff] }
 0xc1f   :  { %2730 = vrcp.f32 %v550_v58  ;;  %v562_v1 = vand.u32 2147483648, %v550_v58  ;;  %vm556_vm4 = vweird.f32 %v550_v58  ;;  %v560_v3 = vand.u32 2147483647, %v550_v58 }
 0xc21   :  { %v563_v6 = vor.u32 1.1754944e-38, %v562_v1  ;;  %vm561_vm8 = vcmp.eq.f32.partialorder %v560_v3, 8.507059e+37 }
 0xc25   :  { %v2731_v59 = vpop.eup %2730 }
 0xc26   :  { %v552_v60 = vmul.f32 %v2731_v59, %v550_v58  ;;  %vm557_vm3 = vweird.f32 %v2731_v59  ;;  %v2954_v58 = vld [vmem:[%s3699_s1 + $0x18] sm:$0xff] }
 0xc27   :  { %vm558_vm7 = vmor %vm556_vm4, %vm557_vm3 }
 0xc28   :  { %v553_v61 = vsub.f32 1.0, %v552_v60 }
 0xc2a   :  { %v554_v62 = vmul.f32 %v2731_v59, %v553_v61  ;;  %v671_v61 = vld [vmem:[#allocation2 + $0xe] sm:$0x3] }
 0xc2c   :  { %v555_v63 = vadd.f32 %v2731_v59, %v554_v62 }
 0xc2e   :  { %v559_v4 = vsel %vm558_vm7, %v2731_v59, %v555_v63  ;;  %v672_v59 = vld [vmem:[#allocation3 + $0x10] sm:$0x3] }
 0xc2f   :  { %v564_v10 = vsel %vm561_vm8, %v563_v6, %v559_v4  ;;  %v674_v60 = vrot.slane %v672_v59, 6 }
 0xc30   :  { %v567_v21 = vmul.f32 %v564_v10, %v499_v41 }
 0xc31   :  { %v676_v62 = vsel %vm126_vm6, %v671_v61, %v674_v60  ;;  %v828_v61 = vld [vmem:[#allocation3 + $0xc] sm:$0x3] }
 0xc75   :  { %v570_v7 = vpop.permute.xlu2 %569 }
 0xc76   :  { %v572_v16 = vmul.f32 %v570_v7, %v564_v10 }
 0xc78   :  { %574 = vrot.lane.b32.xlu0 %v572_v16, %s2985_s10 }
 0xcea   :  { %v575_v22 = vpop.permute.xlu0 %574 }
 0xceb   :  { %v577_v23 = vadd.f32 %v575_v22, %v567_v21 }
 0xced   :  { %2732 = vtanh.f32 %v577_v23 }
 0xcf3   :  { %v2733_v24 = vpop.eup %2732 }
 0xcf4   :  { %580 = vrot.lane.b32.xlu1 %v2733_v24, %s2984_s9 }
 0xd66   :  { %v581_v25 = vpop.permute.xlu1 %580 }
 0xd67   :  { %v583_v26 = vmul.f32 %v581_v25, %v564_v10 }
 0xd69   :  { %589 = vrot.lane.b32.xlu0 %v583_v26, %s2984_s9  ;;  %585 = vrot.lane.b32.xlu2 %v583_v26, %s2985_s10 }
 0xdc3   :  { %v586_v27 = vpop.permute.xlu2 %585 }
 0xdc4   :  { %588 = vst.msk [vmem:[#allocation4 + $0xa] sm:$0x3] %vm195_vm11, %v586_v27 }
 0xddb   :  { %v590_v17 = vpop.permute.xlu0 %589 }
 0xddc   :  { %592 = vst.msk [vmem:[#allocation4 + $0x12] sm:$0xc] %vm200_vm12, %v590_v17  ;;  %v599_v18 = vsel %vm208_vm13, %v586_v27, %v590_v17 }
 0xddd   :  { %v600_v19 = vmul.f32 %v599_v18, %v3055_v13 }
 0xddf   :  { %2608 = vmatmul.msk.f32.vlgmr.msrb.gmra.mxu2 %vm129_vm5, %v600_v19 }
 0xde0   :  { %1236 = vmatpush.msrb.mxu2 %v3006_v0 }
 0xde2   :  { %1237 = vmatpush.msrb.mxu2 %v3014_v2 }
 0xde4   :  { %1238 = vmatpush.msrb.mxu2 %v3020_v5 }
 0xde6   :  { %1239 = vmatpush.msrb.mxu2 %v3027_v8 }
 0xde8   :  { %1240 = vmatpush.msrb.mxu2 %v3033_v9 }
 0xdea   :  { %1241 = vmatpush.msrb.mxu2 %v3049_v11 }
 0xdec   :  { %1242 = vmatpush.msrb.mxu2 %v3061_v14 }
 0xdee   :  { %1243 = vmatpush.msrb.mxu2 %v3069_v15 }
 0xe62   :  { %v621_v0 = vpop.f32.mrf.mxu2 }
 0xe63   :  { %v624_v31 = vadd.f32 %v621_v0, %v598_v30 }
 0xe65   :  { %2734 = vtanh.f32 %v624_v31  ;;  %v2609_v5 = vmul.f32 -1.442695, %v624_v31 }
 0xe67   :  { %2736 = vpow2.f32 %v2609_v5  ;;  %v750_v5 = vld [vmem:[#allocation3 + $0xe] sm:$0x3] }
 0xe6b   :  { %v2735_v2 = vpop.eup %2734 }
 0xe6c   :  { %647 = vrot.lane.b32.xlu1 %v2735_v2, %s2984_s9 }
 0xe6d   :  { %v2737_v8 = vpop.eup %2736 }
 0xe6e   :  { %v628_v9 = vadd.f32 1.0, %v2737_v8  ;;  %v752_v8 = vrot.slane %v750_v5, 6 }
 0xe70   :  { %2738 = vrcp.f32 %v628_v9  ;;  %v640_v37 = vand.u32 2147483648, %v628_v9  ;;  %vm634_vm10 = vweird.f32 %v628_v9  ;;  %v638_v38 = vand.u32 2147483647, %v628_v9 }
 0xe72   :  { %v641_v40 = vor.u32 1.1754944e-38, %v640_v37  ;;  %vm639_vm15 = vcmp.eq.f32.partialorder %v638_v38, 8.507059e+37 }
 0xe76   :  { %v2739_v32 = vpop.eup %2738 }
 0xe77   :  { %v630_v33 = vmul.f32 %v2739_v32, %v628_v9  ;;  %vm635_vm9 = vweird.f32 %v2739_v32  ;;  %v749_v9 = vld [vmem:[#allocation2 + $0x10] sm:$0x3] }
 0xe78   :  { %vm636_vm14 = vmor %vm634_vm10, %vm635_vm9 }
 0xe79   :  { %v631_v34 = vsub.f32 1.0, %v630_v33 }
 0xe7b   :  { %v632_v35 = vmul.f32 %v2739_v32, %v631_v34 }
 0xe7d   :  { %v633_v36 = vadd.f32 %v2739_v32, %v632_v35 }
 0xe7f   :  { %v637_v39 = vsel %vm636_vm14, %v2739_v32, %v633_v36  ;;  %v754_v32 = vsel %vm126_vm6, %v749_v9, %v752_v8  ;;  %v906_v9 = vld [vmem:[#allocation3 + $0xa] sm:$0x3] }
 0xe80   :  { %v642_v42 = vsel %vm639_vm15, %v641_v40, %v637_v39 }
 0xe81   :  { %v645_v44 = vmul.f32 %v642_v42, %v577_v23 }
 0xede   :  { %v648_v41 = vpop.permute.xlu1 %647 }
 0xedf   :  { %v650_v43 = vmul.f32 %v648_v41, %v642_v42 }
 0xee1   :  { %652 = vrot.lane.b32.xlu2 %v650_v43, %s2985_s10 }
 0xf3b   :  { %v653_v45 = vpop.permute.xlu2 %652 }
 0xf3c   :  { %v655_v46 = vadd.f32 %v653_v45, %v645_v44 }
 0xf3e   :  { %2740 = vtanh.f32 %v655_v46 }
 0xf44   :  { %v2741_v47 = vpop.eup %2740 }
 0xf45   :  { %658 = vrot.lane.b32.xlu0 %v2741_v47, %s2984_s9 }
 0xfb7   :  { %v659_v48 = vpop.permute.xlu0 %658 }
 0xfb8   :  { %v661_v49 = vmul.f32 %v659_v48, %v642_v42 }
 0xfba   :  { %667 = vrot.lane.b32.xlu2 %v661_v49, %s2984_s9  ;;  %663 = vrot.lane.b32.xlu1 %v661_v49, %s2985_s10 }
0x1014   :  { %v668_v50 = vpop.permute.xlu2 %667 }
0x1015   :  { %670 = vst.msk [vmem:[#allocation4 + $0x10] sm:$0xc] %vm200_vm12, %v668_v50 }
0x102c   :  { %v664_v51 = vpop.permute.xlu1 %663 }
0x102d   :  { %666 = vst.msk [vmem:[#allocation4 + $0xc] sm:$0x3] %vm195_vm11, %v664_v51  ;;  %v677_v52 = vsel %vm208_vm13, %v664_v51, %v668_v50 }
0x102e   :  { %v678_v53 = vmul.f32 %v677_v52, %v3055_v13 }
0x1030   :  { %2610 = vmatmul.msk.f32.vlgmr.msrb.gmra.mxu3 %vm129_vm5, %v678_v53 }
0x1031   :  { %1314 = vmatpush.msrb.mxu3 %v2950_v54 }
0x1033   :  { %1315 = vmatpush.msrb.mxu3 %v2951_v55 }
0x1035   :  { %1316 = vmatpush.msrb.mxu3 %v2952_v56 }
0x1037   :  { %1317 = vmatpush.msrb.mxu3 %v2953_v57 }
0x1039   :  { %1318 = vmatpush.msrb.mxu3 %v2954_v58 }
0x103b   :  { %1319 = vmatpush.msrb.mxu3 %v3049_v11 }
0x103d   :  { %1320 = vmatpush.msrb.mxu3 %v3061_v14 }
0x103f   :  { %1321 = vmatpush.msrb.mxu3 %v3069_v15 }
0x10b3   :  { %v699_v63 = vpop.f32.mrf.mxu3 }
0x10b4   :  { %v702_v1 = vadd.f32 %v699_v63, %v676_v62  ;;  %v830_v62 = vrot.slane %v828_v61, 6  ;;  %v827_v63 = vld [vmem:[#allocation2 + $0x12] sm:$0x3] }
0x10b6   :  { %2742 = vtanh.f32 %v702_v1  ;;  %v2611_v4 = vmul.f32 -1.442695, %v702_v1  ;;  %v832_v1 = vsel %vm126_vm6, %v827_v63, %v830_v62  ;;  %v984_v63 = vld [vmem:[#allocation3 + $0x8] sm:$0x3] }
0x10b8   :  { %2744 = vpow2.f32 %v2611_v4 }
0x10bc   :  { %v2743_v3 = vpop.eup %2742 }
0x10bd   :  { %725 = vrot.lane.b32.xlu0 %v2743_v3, %s2984_s9 }
0x10be   :  { %v2745_v6 = vpop.eup %2744 }
0x10bf   :  { %v706_v7 = vadd.f32 1.0, %v2745_v6 }
0x10c1   :  { %2746 = vrcp.f32 %v706_v7  ;;  %v718_v21 = vand.u32 2147483648, %v706_v7  ;;  %vm712_vm1 = vweird.f32 %v706_v7  ;;  %v716_v22 = vand.u32 2147483647, %v706_v7 }
0x10c3   :  { %v719_v24 = vor.u32 1.1754944e-38, %v718_v21  ;;  %vm717_vm3 = vcmp.eq.f32.partialorder %v716_v22, 8.507059e+37 }
0x10c7   :  { %v2747_v11 = vpop.eup %2746 }
0x10c8   :  { %v708_v14 = vmul.f32 %v2747_v11, %v706_v7  ;;  %vm713_vm0 = vweird.f32 %v2747_v11 }
0x10c9   :  { %vm714_vm2 = vmor %vm712_vm1, %vm713_vm0 }
0x10ca   :  { %v709_v10 = vsub.f32 1.0, %v708_v14 }
0x10cc   :  { %v710_v15 = vmul.f32 %v2747_v11, %v709_v10 }
0x10ce   :  { %v711_v16 = vadd.f32 %v2747_v11, %v710_v15 }
0x10d0   :  { %v715_v23 = vsel %vm714_vm2, %v2747_v11, %v711_v16 }
0x10d1   :  { %v720_v26 = vsel %vm717_vm3, %v719_v24, %v715_v23 }
0x10d2   :  { %v723_v17 = vmul.f32 %v720_v26, %v655_v46 }
0x112f   :  { %v726_v25 = vpop.permute.xlu0 %725 }
0x1130   :  { %v728_v27 = vmul.f32 %v726_v25, %v720_v26 }
0x1132   :  { %730 = vrot.lane.b32.xlu1 %v728_v27, %s2985_s10 }
0x11a4   :  { %v731_v18 = vpop.permute.xlu1 %730 }
0x11a5   :  { %v733_v19 = vadd.f32 %v731_v18, %v723_v17 }
0x11a7   :  { %2748 = vtanh.f32 %v733_v19 }
0x11ad   :  { %v2749_v20 = vpop.eup %2748 }
0x11ae   :  { %736 = vrot.lane.b32.xlu2 %v2749_v20, %s2984_s9 }
0x1208   :  { %v737_v28 = vpop.permute.xlu2 %736 }
0x1209   :  { %v739_v29 = vmul.f32 %v737_v28, %v720_v26 }
0x120b   :  { %745 = vrot.lane.b32.xlu1 %v739_v29, %s2984_s9  ;;  %741 = vrot.lane.b32.xlu0 %v739_v29, %s2985_s10 }
0x127d   :  { %v746_v30 = vpop.permute.xlu1 %745  ;;  %v742_v0 = vpop.permute.xlu0 %741 }
0x127e   :  { %748 = vst.msk [vmem:[#allocation4 + $0xe] sm:$0xc] %vm200_vm12, %v746_v30  ;;  %v755_v31 = vsel %vm208_vm13, %v742_v0, %v746_v30 }
0x127f   :  { %744 = vst.msk [vmem:[#allocation4 + $0xe] sm:$0x3] %vm195_vm11, %v742_v0  ;;  %v756_v2 = vmul.f32 %v755_v31, %v3055_v13 }
0x1281   :  { %2612 = vmatmul.msk.f32.vlgmr.msra.gmra.mxu0 %vm129_vm5, %v756_v2 }
0x12fe   :  { %v777_v33 = vpop.f32.mrf.mxu0 }
0x12ff   :  { %v780_v34 = vadd.f32 %v777_v33, %v754_v32  ;;  %v908_v32 = vrot.slane %v906_v9, 6  ;;  %v905_v33 = vld [vmem:[#allocation2 + $0x14] sm:$0x3] }
0x1301   :  { %2750 = vtanh.f32 %v780_v34  ;;  %v2613_v36 = vmul.f32 -1.442695, %v780_v34  ;;  %v910_v34 = vsel %vm126_vm6, %v905_v33, %v908_v32  ;;  %v1062_v33 = vld [vmem:[#allocation3 + $0x6] sm:$0x3] }
0x1303   :  { %2752 = vpow2.f32 %v2613_v36 }
0x1307   :  { %v2751_v35 = vpop.eup %2750 }
0x1308   :  { %803 = vrot.lane.b32.xlu2 %v2751_v35, %s2984_s9 }
0x1309   :  { %v2753_v37 = vpop.eup %2752 }
0x130a   :  { %v784_v38 = vadd.f32 1.0, %v2753_v37 }
0x130c   :  { %2754 = vrcp.f32 %v784_v38  ;;  %v796_v44 = vand.u32 2147483648, %v784_v38  ;;  %vm790_vm7 = vweird.f32 %v784_v38  ;;  %v794_v45 = vand.u32 2147483647, %v784_v38 }
0x130e   :  { %v797_v47 = vor.u32 1.1754944e-38, %v796_v44  ;;  %vm795_vm9 = vcmp.eq.f32.partialorder %v794_v45, 8.507059e+37 }
0x1312   :  { %v2755_v39 = vpop.eup %2754 }
0x1313   :  { %v786_v40 = vmul.f32 %v2755_v39, %v784_v38  ;;  %vm791_vm4 = vweird.f32 %v2755_v39 }
0x1314   :  { %vm792_vm8 = vmor %vm790_vm7, %vm791_vm4 }
0x1315   :  { %v787_v41 = vsub.f32 1.0, %v786_v40 }
0x1317   :  { %v788_v42 = vmul.f32 %v2755_v39, %v787_v41 }
0x1319   :  { %v789_v43 = vadd.f32 %v2755_v39, %v788_v42 }
0x131b   :  { %v793_v46 = vsel %vm792_vm8, %v2755_v39, %v789_v43 }
0x131c   :  { %v798_v49 = vsel %vm795_vm9, %v797_v47, %v793_v46 }
0x131d   :  { %v801_v51 = vmul.f32 %v798_v49, %v733_v19 }
0x1362   :  { %v804_v48 = vpop.permute.xlu2 %803 }
0x1363   :  { %v806_v50 = vmul.f32 %v804_v48, %v798_v49 }
0x1365   :  { %808 = vrot.lane.b32.xlu0 %v806_v50, %s2985_s10 }
0x13d7   :  { %v809_v52 = vpop.permute.xlu0 %808 }
0x13d8   :  { %v811_v53 = vadd.f32 %v809_v52, %v801_v51 }
0x13da   :  { %2756 = vtanh.f32 %v811_v53 }
0x13e0   :  { %v2757_v54 = vpop.eup %2756 }
0x13e1   :  { %814 = vrot.lane.b32.xlu1 %v2757_v54, %s2984_s9 }
0x1453   :  { %v815_v55 = vpop.permute.xlu1 %814 }
0x1454   :  { %v817_v56 = vmul.f32 %v815_v55, %v798_v49 }
0x1456   :  { %823 = vrot.lane.b32.xlu0 %v817_v56, %s2984_s9  ;;  %819 = vrot.lane.b32.xlu2 %v817_v56, %s2985_s10 }
0x14b0   :  { %v820_v57 = vpop.permute.xlu2 %819 }
0x14b1   :  { %822 = vst.msk [vmem:[#allocation4 + $0x10] sm:$0x3] %vm195_vm11, %v820_v57 }
0x14c8   :  { %v824_v58 = vpop.permute.xlu0 %823 }
0x14c9   :  { %826 = vst.msk [vmem:[#allocation4 + $0xc] sm:$0xc] %vm200_vm12, %v824_v58  ;;  %v833_v59 = vsel %vm208_vm13, %v820_v57, %v824_v58 }
0x14ca   :  { %v834_v60 = vmul.f32 %v833_v59, %v3055_v13 }
0x14cc   :  { %2614 = vmatmul.msk.f32.vlgmr.msra.gmra.mxu1 %vm129_vm5, %v834_v60 }
0x1549   :  { %v855_v3 = vpop.f32.mrf.mxu1 }
0x154a   :  { %v858_v4 = vadd.f32 %v855_v3, %v832_v1  ;;  %v986_v1 = vrot.slane %v984_v63, 6  ;;  %v983_v3 = vld [vmem:[#allocation2 + $0x16] sm:$0x3] }
0x154c   :  { %2758 = vtanh.f32 %v858_v4  ;;  %v2615_v7 = vmul.f32 -1.442695, %v858_v4  ;;  %v988_v4 = vsel %vm126_vm6, %v983_v3, %v986_v1  ;;  %v1140_v3 = vld [vmem:[#allocation3 + $0x4] sm:$0x3] }
0x154e   :  { %2760 = vpow2.f32 %v2615_v7 }
0x1552   :  { %v2759_v6 = vpop.eup %2758 }
0x1553   :  { %881 = vrot.lane.b32.xlu1 %v2759_v6, %s2984_s9 }
0x1554   :  { %v2761_v11 = vpop.eup %2760 }
0x1555   :  { %v862_v14 = vadd.f32 1.0, %v2761_v11 }
0x1557   :  { %2762 = vrcp.f32 %v862_v14  ;;  %v874_v23 = vand.u32 2147483648, %v862_v14  ;;  %vm868_vm14 = vweird.f32 %v862_v14  ;;  %v872_v24 = vand.u32 2147483647, %v862_v14 }
0x1559   :  { %v875_v26 = vor.u32 1.1754944e-38, %v874_v23  ;;  %vm873_vm0 = vcmp.eq.f32.partialorder %v872_v24, 8.507059e+37 }
0x155d   :  { %v2763_v10 = vpop.eup %2762 }
0x155e   :  { %v864_v15 = vmul.f32 %v2763_v10, %v862_v14  ;;  %vm869_vm10 = vweird.f32 %v2763_v10 }
0x155f   :  { %vm870_vm15 = vmor %vm868_vm14, %vm869_vm10 }
0x1560   :  { %v865_v16 = vsub.f32 1.0, %v864_v15 }
0x1562   :  { %v866_v21 = vmul.f32 %v2763_v10, %v865_v16 }
0x1564   :  { %v867_v22 = vadd.f32 %v2763_v10, %v866_v21 }
0x1566   :  { %v871_v25 = vsel %vm870_vm15, %v2763_v10, %v867_v22 }
0x1567   :  { %v876_v17 = vsel %vm873_vm0, %v875_v26, %v871_v25 }
0x1568   :  { %v879_v19 = vmul.f32 %v876_v17, %v811_v53 }
0x15c5   :  { %v882_v27 = vpop.permute.xlu1 %881 }
0x15c6   :  { %v884_v18 = vmul.f32 %v882_v27, %v876_v17 }
0x15c8   :  { %886 = vrot.lane.b32.xlu2 %v884_v18, %s2985_s10 }
0x1622   :  { %v887_v20 = vpop.permute.xlu2 %886 }
0x1623   :  { %v889_v28 = vadd.f32 %v887_v20, %v879_v19 }
0x1625   :  { %2764 = vtanh.f32 %v889_v28 }
0x162b   :  { %v2765_v29 = vpop.eup %2764 }
0x162c   :  { %892 = vrot.lane.b32.xlu0 %v2765_v29, %s2984_s9 }
0x169e   :  { %v893_v30 = vpop.permute.xlu0 %892 }
0x169f   :  { %v895_v0 = vmul.f32 %v893_v30, %v876_v17 }
0x16a1   :  { %901 = vrot.lane.b32.xlu2 %v895_v0, %s2984_s9  ;;  %897 = vrot.lane.b32.xlu1 %v895_v0, %s2985_s10 }
0x16fb   :  { %v902_v31 = vpop.permute.xlu2 %901 }
0x16fc   :  { %904 = vst.msk [vmem:[#allocation4 + $0xa] sm:$0xc] %vm200_vm12, %v902_v31 }
0x1713   :  { %v898_v2 = vpop.permute.xlu1 %897 }
0x1714   :  { %900 = vst.msk [vmem:[#allocation4 + $0x12] sm:$0x3] %vm195_vm11, %v898_v2  ;;  %v911_v5 = vsel %vm208_vm13, %v898_v2, %v902_v31 }
0x1715   :  { %v912_v8 = vmul.f32 %v911_v5, %v3055_v13 }
0x1717   :  { %2616 = vmatmul.msk.f32.vlgmr.msra.gmra.mxu2 %vm129_vm5, %v912_v8 }
0x179a   :  { %v933_v35 = vpop.f32.mrf.mxu2 }
0x179b   :  { %v936_v36 = vadd.f32 %v933_v35, %v910_v34  ;;  %v1064_v34 = vrot.slane %v1062_v33, 6  ;;  %v1061_v35 = vld [vmem:[#allocation2 + $0x18] sm:$0x3] }
0x179d   :  { %2766 = vtanh.f32 %v936_v36  ;;  %v2617_v38 = vmul.f32 -1.442695, %v936_v36  ;;  %v1066_v36 = vsel %vm126_vm6, %v1061_v35, %v1064_v34  ;;  %v1218_v35 = vld [vmem:[#allocation3 + $0x2] sm:$0x3] }
0x179f   :  { %2768 = vpow2.f32 %v2617_v38 }
0x17a3   :  { %v2767_v37 = vpop.eup %2766 }
0x17a4   :  { %959 = vrot.lane.b32.xlu0 %v2767_v37, %s2984_s9 }
0x17a5   :  { %v2769_v39 = vpop.eup %2768 }
0x17a6   :  { %v940_v40 = vadd.f32 1.0, %v2769_v39 }
0x17a8   :  { %2770 = vrcp.f32 %v940_v40  ;;  %v952_v46 = vand.u32 2147483648, %v940_v40  ;;  %vm946_vm2 = vweird.f32 %v940_v40  ;;  %v950_v47 = vand.u32 2147483647, %v940_v40 }
0x17aa   :  { %v953_v49 = vor.u32 1.1754944e-38, %v952_v46  ;;  %vm951_vm4 = vcmp.eq.f32.partialorder %v950_v47, 8.507059e+37 }
0x17ae   :  { %v2771_v41 = vpop.eup %2770 }
0x17af   :  { %v942_v42 = vmul.f32 %v2771_v41, %v940_v40  ;;  %vm947_vm1 = vweird.f32 %v2771_v41 }
0x17b0   :  { %vm948_vm3 = vmor %vm946_vm2, %vm947_vm1 }
0x17b1   :  { %v943_v43 = vsub.f32 1.0, %v942_v42 }
0x17b3   :  { %v944_v44 = vmul.f32 %v2771_v41, %v943_v43 }
0x17b5   :  { %v945_v45 = vadd.f32 %v2771_v41, %v944_v44 }
0x17b7   :  { %v949_v48 = vsel %vm948_vm3, %v2771_v41, %v945_v45 }
0x17b8   :  { %v954_v51 = vsel %vm951_vm4, %v953_v49, %v949_v48 }
0x17b9   :  { %v957_v53 = vmul.f32 %v954_v51, %v889_v28 }
0x1816   :  { %v960_v50 = vpop.permute.xlu0 %959 }
0x1817   :  { %v962_v52 = vmul.f32 %v960_v50, %v954_v51 }
0x1819   :  { %964 = vrot.lane.b32.xlu1 %v962_v52, %s2985_s10 }
0x188b   :  { %v965_v54 = vpop.permute.xlu1 %964 }
0x188c   :  { %v967_v55 = vadd.f32 %v965_v54, %v957_v53 }
0x188e   :  { %2772 = vtanh.f32 %v967_v55 }
0x1894   :  { %v2773_v56 = vpop.eup %2772 }
0x1895   :  { %970 = vrot.lane.b32.xlu2 %v2773_v56, %s2984_s9 }
0x18ef   :  { %v971_v57 = vpop.permute.xlu2 %970 }
0x18f0   :  { %v973_v58 = vmul.f32 %v971_v57, %v954_v51 }
0x18f2   :  { %979 = vrot.lane.b32.xlu1 %v973_v58, %s2984_s9  ;;  %975 = vrot.lane.b32.xlu0 %v973_v58, %s2985_s10 }
0x1964   :  { %v980_v59 = vpop.permute.xlu1 %979  ;;  %v976_v60 = vpop.permute.xlu0 %975 }
0x1965   :  { %982 = vst.msk [vmem:[#allocation4 + $0x8] sm:$0xc] %vm200_vm12, %v980_v59  ;;  %v989_v61 = vsel %vm208_vm13, %v976_v60, %v980_v59 }
0x1966   :  { %978 = vst.msk [vmem:[#allocation4 + $0x14] sm:$0x3] %vm195_vm11, %v976_v60  ;;  %v990_v62 = vmul.f32 %v989_v61, %v3055_v13 }
0x1968   :  { %2618 = vmatmul.msk.f32.vlgmr.msra.gmra.mxu3 %vm129_vm5, %v990_v62 }
0x19eb   :  { %v1011_v6 = vpop.f32.mrf.mxu3 }
0x19ec   :  { %v1014_v7 = vadd.f32 %v1011_v6, %v988_v4  ;;  %v1142_v4 = vrot.slane %v1140_v3, 6  ;;  %v1139_v6 = vld [vmem:[#allocation2 + $0x1a] sm:$0x3] }
0x19ee   :  { %2774 = vtanh.f32 %v1014_v7  ;;  %v2619_v14 = vmul.f32 -1.442695, %v1014_v7  ;;  %v1144_v7 = vsel %vm126_vm6, %v1139_v6, %v1142_v4  ;;  %v1296_v6 = vld [vmem:[#allocation3] sm:$0x3] }
0x19f0   :  { %2776 = vpow2.f32 %v2619_v14 }
0x19f4   :  { %v2775_v11 = vpop.eup %2774 }
0x19f5   :  { %1037 = vrot.lane.b32.xlu2 %v2775_v11, %s2984_s9 }
0x19f6   :  { %v2777_v10 = vpop.eup %2776 }
0x19f7   :  { %v1018_v15 = vadd.f32 1.0, %v2777_v10 }
0x19f9   :  { %2778 = vrcp.f32 %v1018_v15  ;;  %v1030_v25 = vand.u32 2147483648, %v1018_v15  ;;  %vm1024_vm8 = vweird.f32 %v1018_v15  ;;  %v1028_v26 = vand.u32 2147483647, %v1018_v15 }
0x19fb   :  { %v1031_v17 = vor.u32 1.1754944e-38, %v1030_v25  ;;  %vm1029_vm10 = vcmp.eq.f32.partialorder %v1028_v26, 8.507059e+37 }
0x19ff   :  { %v2779_v16 = vpop.eup %2778 }
0x1a00   :  { %v1020_v21 = vmul.f32 %v2779_v16, %v1018_v15  ;;  %vm1025_vm7 = vweird.f32 %v2779_v16 }
0x1a01   :  { %vm1026_vm9 = vmor %vm1024_vm8, %vm1025_vm7 }
0x1a02   :  { %v1021_v22 = vsub.f32 1.0, %v1020_v21 }
0x1a04   :  { %v1022_v23 = vmul.f32 %v2779_v16, %v1021_v22 }
0x1a06   :  { %v1023_v24 = vadd.f32 %v2779_v16, %v1022_v23 }
0x1a08   :  { %v1027_v27 = vsel %vm1026_vm9, %v2779_v16, %v1023_v24 }
0x1a09   :  { %v1032_v19 = vsel %vm1029_vm10, %v1031_v17, %v1027_v27 }
0x1a0a   :  { %v1035_v28 = vmul.f32 %v1032_v19, %v967_v55 }
0x1a4f   :  { %v1038_v18 = vpop.permute.xlu2 %1037 }
0x1a50   :  { %v1040_v20 = vmul.f32 %v1038_v18, %v1032_v19 }
0x1a52   :  { %1042 = vrot.lane.b32.xlu0 %v1040_v20, %s2985_s10 }
0x1ac4   :  { %v1043_v29 = vpop.permute.xlu0 %1042 }
0x1ac5   :  { %v1045_v30 = vadd.f32 %v1043_v29, %v1035_v28 }
0x1ac7   :  { %2780 = vtanh.f32 %v1045_v30 }
0x1acd   :  { %v2781_v0 = vpop.eup %2780 }
0x1ace   :  { %1048 = vrot.lane.b32.xlu1 %v2781_v0, %s2984_s9 }
0x1b40   :  { %v1049_v31 = vpop.permute.xlu1 %1048 }
0x1b41   :  { %v1051_v2 = vmul.f32 %v1049_v31, %v1032_v19 }
0x1b43   :  { %1057 = vrot.lane.b32.xlu0 %v1051_v2, %s2984_s9  ;;  %1053 = vrot.lane.b32.xlu2 %v1051_v2, %s2985_s10 }
0x1b9d   :  { %v1054_v5 = vpop.permute.xlu2 %1053 }
0x1b9e   :  { %1056 = vst.msk [vmem:[#allocation4 + $0x16] sm:$0x3] %vm195_vm11, %v1054_v5 }
0x1bb5   :  { %v1058_v8 = vpop.permute.xlu0 %1057 }
0x1bb6   :  { %1060 = vst.msk [vmem:[#allocation4 + $0x6] sm:$0xc] %vm200_vm12, %v1058_v8  ;;  %v1067_v9 = vsel %vm208_vm13, %v1054_v5, %v1058_v8 }
0x1bb7   :  { %v1068_v32 = vmul.f32 %v1067_v9, %v3055_v13 }
0x1bb9   :  { %2620 = vmatmul.msk.f32.vlgmr.msrb.gmra.mxu0 %vm129_vm5, %v1068_v32 }
0x1c36   :  { %v1089_v37 = vpop.f32.mrf.mxu0 }
0x1c37   :  { %v1092_v38 = vadd.f32 %v1089_v37, %v1066_v36  ;;  %v1220_v36 = vrot.slane %v1218_v35, 6  ;;  %v1217_v37 = vld [vmem:[#allocation2 + $0x1c] sm:$0x3] }
0x1c39   :  { %2782 = vtanh.f32 %v1092_v38  ;;  %v2621_v40 = vmul.f32 -1.442695, %v1092_v38  ;;  %v1222_v38 = vsel %vm126_vm6, %v1217_v37, %v1220_v36  ;;  %v27_v36 = vld [vmem:[%s3699_s1 + $0x5c] sm:$0xff]  ;;  %v26_v37 = vld [vmem:[%s3699_s1 + $0x54] sm:$0xff] }
0x1c3b   :  { %2784 = vpow2.f32 %v2621_v40 }
0x1c3f   :  { %v2783_v39 = vpop.eup %2782 }
0x1c40   :  { %1115 = vrot.lane.b32.xlu1 %v2783_v39, %s2984_s9 }
0x1c41   :  { %v2785_v41 = vpop.eup %2784 }
0x1c42   :  { %v1096_v42 = vadd.f32 1.0, %v2785_v41 }
0x1c44   :  { %2786 = vrcp.f32 %v1096_v42  ;;  %v1108_v48 = vand.u32 2147483648, %v1096_v42  ;;  %vm1102_vm15 = vweird.f32 %v1096_v42  ;;  %v1106_v49 = vand.u32 2147483647, %v1096_v42 }
0x1c46   :  { %v1109_v51 = vor.u32 1.1754944e-38, %v1108_v48  ;;  %vm1107_vm1 = vcmp.eq.f32.partialorder %v1106_v49, 8.507059e+37 }
0x1c4a   :  { %v2787_v43 = vpop.eup %2786 }
0x1c4b   :  { %v1098_v44 = vmul.f32 %v2787_v43, %v1096_v42  ;;  %vm1103_vm14 = vweird.f32 %v2787_v43 }
0x1c4c   :  { %vm1104_vm0 = vmor %vm1102_vm15, %vm1103_vm14 }
0x1c4d   :  { %v1099_v45 = vsub.f32 1.0, %v1098_v44 }
0x1c4f   :  { %v1100_v46 = vmul.f32 %v2787_v43, %v1099_v45 }
0x1c51   :  { %v1101_v47 = vadd.f32 %v2787_v43, %v1100_v46 }
0x1c53   :  { %v1105_v50 = vsel %vm1104_vm0, %v2787_v43, %v1101_v47 }
0x1c54   :  { %v1110_v53 = vsel %vm1107_vm1, %v1109_v51, %v1105_v50 }
0x1c55   :  { %v1113_v55 = vmul.f32 %v1110_v53, %v1045_v30 }
0x1cb2   :  { %v1116_v52 = vpop.permute.xlu1 %1115 }
0x1cb3   :  { %v1118_v54 = vmul.f32 %v1116_v52, %v1110_v53 }
0x1cb5   :  { %1120 = vrot.lane.b32.xlu2 %v1118_v54, %s2985_s10 }
0x1d0f   :  { %v1121_v56 = vpop.permute.xlu2 %1120 }
0x1d10   :  { %v1123_v57 = vadd.f32 %v1121_v56, %v1113_v55 }
0x1d12   :  { %2788 = vtanh.f32 %v1123_v57 }
0x1d18   :  { %v2789_v58 = vpop.eup %2788 }
0x1d19   :  { %1126 = vrot.lane.b32.xlu0 %v2789_v58, %s2984_s9 }
0x1d8b   :  { %v1127_v59 = vpop.permute.xlu0 %1126 }
0x1d8c   :  { %v1129_v60 = vmul.f32 %v1127_v59, %v1110_v53 }
0x1d8e   :  { %1135 = vrot.lane.b32.xlu2 %v1129_v60, %s2984_s9  ;;  %1131 = vrot.lane.b32.xlu1 %v1129_v60, %s2985_s10 }
0x1de8   :  { %v1136_v61 = vpop.permute.xlu2 %1135 }
0x1de9   :  { %1138 = vst.msk [vmem:[#allocation4 + $0x4] sm:$0xc] %vm200_vm12, %v1136_v61 }
0x1e00   :  { %v1132_v62 = vpop.permute.xlu1 %1131 }
0x1e01   :  { %1134 = vst.msk [vmem:[#allocation4 + $0x18] sm:$0x3] %vm195_vm11, %v1132_v62  ;;  %v1145_v63 = vsel %vm208_vm13, %v1132_v62, %v1136_v61 }
0x1e02   :  { %v1146_v1 = vmul.f32 %v1145_v63, %v3055_v13 }
0x1e04   :  { %2622 = vmatmul.msk.f32.vlgmr.msrb.gmra.mxu1 %vm129_vm5, %v1146_v1 }
0x1e81   :  { %v1167_v11 = vpop.f32.mrf.mxu1 }
0x1e82   :  { %v1170_v14 = vadd.f32 %v1167_v11, %v1144_v7  ;;  %v1298_v7 = vrot.slane %v1296_v6, 6  ;;  %v1295_v11 = vld [vmem:[#allocation2 + $0x1e] sm:$0x3] }
0x1e84   :  { %2790 = vtanh.f32 %v1170_v14  ;;  %v2623_v15 = vmul.f32 -1.442695, %v1170_v14  ;;  %v1300_v14 = vsel %vm126_vm6, %v1295_v11, %v1298_v7 }
0x1e86   :  { %2792 = vpow2.f32 %v2623_v15 }
0x1e8a   :  { %v2791_v10 = vpop.eup %2790 }
0x1e8b   :  { %1193 = vrot.lane.b32.xlu0 %v2791_v10, %s2984_s9 }
0x1e8c   :  { %v2793_v16 = vpop.eup %2792 }
0x1e8d   :  { %v1174_v21 = vadd.f32 1.0, %v2793_v16 }
0x1e8f   :  { %2794 = vrcp.f32 %v1174_v21  ;;  %v1186_v27 = vand.u32 2147483648, %v1174_v21  ;;  %vm1180_vm3 = vweird.f32 %v1174_v21  ;;  %v1184_v17 = vand.u32 2147483647, %v1174_v21 }
0x1e91   :  { %v1187_v19 = vor.u32 1.1754944e-38, %v1186_v27  ;;  %vm1185_vm7 = vcmp.eq.f32.partialorder %v1184_v17, 8.507059e+37 }
0x1e95   :  { %v2795_v22 = vpop.eup %2794 }
0x1e96   :  { %v1176_v23 = vmul.f32 %v2795_v22, %v1174_v21  ;;  %vm1181_vm2 = vweird.f32 %v2795_v22 }
0x1e97   :  { %vm1182_vm4 = vmor %vm1180_vm3, %vm1181_vm2 }
0x1e98   :  { %v1177_v24 = vsub.f32 1.0, %v1176_v23 }
0x1e9a   :  { %v1178_v25 = vmul.f32 %v2795_v22, %v1177_v24 }
0x1e9c   :  { %v1179_v26 = vadd.f32 %v2795_v22, %v1178_v25 }
0x1e9e   :  { %v1183_v18 = vsel %vm1182_vm4, %v2795_v22, %v1179_v26 }
0x1e9f   :  { %v1188_v28 = vsel %vm1185_vm7, %v1187_v19, %v1183_v18 }
0x1ea0   :  { %v1191_v30 = vmul.f32 %v1188_v28, %v1123_v57 }
0x1efd   :  { %v1194_v20 = vpop.permute.xlu0 %1193 }
0x1efe   :  { %v1196_v29 = vmul.f32 %v1194_v20, %v1188_v28 }
0x1f00   :  { %1198 = vrot.lane.b32.xlu1 %v1196_v29, %s2985_s10 }
0x1f72   :  { %v1199_v0 = vpop.permute.xlu1 %1198 }
0x1f73   :  { %v1201_v31 = vadd.f32 %v1199_v0, %v1191_v30 }
0x1f75   :  { %2796 = vtanh.f32 %v1201_v31 }
0x1f7b   :  { %v2797_v2 = vpop.eup %2796 }
0x1f7c   :  { %1204 = vrot.lane.b32.xlu2 %v2797_v2, %s2984_s9 }
0x1fd6   :  { %v1205_v5 = vpop.permute.xlu2 %1204 }
0x1fd7   :  { %v1207_v8 = vmul.f32 %v1205_v5, %v1188_v28 }
0x1fd9   :  { %1213 = vrot.lane.b32.xlu1 %v1207_v8, %s2984_s9  ;;  %1209 = vrot.lane.b32.xlu0 %v1207_v8, %s2985_s10  ;;  %v31_v8 = vld [vmem:[%s3699_s1 + $0x7c] sm:$0xff] }
0x1fda   :  { %1398 = vmatpush.msra.mxu0 %v31_v8 }
0x204b   :  { %v1214_v9 = vpop.permute.xlu1 %1213  ;;  %v1210_v32 = vpop.permute.xlu0 %1209 }
0x204c   :  { %1216 = vst.msk [vmem:[#allocation4 + $0x2] sm:$0xc] %vm200_vm12, %v1214_v9  ;;  %v1223_v33 = vsel %vm208_vm13, %v1210_v32, %v1214_v9  ;;  %v30_v9 = vld [vmem:[%s3699_s1 + $0x74] sm:$0xff] }
0x204d   :  { %1212 = vst.msk [vmem:[#allocation4 + $0x1a] sm:$0x3] %vm195_vm11, %v1210_v32  ;;  %v1224_v34 = vmul.f32 %v1223_v33, %v3055_v13  ;;  %v29_v32 = vld [vmem:[%s3699_s1 + $0x6c] sm:$0xff]  ;;  %1399 = vmatpush.msra.mxu0 %v30_v9  ;;  %v28_v33 = vld [vmem:[%s3699_s1 + $0x64] sm:$0xff] }
0x204f   :  { %2624 = vmatmul.msk.f32.vlgmr.msrb.gmra.mxu2 %vm129_vm5, %v1224_v34  ;;  %1400 = vmatpush.msra.mxu0 %v29_v32 }
0x2051   :  { %1401 = vmatpush.msra.mxu0 %v28_v33 }
0x2053   :  { %1402 = vmatpush.msra.mxu0 %v27_v36 }
0x2055   :  { %1403 = vmatpush.msra.mxu0 %v26_v37 }
0x20d2   :  { %v1245_v39 = vpop.f32.mrf.mxu2 }
0x20d3   :  { %v1248_v40 = vadd.f32 %v1245_v39, %v1222_v38  ;;  %v25_v38 = vld [vmem:[%s3699_s1 + $0x4c] sm:$0xff]  ;;  %v24_v39 = vld [vmem:[%s3699_s1 + $0x44] sm:$0xff] }
0x20d4   :  { %1404 = vmatpush.msra.mxu0 %v25_v38 }
0x20d5   :  { %2798 = vtanh.f32 %v1248_v40  ;;  %v2625_v42 = vmul.f32 -1.442695, %v1248_v40  ;;  %v3438_v40 = vld [vmem:[%s3699_s1 + $0x9d] sm:$0xff] }
0x20d6   :  { %1405 = vmatpush.msra.mxu0 %v24_v39  ;;  %1439 = vmatpush.msra.mxu1 %v3438_v40 }
0x20d7   :  { %2800 = vpow2.f32 %v2625_v42  ;;  %1503 = vmatpush.msra.mxu2 %v3438_v40  ;;  %v3450_v42 = vld [vmem:[%s3699_s1 + $0x8d] sm:$0xff]  ;;  %1567 = vmatpush.msra.mxu3 %v3438_v40 }
0x20d8   :  { %2399 = vmatpush.msrb.mxu0 %v3438_v40 }
0x20db   :  { %v2799_v41 = vpop.eup %2798 }
0x20dc   :  { %1271 = vrot.lane.b32.xlu2 %v2799_v41, %s2984_s9  ;;  %v3443_v41 = vld [vmem:[%s3699_s1 + $0x95] sm:$0xff] }
0x20dd   :  { %v2801_v43 = vpop.eup %2800  ;;  %1440 = vmatpush.msra.mxu1 %v3443_v41  ;;  %1504 = vmatpush.msra.mxu2 %v3443_v41 }
0x20de   :  { %v1252_v44 = vadd.f32 1.0, %v2801_v43  ;;  %1568 = vmatpush.msra.mxu3 %v3443_v41  ;;  %2400 = vmatpush.msrb.mxu0 %v3443_v41  ;;  %v3465_v43 = vld [vmem:[%s3699_s1 + $0x85] sm:$0xff] }
0x20df   :  { %1441 = vmatpush.msra.mxu1 %v3450_v42  ;;  %1505 = vmatpush.msra.mxu2 %v3450_v42 }
0x20e0   :  { %2802 = vrcp.f32 %v1252_v44  ;;  %v1264_v50 = vand.u32 2147483648, %v1252_v44  ;;  %vm1258_vm9 = vweird.f32 %v1252_v44  ;;  %v1262_v51 = vand.u32 2147483647, %v1252_v44  ;;  %1569 = vmatpush.msra.mxu3 %v3450_v42  ;;  %2401 = vmatpush.msrb.mxu0 %v3450_v42 }
0x20e1   :  { %1442 = vmatpush.msra.mxu1 %v3465_v43  ;;  %1506 = vmatpush.msra.mxu2 %v3465_v43 }
0x20e2   :  { %v1265_v53 = vor.u32 1.1754944e-38, %v1264_v50  ;;  %vm1263_vm14 = vcmp.eq.f32.partialorder %v1262_v51, 8.507059e+37  ;;  %1443 = vmatmul.f32.vlgmr.msra.gmra.mxu1 %v2983_v12  ;;  %1570 = vmatpush.msra.mxu3 %v3465_v43 }
0x20e3   :  { %1631 = vmatpush.msrb.mxu1 %v3438_v40  ;;  %1695 = vmatpush.msrb.mxu2 %v3438_v40 }
0x20e4   :  { %2402 = vmatpush.msrb.mxu0 %v3465_v43 }
0x20e5   :  { %1632 = vmatpush.msrb.mxu1 %v3443_v41  ;;  %1696 = vmatpush.msrb.mxu2 %v3443_v41 }
0x20e6   :  { %v2803_v45 = vpop.eup %2802 }
0x20e7   :  { %v1254_v46 = vmul.f32 %v2803_v45, %v1252_v44  ;;  %vm1259_vm8 = vweird.f32 %v2803_v45  ;;  %1633 = vmatpush.msrb.mxu1 %v3450_v42  ;;  %1697 = vmatpush.msrb.mxu2 %v3450_v42 }
0x20e8   :  { %vm1260_vm10 = vmor %vm1258_vm9, %vm1259_vm8 }
0x20e9   :  { %v1255_v47 = vsub.f32 1.0, %v1254_v46  ;;  %1634 = vmatpush.msrb.mxu1 %v3465_v43  ;;  %1698 = vmatpush.msrb.mxu2 %v3465_v43  ;;  %v1375_v46 = vld [vmem:[#allocation4 + $0x10] sm:$0xff] }
0x20eb   :  { %v1256_v48 = vmul.f32 %v2803_v45, %v1255_v47  ;;  %1823 = vmatpush.msra.mxu1 %v3438_v40  ;;  %v3495_v47 = vld [vmem:[%s3699_s1 + $0x84] ss:$0 sm:$0xff] }
0x20ed   :  { %v1257_v49 = vadd.f32 %v2803_v45, %v1256_v48  ;;  %1824 = vmatpush.msra.mxu1 %v3443_v41 }
0x20ef   :  { %v1261_v52 = vsel %vm1260_vm10, %v2803_v45, %v1257_v49  ;;  %1825 = vmatpush.msra.mxu1 %v3450_v42  ;;  %v1374_v45 = vld [vmem:[#allocation4 + $0x8] sm:$0xff] }
0x20f0   :  { %v1266_v55 = vsel %vm1263_vm14, %v1265_v53, %v1261_v52 }
0x20f1   :  { %v1269_v57 = vmul.f32 %v1266_v55, %v1201_v31  ;;  %1826 = vmatpush.msra.mxu1 %v3465_v43 }
0x2136   :  { %v1272_v54 = vpop.permute.xlu2 %1271 }
0x2137   :  { %v1274_v56 = vmul.f32 %v1272_v54, %v1266_v55 }
0x2139   :  { %1276 = vrot.lane.b32.xlu0 %v1274_v56, %s2985_s10 }
0x215f   :  { %v1444_v51 = vpop.f32.mrf.mxu1 }
0x21ab   :  { %v1277_v58 = vpop.permute.xlu0 %1276 }
0x21ac   :  { %v1279_v59 = vadd.f32 %v1277_v58, %v1269_v57 }
0x21ae   :  { %2804 = vtanh.f32 %v1279_v59 }
0x21b4   :  { %v2805_v60 = vpop.eup %2804 }
0x21b5   :  { %1282 = vrot.lane.b32.xlu1 %v2805_v60, %s2984_s9 }
0x2227   :  { %v1283_v61 = vpop.permute.xlu1 %1282 }
0x2228   :  { %v1285_v62 = vmul.f32 %v1283_v61, %v1266_v55 }
0x222a   :  { %1291 = vrot.lane.b32.xlu0 %v1285_v62, %s2984_s9  ;;  %1287 = vrot.lane.b32.xlu2 %v1285_v62, %s2985_s10 }
0x2284   :  { %v1288_v63 = vpop.permute.xlu2 %1287 }
0x2285   :  { %1290 = vst.msk [vmem:[#allocation4 + $0x1c] sm:$0x3] %vm195_vm11, %v1288_v63 }
0x229c   :  { %v1292_v1 = vpop.permute.xlu0 %1291 }
0x229d   :  { %1294 = vst.msk [vmem:[#allocation4] sm:$0xc] %vm200_vm12, %v1292_v1  ;;  %v1301_v3 = vsel %vm208_vm13, %v1288_v63, %v1292_v1 }
0x229e   :  { %v1302_v4 = vmul.f32 %v1301_v3, %v3055_v13 }
0x22a0   :  { %2626 = vmatmul.msk.f32.vlgmr.msrb.gmra.mxu3 %vm129_vm5, %v1302_v4 }
0x22a1   :  { %1759 = vmatpush.msrb.mxu3 %v3438_v40 }
0x22a3   :  { %1760 = vmatpush.msrb.mxu3 %v3443_v41 }
0x22a5   :  { %1761 = vmatpush.msrb.mxu3 %v3450_v42 }
0x22a7   :  { %1762 = vmatpush.msrb.mxu3 %v3465_v43 }
0x2323   :  { %v1323_v10 = vpop.f32.mrf.mxu3 }
0x2324   :  { %v1326_v15 = vadd.f32 %v1323_v10, %v1300_v14 }
0x2326   :  { %2806 = vtanh.f32 %v1326_v15  ;;  %v2627_v21 = vmul.f32 -1.442695, %v1326_v15 }
0x2328   :  { %2808 = vpow2.f32 %v2627_v21 }
0x232c   :  { %v2807_v16 = vpop.eup %2806 }
0x232d   :  { %1349 = vrot.lane.b32.xlu1 %v2807_v16, %s2984_s9 }
0x232e   :  { %v2809_v22 = vpop.eup %2808 }
0x232f   :  { %v1330_v23 = vadd.f32 1.0, %v2809_v22 }
0x2331   :  { %2810 = vrcp.f32 %v1330_v23  ;;  %v1342_v17 = vand.u32 2147483648, %v1330_v23  ;;  %vm1336_vm0 = vweird.f32 %v1330_v23  ;;  %v1340_v18 = vand.u32 2147483647, %v1330_v23 }
0x2333   :  { %v1343_v20 = vor.u32 1.1754944e-38, %v1342_v17  ;;  %vm1341_vm1 = vcmp.eq.f32.partialorder %v1340_v18, 8.507059e+37 }
0x2337   :  { %v2811_v24 = vpop.eup %2810 }
0x2338   :  { %v1332_v13 = vmul.f32 %v2811_v24, %v1330_v23  ;;  %vm1337_vm15 = vweird.f32 %v2811_v24 }
0x2339   :  { %vm1338_vm6 = vmor %vm1336_vm0, %vm1337_vm15 }
0x233a   :  { %v1333_v25 = vsub.f32 1.0, %v1332_v13 }
0x233c   :  { %v1334_v26 = vmul.f32 %v2811_v24, %v1333_v25 }
0x233e   :  { %v1335_v27 = vadd.f32 %v2811_v24, %v1334_v26 }
0x2340   :  { %v1339_v19 = vsel %vm1338_vm6, %v2811_v24, %v1335_v27 }
0x2341   :  { %v1344_v29 = vsel %vm1341_vm1, %v1343_v20, %v1339_v19 }
0x2342   :  { %v1347_v0 = vmul.f32 %v1344_v29, %v1279_v59 }
0x239f   :  { %v1350_v28 = vpop.permute.xlu1 %1349 }
0x23a0   :  { %v1352_v30 = vmul.f32 %v1350_v28, %v1344_v29 }
0x23a2   :  { %1354 = vrot.lane.b32.xlu2 %v1352_v30, %s2985_s10 }
0x23fc   :  { %v1355_v31 = vpop.permute.xlu2 %1354 }
0x23fd   :  { %v1357_v2 = vadd.f32 %v1355_v31, %v1347_v0 }
0x23ff   :  { %2812 = vtanh.f32 %v1357_v2 }
0x2405   :  { %v2813_v5 = vpop.eup %2812 }
0x2406   :  { %1360 = vrot.lane.b32.xlu0 %v2813_v5, %s2984_s9 }
0x2478   :  { %v1361_v34 = vpop.permute.xlu0 %1360 }
0x2479   :  { %v3419_v35 = vmul.f32 %v1361_v34, %v1344_v29 }
0x247b   :  { %1369 = vrot.lane.b32.xlu1 %v3419_v35, %s2984_s9 }
0x24ed   :  { %v1370_v12 = vpop.permute.xlu1 %1369 }
0x24ee   :  { %1372 = vst.msk [vmem:[#allocation4 - $0x2] sm:$0xc] %vm200_vm12, %v1370_v12 }
0x24f5   :  { %v1373_v44 = vld [vmem:[#allocation4] sm:$0xff] }
0x24f6   :  { %2628 = vmatmul.msk.f32.vlgmr.msra.gmra.mxu0 %vm129_vm5, %v1373_v44 }
0x24fe   :  { %2629 = vmatmul.msk.f32.gmra.mxu0 %vm129_vm5, %v1374_v45 }
0x2506   :  { %2630 = vmatmul.msk.f32.gmra.mxu0 %vm129_vm5, %v1375_v46 }
0x2573   :  { %v1407_v48 = vpop.f32.mrf.mxu0 }
0x2574   :  { %v1408_v49 = vadd.f32 %v3495_v47, %v1407_v48 }
0x2576   :  { %1419 = vst [vmem:[#allocation5] sm:$0xff] %v1408_v49 }
0x257b   :  { %v1410_v50 = vpop.f32.mrf.mxu0 }
0x257c   :  { %v1411_v52 = vadd.f32 %v3495_v47, %v1410_v50 }
0x257d   :  { %v1423_v53 = vld [vmem:[#allocation5] sm:$0x3]  ;;  %v1485_v26 = vld [vmem:[#allocation5 + $0x2] sm:$0x3]  ;;  %v1549_v48 = vld [vmem:[#allocation5 + $0x4] sm:$0x3] }
0x257e   :  { %1420 = vst [vmem:[#allocation5 + $0x8] sm:$0xff] %v1411_v52  ;;  %v1447_v54 = vadd.f32 %v1444_v51, %v1423_v53 }
0x2580   :  { %2814 = vtanh.f32 %v1447_v54  ;;  %v2632_v58 = vmul.f32 -1.442695, %v1447_v54 }
0x2582   :  { %2816 = vpow2.f32 %v2632_v58 }
0x2583   :  { %v1413_v55 = vpop.f32.mrf.mxu0 }
0x2584   :  { %v1414_v56 = vadd.f32 %v3495_v47, %v1413_v55 }
0x2586   :  { %v2815_v57 = vpop.eup %2814  ;;  %1421 = vst [vmem:[#allocation5 + $0x10] sm:$0xff] %v1414_v56 }
0x2587   :  { %1470 = vrot.lane.b32.xlu2 %v2815_v57, %s2984_s9 }
0x2588   :  { %v2817_v59 = vpop.eup %2816 }
0x2589   :  { %v1451_v60 = vadd.f32 1.0, %v2817_v59 }
0x258b   :  { %2818 = vrcp.f32 %v1451_v60  ;;  %v1463_v4 = vand.u32 2147483648, %v1451_v60  ;;  %vm1457_vm2 = vweird.f32 %v1451_v60  ;;  %v1461_v6 = vand.u32 2147483647, %v1451_v60 }
0x258d   :  { %v1464_v11 = vor.u32 1.1754944e-38, %v1463_v4  ;;  %vm1462_vm4 = vcmp.eq.f32.partialorder %v1461_v6, 8.507059e+37 }
0x2591   :  { %v2819_v61 = vpop.eup %2818 }
0x2592   :  { %v1453_v62 = vmul.f32 %v2819_v61, %v1451_v60  ;;  %vm1458_vm12 = vweird.f32 %v2819_v61 }
0x2593   :  { %vm1459_vm3 = vmor %vm1457_vm2, %vm1458_vm12 }
0x2594   :  { %v1454_v63 = vsub.f32 1.0, %v1453_v62 }
0x2596   :  { %v1455_v1 = vmul.f32 %v2819_v61, %v1454_v63 }
0x2598   :  { %v1456_v3 = vadd.f32 %v2819_v61, %v1455_v1 }
0x259a   :  { %v1460_v7 = vsel %vm1459_vm3, %v2819_v61, %v1456_v3 }
0x259b   :  { %v1465_v10 = vsel %vm1462_vm4, %v1464_v11, %v1460_v7 }
0x259c   :  { %v1468_v16 = vmul.f32 0.0, %v1465_v10 }
0x25e1   :  { %v1471_v14 = vpop.permute.xlu2 %1470 }
0x25e2   :  { %v1473_v15 = vmul.f32 %v1471_v14, %v1465_v10 }
0x25e4   :  { %1475 = vrot.lane.b32.xlu0 %v1473_v15, %s2985_s10 }
0x2656   :  { %v1476_v21 = vpop.permute.xlu0 %1475 }
0x2657   :  { %v1478_v22 = vadd.f32 %v1476_v21, %v1468_v16  ;;  %v1613_v21 = vld [vmem:[#allocation5 + $0x6] sm:$0x3] }
0x2659   :  { %2820 = vtanh.f32 %v1478_v22 }
0x265f   :  { %v2821_v23 = vpop.eup %2820 }
0x2660   :  { %1481 = vrot.lane.b32.xlu1 %v2821_v23, %s2984_s9 }
0x26d2   :  { %v1482_v24 = vpop.permute.xlu1 %1481 }
0x26d3   :  { %v1484_v13 = vmul.f32 %v1482_v24, %v1465_v10 }
0x26d5   :  { %1487 = vrot.lane.b32.xlu2 %v1484_v13, %s2985_s10 }
0x272f   :  { %v1488_v25 = vpop.permute.xlu2 %1487 }
0x2730   :  { %2633 = vmatmul.msk.f32.vlgmr.msra.gmra.mxu2 %vm208_vm13, %v1488_v25 }
0x2731   :  { %1887 = vmatpush.msra.mxu2 %v3438_v40 }
0x2733   :  { %1888 = vmatpush.msra.mxu2 %v3443_v41 }
0x2735   :  { %1889 = vmatpush.msra.mxu2 %v3450_v42 }
0x2737   :  { %1890 = vmatpush.msra.mxu2 %v3465_v43 }
0x27b3   :  { %v1508_v27 = vpop.f32.mrf.mxu2 }
0x27b4   :  { %v1511_v17 = vadd.f32 %v1508_v27, %v1485_v26 }
0x27b6   :  { %2822 = vtanh.f32 %v1511_v17  ;;  %v2634_v19 = vmul.f32 -1.442695, %v1511_v17 }
0x27b8   :  { %2824 = vpow2.f32 %v2634_v19 }
0x27bc   :  { %v2823_v18 = vpop.eup %2822 }
0x27bd   :  { %1534 = vrot.lane.b32.xlu0 %v2823_v18, %s2984_s9 }
0x27be   :  { %v2825_v20 = vpop.eup %2824 }
0x27bf   :  { %v1515_v28 = vadd.f32 1.0, %v2825_v20 }
0x27c1   :  { %2826 = vrcp.f32 %v1515_v28  ;;  %v1527_v5 = vand.u32 2147483648, %v1515_v28  ;;  %vm1521_vm8 = vweird.f32 %v1515_v28  ;;  %v1525_v8 = vand.u32 2147483647, %v1515_v28 }
0x27c3   :  { %v1528_v32 = vor.u32 1.1754944e-38, %v1527_v5  ;;  %vm1526_vm10 = vcmp.eq.f32.partialorder %v1525_v8, 8.507059e+37 }
0x27c7   :  { %v2827_v29 = vpop.eup %2826 }
0x27c8   :  { %v1517_v30 = vmul.f32 %v2827_v29, %v1515_v28  ;;  %vm1522_vm7 = vweird.f32 %v2827_v29 }
0x27c9   :  { %vm1523_vm9 = vmor %vm1521_vm8, %vm1522_vm7 }
0x27ca   :  { %v1518_v0 = vsub.f32 1.0, %v1517_v30 }
0x27cc   :  { %v1519_v31 = vmul.f32 %v2827_v29, %v1518_v0 }
0x27ce   :  { %v1520_v2 = vadd.f32 %v2827_v29, %v1519_v31 }
0x27d0   :  { %v1524_v9 = vsel %vm1523_vm9, %v2827_v29, %v1520_v2 }
0x27d1   :  { %v1529_v34 = vsel %vm1526_vm10, %v1528_v32, %v1524_v9 }
0x27d2   :  { %v1532_v37 = vmul.f32 %v1529_v34, %v1478_v22 }
0x282f   :  { %v1535_v33 = vpop.permute.xlu0 %1534 }
0x2830   :  { %v1537_v36 = vmul.f32 %v1535_v33, %v1529_v34 }
0x2832   :  { %1539 = vrot.lane.b32.xlu1 %v1537_v36, %s2985_s10 }
0x28a4   :  { %v1540_v38 = vpop.permute.xlu1 %1539 }
0x28a5   :  { %v1542_v39 = vadd.f32 %v1540_v38, %v1532_v37  ;;  %v1677_v38 = vld [vmem:[#allocation5 + $0x8] sm:$0x3] }
0x28a7   :  { %2828 = vtanh.f32 %v1542_v39 }
0x28ad   :  { %v2829_v12 = vpop.eup %2828 }
0x28ae   :  { %1545 = vrot.lane.b32.xlu2 %v2829_v12, %s2984_s9 }
0x2908   :  { %v1546_v44 = vpop.permute.xlu2 %1545 }
0x2909   :  { %v1548_v45 = vmul.f32 %v1546_v44, %v1529_v34 }
0x290b   :  { %1551 = vrot.lane.b32.xlu0 %v1548_v45, %s2985_s10 }
0x297d   :  { %v1552_v46 = vpop.permute.xlu0 %1551 }
0x297e   :  { %2635 = vmatmul.msk.f32.vlgmr.msra.gmra.mxu3 %vm208_vm13, %v1552_v46 }
0x297f   :  { %1951 = vmatpush.msra.mxu3 %v3438_v40 }
0x2981   :  { %1952 = vmatpush.msra.mxu3 %v3443_v41 }
0x2983   :  { %1953 = vmatpush.msra.mxu3 %v3450_v42 }
0x2985   :  { %1954 = vmatpush.msra.mxu3 %v3465_v43 }
0x2a01   :  { %v1572_v49 = vpop.f32.mrf.mxu3 }
0x2a02   :  { %v1575_v50 = vadd.f32 %v1572_v49, %v1549_v48 }
0x2a04   :  { %2830 = vtanh.f32 %v1575_v50  ;;  %v2636_v52 = vmul.f32 -1.442695, %v1575_v50 }
0x2a06   :  { %2832 = vpow2.f32 %v2636_v52 }
0x2a0a   :  { %v2831_v51 = vpop.eup %2830 }
0x2a0b   :  { %1598 = vrot.lane.b32.xlu1 %v2831_v51, %s2984_s9 }
0x2a0c   :  { %v2833_v53 = vpop.eup %2832 }
0x2a0d   :  { %v1579_v54 = vadd.f32 1.0, %v2833_v53 }
0x2a0f   :  { %2834 = vrcp.f32 %v1579_v54  ;;  %v1591_v60 = vand.u32 2147483648, %v1579_v54  ;;  %vm1585_vm15 = vweird.f32 %v1579_v54  ;;  %v1589_v61 = vand.u32 2147483647, %v1579_v54 }
0x2a11   :  { %v1592_v63 = vor.u32 1.1754944e-38, %v1591_v60  ;;  %vm1590_vm6 = vcmp.eq.f32.partialorder %v1589_v61, 8.507059e+37 }
0x2a15   :  { %v2835_v55 = vpop.eup %2834 }
0x2a16   :  { %v1581_v56 = vmul.f32 %v2835_v55, %v1579_v54  ;;  %vm1586_vm14 = vweird.f32 %v2835_v55 }
0x2a17   :  { %vm1587_vm0 = vmor %vm1585_vm15, %vm1586_vm14 }
0x2a18   :  { %v1582_v57 = vsub.f32 1.0, %v1581_v56 }
0x2a1a   :  { %v1583_v58 = vmul.f32 %v2835_v55, %v1582_v57 }
0x2a1c   :  { %v1584_v59 = vadd.f32 %v2835_v55, %v1583_v58 }
0x2a1e   :  { %v1588_v62 = vsel %vm1587_vm0, %v2835_v55, %v1584_v59 }
0x2a1f   :  { %v1593_v3 = vsel %vm1590_vm6, %v1592_v63, %v1588_v62 }
0x2a20   :  { %v1596_v6 = vmul.f32 %v1593_v3, %v1542_v39 }
0x2a7d   :  { %v1599_v1 = vpop.permute.xlu1 %1598 }
0x2a7e   :  { %v1601_v4 = vmul.f32 %v1599_v1, %v1593_v3 }
0x2a80   :  { %1603 = vrot.lane.b32.xlu2 %v1601_v4, %s2985_s10 }
0x2ada   :  { %v1604_v7 = vpop.permute.xlu2 %1603 }
0x2adb   :  { %v1606_v11 = vadd.f32 %v1604_v7, %v1596_v6  ;;  %v1741_v7 = vld [vmem:[#allocation5 + $0xa] sm:$0x3] }
0x2add   :  { %2836 = vtanh.f32 %v1606_v11 }
0x2ae3   :  { %v2837_v14 = vpop.eup %2836 }
0x2ae4   :  { %1609 = vrot.lane.b32.xlu0 %v2837_v14, %s2984_s9 }
0x2b56   :  { %v1610_v10 = vpop.permute.xlu0 %1609 }
0x2b57   :  { %v1612_v15 = vmul.f32 %v1610_v10, %v1593_v3 }
0x2b59   :  { %1615 = vrot.lane.b32.xlu1 %v1612_v15, %s2985_s10 }
0x2bcb   :  { %v1616_v16 = vpop.permute.xlu1 %1615 }
0x2bcc   :  { %2637 = vmatmul.msk.f32.vlgmr.msrb.gmra.mxu1 %vm208_vm13, %v1616_v16 }
0x2bcd   :  { %2015 = vmatpush.msrb.mxu1 %v3438_v40 }
0x2bcf   :  { %2016 = vmatpush.msrb.mxu1 %v3443_v41 }
0x2bd1   :  { %2017 = vmatpush.msrb.mxu1 %v3450_v42 }
0x2bd3   :  { %2018 = vmatpush.msrb.mxu1 %v3465_v43 }
0x2c49   :  { %v1636_v22 = vpop.f32.mrf.mxu1 }
0x2c4a   :  { %v1639_v23 = vadd.f32 %v1636_v22, %v1613_v21 }
0x2c4c   :  { %2838 = vtanh.f32 %v1639_v23  ;;  %v2638_v13 = vmul.f32 -1.442695, %v1639_v23 }
0x2c4e   :  { %2840 = vpow2.f32 %v2638_v13 }
0x2c52   :  { %v2839_v24 = vpop.eup %2838 }
0x2c53   :  { %1662 = vrot.lane.b32.xlu2 %v2839_v24, %s2984_s9 }
0x2c54   :  { %v2841_v25 = vpop.eup %2840 }
0x2c55   :  { %v1643_v26 = vadd.f32 1.0, %v2841_v25 }
0x2c57   :  { %2842 = vrcp.f32 %v1643_v26  ;;  %v1655_v28 = vand.u32 2147483648, %v1643_v26  ;;  %vm1649_vm12 = vweird.f32 %v1643_v26  ;;  %v1653_v29 = vand.u32 2147483647, %v1643_v26 }
0x2c59   :  { %v1656_v0 = vor.u32 1.1754944e-38, %v1655_v28  ;;  %vm1654_vm3 = vcmp.eq.f32.partialorder %v1653_v29, 8.507059e+37 }
0x2c5d   :  { %v2843_v27 = vpop.eup %2842 }
0x2c5e   :  { %v1645_v17 = vmul.f32 %v2843_v27, %v1643_v26  ;;  %vm1650_vm1 = vweird.f32 %v2843_v27 }
0x2c5f   :  { %vm1651_vm2 = vmor %vm1649_vm12, %vm1650_vm1 }
0x2c60   :  { %v1646_v18 = vsub.f32 1.0, %v1645_v17 }
0x2c62   :  { %v1647_v19 = vmul.f32 %v2843_v27, %v1646_v18 }
0x2c64   :  { %v1648_v20 = vadd.f32 %v2843_v27, %v1647_v19 }
0x2c66   :  { %v1652_v30 = vsel %vm1651_vm2, %v2843_v27, %v1648_v20 }
0x2c67   :  { %v1657_v2 = vsel %vm1654_vm3, %v1656_v0, %v1652_v30 }
0x2c68   :  { %v1660_v8 = vmul.f32 %v1657_v2, %v1606_v11 }
0x2cad   :  { %v1663_v31 = vpop.permute.xlu2 %1662 }
0x2cae   :  { %v1665_v5 = vmul.f32 %v1663_v31, %v1657_v2 }
0x2cb0   :  { %1667 = vrot.lane.b32.xlu0 %v1665_v5, %s2985_s10 }
0x2d22   :  { %v1668_v9 = vpop.permute.xlu0 %1667 }
0x2d23   :  { %v1670_v32 = vadd.f32 %v1668_v9, %v1660_v8  ;;  %v1805_v9 = vld [vmem:[#allocation5 + $0xc] sm:$0x3] }
0x2d25   :  { %2844 = vtanh.f32 %v1670_v32 }
0x2d2b   :  { %v2845_v33 = vpop.eup %2844 }
0x2d2c   :  { %1673 = vrot.lane.b32.xlu1 %v2845_v33, %s2984_s9 }
0x2d9e   :  { %v1674_v34 = vpop.permute.xlu1 %1673 }
0x2d9f   :  { %v1676_v36 = vmul.f32 %v1674_v34, %v1657_v2 }
0x2da1   :  { %1679 = vrot.lane.b32.xlu2 %v1676_v36, %s2985_s10 }
0x2dfb   :  { %v1680_v37 = vpop.permute.xlu2 %1679 }
0x2dfc   :  { %2639 = vmatmul.msk.f32.vlgmr.msrb.gmra.mxu2 %vm208_vm13, %v1680_v37 }
0x2dfd   :  { %2079 = vmatpush.msrb.mxu2 %v3438_v40 }
0x2dff   :  { %2080 = vmatpush.msrb.mxu2 %v3443_v41 }
0x2e01   :  { %2081 = vmatpush.msrb.mxu2 %v3450_v42 }
0x2e03   :  { %2082 = vmatpush.msrb.mxu2 %v3465_v43 }
0x2e7f   :  { %v1700_v39 = vpop.f32.mrf.mxu2 }
0x2e80   :  { %v1703_v12 = vadd.f32 %v1700_v39, %v1677_v38 }
0x2e82   :  { %2846 = vtanh.f32 %v1703_v12  ;;  %v2640_v45 = vmul.f32 -1.442695, %v1703_v12 }
0x2e84   :  { %2848 = vpow2.f32 %v2640_v45 }
0x2e88   :  { %v2847_v44 = vpop.eup %2846 }
0x2e89   :  { %1726 = vrot.lane.b32.xlu0 %v2847_v44, %s2984_s9 }
0x2e8a   :  { %v2849_v46 = vpop.eup %2848 }
0x2e8b   :  { %v1707_v48 = vadd.f32 1.0, %v2849_v46 }
0x2e8d   :  { %2850 = vrcp.f32 %v1707_v48  ;;  %v1719_v54 = vand.u32 2147483648, %v1707_v48  ;;  %vm1713_vm7 = vweird.f32 %v1707_v48  ;;  %v1717_v55 = vand.u32 2147483647, %v1707_v48 }
0x2e8f   :  { %v1720_v57 = vor.u32 1.1754944e-38, %v1719_v54  ;;  %vm1718_vm9 = vcmp.eq.f32.partialorder %v1717_v55, 8.507059e+37 }
0x2e93   :  { %v2851_v49 = vpop.eup %2850 }
0x2e94   :  { %v1709_v50 = vmul.f32 %v2851_v49, %v1707_v48  ;;  %vm1714_vm4 = vweird.f32 %v2851_v49 }
0x2e95   :  { %vm1715_vm8 = vmor %vm1713_vm7, %vm1714_vm4 }
0x2e96   :  { %v1710_v51 = vsub.f32 1.0, %v1709_v50 }
0x2e98   :  { %v1711_v52 = vmul.f32 %v2851_v49, %v1710_v51 }
0x2e9a   :  { %v1712_v53 = vadd.f32 %v2851_v49, %v1711_v52 }
0x2e9c   :  { %v1716_v56 = vsel %vm1715_vm8, %v2851_v49, %v1712_v53 }
0x2e9d   :  { %v1721_v59 = vsel %vm1718_vm9, %v1720_v57, %v1716_v56 }
0x2e9e   :  { %v1724_v61 = vmul.f32 %v1721_v59, %v1670_v32 }
0x2efb   :  { %v1727_v58 = vpop.permute.xlu0 %1726 }
0x2efc   :  { %v1729_v60 = vmul.f32 %v1727_v58, %v1721_v59 }
0x2efe   :  { %1731 = vrot.lane.b32.xlu1 %v1729_v60, %s2985_s10 }
0x2f70   :  { %v1732_v62 = vpop.permute.xlu1 %1731 }
0x2f71   :  { %v1734_v63 = vadd.f32 %v1732_v62, %v1724_v61  ;;  %v1869_v62 = vld [vmem:[#allocation5 + $0xe] sm:$0x3] }
0x2f73   :  { %2852 = vtanh.f32 %v1734_v63 }
0x2f79   :  { %v2853_v1 = vpop.eup %2852 }
0x2f7a   :  { %1737 = vrot.lane.b32.xlu2 %v2853_v1, %s2984_s9 }
0x2fd4   :  { %v1738_v3 = vpop.permute.xlu2 %1737 }
0x2fd5   :  { %v1740_v4 = vmul.f32 %v1738_v3, %v1721_v59 }
0x2fd7   :  { %1743 = vrot.lane.b32.xlu0 %v1740_v4, %s2985_s10 }
0x3049   :  { %v1744_v6 = vpop.permute.xlu0 %1743 }
0x304a   :  { %2641 = vmatmul.msk.f32.vlgmr.msrb.gmra.mxu3 %vm208_vm13, %v1744_v6 }
0x304b   :  { %2143 = vmatpush.msrb.mxu3 %v3438_v40 }
0x304d   :  { %2144 = vmatpush.msrb.mxu3 %v3443_v41 }
0x304f   :  { %2145 = vmatpush.msrb.mxu3 %v3450_v42 }
0x3051   :  { %2146 = vmatpush.msrb.mxu3 %v3465_v43 }
0x30cd   :  { %v1764_v11 = vpop.f32.mrf.mxu3 }
0x30ce   :  { %v1767_v14 = vadd.f32 %v1764_v11, %v1741_v7 }
0x30d0   :  { %2854 = vtanh.f32 %v1767_v14  ;;  %v2642_v15 = vmul.f32 -1.442695, %v1767_v14 }
0x30d2   :  { %2856 = vpow2.f32 %v2642_v15 }
0x30d6   :  { %v2855_v10 = vpop.eup %2854 }
0x30d7   :  { %1790 = vrot.lane.b32.xlu1 %v2855_v10, %s2984_s9 }
0x30d8   :  { %v2857_v16 = vpop.eup %2856 }
0x30d9   :  { %v1771_v21 = vadd.f32 1.0, %v2857_v16 }
0x30db   :  { %2858 = vrcp.f32 %v1771_v21  ;;  %v1783_v26 = vand.u32 2147483648, %v1771_v21  ;;  %vm1777_vm14 = vweird.f32 %v1771_v21  ;;  %v1781_v27 = vand.u32 2147483647, %v1771_v21 }
0x30dd   :  { %v1784_v18 = vor.u32 1.1754944e-38, %v1783_v26  ;;  %vm1782_vm0 = vcmp.eq.f32.partialorder %v1781_v27, 8.507059e+37 }
0x30e1   :  { %v2859_v22 = vpop.eup %2858 }
0x30e2   :  { %v1773_v23 = vmul.f32 %v2859_v22, %v1771_v21  ;;  %vm1778_vm10 = vweird.f32 %v2859_v22 }
0x30e3   :  { %vm1779_vm15 = vmor %vm1777_vm14, %vm1778_vm10 }
0x30e4   :  { %v1774_v24 = vsub.f32 1.0, %v1773_v23 }
0x30e6   :  { %v1775_v13 = vmul.f32 %v2859_v22, %v1774_v24 }
0x30e8   :  { %v1776_v25 = vadd.f32 %v2859_v22, %v1775_v13 }
0x30ea   :  { %v1780_v17 = vsel %vm1779_vm15, %v2859_v22, %v1776_v25 }
0x30eb   :  { %v1785_v20 = vsel %vm1782_vm0, %v1784_v18, %v1780_v17 }
0x30ec   :  { %v1788_v29 = vmul.f32 %v1785_v20, %v1734_v63 }
0x3149   :  { %v1791_v19 = vpop.permute.xlu1 %1790 }
0x314a   :  { %v1793_v28 = vmul.f32 %v1791_v19, %v1785_v20 }
0x314c   :  { %1795 = vrot.lane.b32.xlu2 %v1793_v28, %s2985_s10 }
0x31a6   :  { %v1796_v30 = vpop.permute.xlu2 %1795 }
0x31a7   :  { %v1798_v0 = vadd.f32 %v1796_v30, %v1788_v29  ;;  %v1933_v30 = vld [vmem:[#allocation5 + $0x10] sm:$0x3] }
0x31a9   :  { %2860 = vtanh.f32 %v1798_v0 }
0x31af   :  { %v2861_v31 = vpop.eup %2860 }
0x31b0   :  { %1801 = vrot.lane.b32.xlu0 %v2861_v31, %s2984_s9 }
0x3222   :  { %v1802_v2 = vpop.permute.xlu0 %1801 }
0x3223   :  { %v1804_v5 = vmul.f32 %v1802_v2, %v1785_v20 }
0x3225   :  { %1807 = vrot.lane.b32.xlu1 %v1804_v5, %s2985_s10 }
0x3297   :  { %v1808_v8 = vpop.permute.xlu1 %1807 }
0x3298   :  { %2643 = vmatmul.msk.f32.vlgmr.msra.gmra.mxu1 %vm208_vm13, %v1808_v8 }
0x3299   :  { %2207 = vmatpush.msra.mxu1 %v3438_v40 }
0x329b   :  { %2208 = vmatpush.msra.mxu1 %v3443_v41 }
0x329d   :  { %2209 = vmatpush.msra.mxu1 %v3450_v42 }
0x329f   :  { %2210 = vmatpush.msra.mxu1 %v3465_v43 }
0x3315   :  { %v1828_v32 = vpop.f32.mrf.mxu1 }
0x3316   :  { %v1831_v33 = vadd.f32 %v1828_v32, %v1805_v9 }
0x3318   :  { %2862 = vtanh.f32 %v1831_v33  ;;  %v2644_v36 = vmul.f32 -1.442695, %v1831_v33 }
0x331a   :  { %2864 = vpow2.f32 %v2644_v36 }
0x331e   :  { %v2863_v34 = vpop.eup %2862 }
0x331f   :  { %1854 = vrot.lane.b32.xlu2 %v2863_v34, %s2984_s9 }
0x3320   :  { %v2865_v37 = vpop.eup %2864 }
0x3321   :  { %v1835_v38 = vadd.f32 1.0, %v2865_v37 }
0x3323   :  { %2866 = vrcp.f32 %v1835_v38  ;;  %v1847_v48 = vand.u32 2147483648, %v1835_v38  ;;  %vm1841_vm1 = vweird.f32 %v1835_v38  ;;  %v1845_v49 = vand.u32 2147483647, %v1835_v38 }
0x3325   :  { %v1848_v51 = vor.u32 1.1754944e-38, %v1847_v48  ;;  %vm1846_vm2 = vcmp.eq.f32.partialorder %v1845_v49, 8.507059e+37 }
0x3329   :  { %v2867_v39 = vpop.eup %2866 }
0x332a   :  { %v1837_v12 = vmul.f32 %v2867_v39, %v1835_v38  ;;  %vm1842_vm6 = vweird.f32 %v2867_v39 }
0x332b   :  { %vm1843_vm12 = vmor %vm1841_vm1, %vm1842_vm6 }
0x332c   :  { %v1838_v44 = vsub.f32 1.0, %v1837_v12 }
0x332e   :  { %v1839_v45 = vmul.f32 %v2867_v39, %v1838_v44 }
0x3330   :  { %v1840_v46 = vadd.f32 %v2867_v39, %v1839_v45 }
0x3332   :  { %v1844_v50 = vsel %vm1843_vm12, %v2867_v39, %v1840_v46 }
0x3333   :  { %v1849_v53 = vsel %vm1846_vm2, %v1848_v51, %v1844_v50 }
0x3334   :  { %v1852_v55 = vmul.f32 %v1849_v53, %v1798_v0 }
0x3379   :  { %v1855_v52 = vpop.permute.xlu2 %1854 }
0x337a   :  { %v1857_v54 = vmul.f32 %v1855_v52, %v1849_v53  ;;  %v1997_v52 = vld [vmem:[#allocation5 + $0x12] sm:$0x3] }
0x337c   :  { %1859 = vrot.lane.b32.xlu0 %v1857_v54, %s2985_s10 }
0x33ee   :  { %v1860_v56 = vpop.permute.xlu0 %1859 }
0x33ef   :  { %v1862_v57 = vadd.f32 %v1860_v56, %v1852_v55 }
0x33f1   :  { %2868 = vtanh.f32 %v1862_v57 }
0x33f7   :  { %v2869_v58 = vpop.eup %2868 }
0x33f8   :  { %1865 = vrot.lane.b32.xlu1 %v2869_v58, %s2984_s9 }
0x346a   :  { %v1866_v59 = vpop.permute.xlu1 %1865 }
0x346b   :  { %v1868_v60 = vmul.f32 %v1866_v59, %v1849_v53 }
0x346d   :  { %1871 = vrot.lane.b32.xlu2 %v1868_v60, %s2985_s10 }
0x34c7   :  { %v1872_v61 = vpop.permute.xlu2 %1871 }
0x34c8   :  { %2645 = vmatmul.msk.f32.vlgmr.msra.gmra.mxu2 %vm208_vm13, %v1872_v61 }
0x34c9   :  { %2271 = vmatpush.msra.mxu2 %v3438_v40 }
0x34cb   :  { %2272 = vmatpush.msra.mxu2 %v3443_v41 }
0x34cd   :  { %2273 = vmatpush.msra.mxu2 %v3450_v42 }
0x34cf   :  { %2274 = vmatpush.msra.mxu2 %v3465_v43 }
0x354b   :  { %v1892_v63 = vpop.f32.mrf.mxu2 }
0x354c   :  { %v1895_v1 = vadd.f32 %v1892_v63, %v1869_v62 }
0x354e   :  { %2870 = vtanh.f32 %v1895_v1  ;;  %v2646_v4 = vmul.f32 -1.442695, %v1895_v1 }
0x3550   :  { %2872 = vpow2.f32 %v2646_v4 }
0x3554   :  { %v2871_v3 = vpop.eup %2870 }
0x3555   :  { %1918 = vrot.lane.b32.xlu0 %v2871_v3, %s2984_s9 }
0x3556   :  { %v2873_v6 = vpop.eup %2872 }
0x3557   :  { %v1899_v7 = vadd.f32 1.0, %v2873_v6 }
0x3559   :  { %2874 = vrcp.f32 %v1899_v7  ;;  %v1911_v21 = vand.u32 2147483648, %v1899_v7  ;;  %vm1905_vm4 = vweird.f32 %v1899_v7  ;;  %v1909_v22 = vand.u32 2147483647, %v1899_v7 }
0x355b   :  { %v1912_v24 = vor.u32 1.1754944e-38, %v1911_v21  ;;  %vm1910_vm8 = vcmp.eq.f32.partialorder %v1909_v22, 8.507059e+37 }
0x355f   :  { %v2875_v11 = vpop.eup %2874 }
0x3560   :  { %v1901_v14 = vmul.f32 %v2875_v11, %v1899_v7  ;;  %vm1906_vm3 = vweird.f32 %v2875_v11 }
0x3561   :  { %vm1907_vm7 = vmor %vm1905_vm4, %vm1906_vm3 }
0x3562   :  { %v1902_v10 = vsub.f32 1.0, %v1901_v14 }
0x3564   :  { %v1903_v15 = vmul.f32 %v2875_v11, %v1902_v10 }
0x3566   :  { %v1904_v16 = vadd.f32 %v2875_v11, %v1903_v15 }
0x3568   :  { %v1908_v23 = vsel %vm1907_vm7, %v2875_v11, %v1904_v16 }
0x3569   :  { %v1913_v25 = vsel %vm1910_vm8, %v1912_v24, %v1908_v23 }
0x356a   :  { %v1916_v27 = vmul.f32 %v1913_v25, %v1862_v57 }
0x35c7   :  { %v1919_v13 = vpop.permute.xlu0 %1918 }
0x35c8   :  { %v1921_v26 = vmul.f32 %v1919_v13, %v1913_v25  ;;  %v2061_v13 = vld [vmem:[#allocation5 + $0x14] sm:$0x3] }
0x35ca   :  { %1923 = vrot.lane.b32.xlu1 %v1921_v26, %s2985_s10 }
0x363c   :  { %v1924_v17 = vpop.permute.xlu1 %1923 }
0x363d   :  { %v1926_v18 = vadd.f32 %v1924_v17, %v1916_v27 }
0x363f   :  { %2876 = vtanh.f32 %v1926_v18 }
0x3645   :  { %v2877_v19 = vpop.eup %2876 }
0x3646   :  { %1929 = vrot.lane.b32.xlu2 %v2877_v19, %s2984_s9 }
0x36a0   :  { %v1930_v20 = vpop.permute.xlu2 %1929 }
0x36a1   :  { %v1932_v28 = vmul.f32 %v1930_v20, %v1913_v25 }
0x36a3   :  { %1935 = vrot.lane.b32.xlu0 %v1932_v28, %s2985_s10 }
0x3715   :  { %v1936_v29 = vpop.permute.xlu0 %1935 }
0x3716   :  { %2647 = vmatmul.msk.f32.vlgmr.msra.gmra.mxu3 %vm208_vm13, %v1936_v29 }
0x3717   :  { %2335 = vmatpush.msra.mxu3 %v3438_v40 }
0x3719   :  { %2336 = vmatpush.msra.mxu3 %v3443_v41 }
0x371b   :  { %2337 = vmatpush.msra.mxu3 %v3450_v42 }
0x371d   :  { %2338 = vmatpush.msra.mxu3 %v3465_v43 }
0x3799   :  { %v1956_v0 = vpop.f32.mrf.mxu3 }
0x379a   :  { %v1959_v31 = vadd.f32 %v1956_v0, %v1933_v30 }
0x379c   :  { %2878 = vtanh.f32 %v1959_v31  ;;  %v2648_v5 = vmul.f32 -1.442695, %v1959_v31 }
0x379e   :  { %2880 = vpow2.f32 %v2648_v5 }
0x37a2   :  { %v2879_v2 = vpop.eup %2878 }
0x37a3   :  { %1982 = vrot.lane.b32.xlu1 %v2879_v2, %s2984_s9 }
0x37a4   :  { %v2881_v8 = vpop.eup %2880 }
0x37a5   :  { %v1963_v9 = vadd.f32 1.0, %v2881_v8 }
0x37a7   :  { %2882 = vrcp.f32 %v1963_v9  ;;  %v1975_v42 = vand.u32 2147483648, %v1963_v9  ;;  %vm1969_vm10 = vweird.f32 %v1963_v9  ;;  %v1973_v43 = vand.u32 2147483647, %v1963_v9 }
0x37a9   :  { %v1976_v37 = vor.u32 1.1754944e-38, %v1975_v42  ;;  %vm1974_vm15 = vcmp.eq.f32.partialorder %v1973_v43, 8.507059e+37 }
0x37ad   :  { %v2883_v32 = vpop.eup %2882 }
0x37ae   :  { %v1965_v40 = vmul.f32 %v2883_v32, %v1963_v9  ;;  %vm1970_vm9 = vweird.f32 %v2883_v32 }
0x37af   :  { %vm1971_vm14 = vmor %vm1969_vm10, %vm1970_vm9 }
0x37b0   :  { %v1966_v33 = vsub.f32 1.0, %v1965_v40 }
0x37b2   :  { %v1967_v41 = vmul.f32 %v2883_v32, %v1966_v33 }
0x37b4   :  { %v1968_v34 = vadd.f32 %v2883_v32, %v1967_v41 }
0x37b6   :  { %v1972_v36 = vsel %vm1971_vm14, %v2883_v32, %v1968_v34 }
0x37b7   :  { %v1977_v39 = vsel %vm1974_vm15, %v1976_v37, %v1972_v36 }
0x37b8   :  { %v1980_v44 = vmul.f32 %v1977_v39, %v1926_v18 }
0x3815   :  { %v1983_v38 = vpop.permute.xlu1 %1982 }
0x3816   :  { %v1985_v12 = vmul.f32 %v1983_v38, %v1977_v39  ;;  %v2125_v38 = vld [vmem:[#allocation5 + $0x16] sm:$0x3] }
0x3818   :  { %1987 = vrot.lane.b32.xlu2 %v1985_v12, %s2985_s10 }
0x3872   :  { %v1988_v45 = vpop.permute.xlu2 %1987 }
0x3873   :  { %v1990_v46 = vadd.f32 %v1988_v45, %v1980_v44 }
0x3875   :  { %2884 = vtanh.f32 %v1990_v46 }
0x387b   :  { %v2885_v48 = vpop.eup %2884 }
0x387c   :  { %1993 = vrot.lane.b32.xlu0 %v2885_v48, %s2984_s9 }
0x38ee   :  { %v1994_v49 = vpop.permute.xlu0 %1993 }
0x38ef   :  { %v1996_v50 = vmul.f32 %v1994_v49, %v1977_v39 }
0x38f1   :  { %1999 = vrot.lane.b32.xlu1 %v1996_v50, %s2985_s10 }
0x3963   :  { %v2000_v51 = vpop.permute.xlu1 %1999 }
0x3964   :  { %2649 = vmatmul.msk.f32.vlgmr.msrb.gmra.mxu1 %vm208_vm13, %v2000_v51 }
0x39e1   :  { %v2020_v53 = vpop.f32.mrf.mxu1 }
0x39e2   :  { %v2023_v54 = vadd.f32 %v2020_v53, %v1997_v52 }
0x39e4   :  { %2886 = vtanh.f32 %v2023_v54  ;;  %v2650_v56 = vmul.f32 -1.442695, %v2023_v54 }
0x39e6   :  { %2888 = vpow2.f32 %v2650_v56 }
0x39ea   :  { %v2887_v55 = vpop.eup %2886 }
0x39eb   :  { %2046 = vrot.lane.b32.xlu2 %v2887_v55, %s2984_s9 }
0x39ec   :  { %v2889_v57 = vpop.eup %2888 }
0x39ed   :  { %v2027_v58 = vadd.f32 1.0, %v2889_v57 }
0x39ef   :  { %2890 = vrcp.f32 %v2027_v58  ;;  %v2039_v1 = vand.u32 2147483648, %v2027_v58  ;;  %vm2033_vm6 = vweird.f32 %v2027_v58  ;;  %v2037_v3 = vand.u32 2147483647, %v2027_v58 }
0x39f1   :  { %v2040_v6 = vor.u32 1.1754944e-38, %v2039_v1  ;;  %vm2038_vm12 = vcmp.eq.f32.partialorder %v2037_v3, 8.507059e+37 }
0x39f5   :  { %v2891_v59 = vpop.eup %2890 }
0x39f6   :  { %v2029_v60 = vmul.f32 %v2891_v59, %v2027_v58  ;;  %vm2034_vm0 = vweird.f32 %v2891_v59 }
0x39f7   :  { %vm2035_vm1 = vmor %vm2033_vm6, %vm2034_vm0 }
0x39f8   :  { %v2030_v61 = vsub.f32 1.0, %v2029_v60 }
0x39fa   :  { %v2031_v62 = vmul.f32 %v2891_v59, %v2030_v61 }
0x39fc   :  { %v2032_v63 = vadd.f32 %v2891_v59, %v2031_v62 }
0x39fe   :  { %v2036_v4 = vsel %vm2035_vm1, %v2891_v59, %v2032_v63 }
0x39ff   :  { %v2041_v11 = vsel %vm2038_vm12, %v2040_v6, %v2036_v4 }
0x3a00   :  { %v2044_v10 = vmul.f32 %v2041_v11, %v1990_v46 }
0x3a45   :  { %v2047_v7 = vpop.permute.xlu2 %2046 }
0x3a46   :  { %v2049_v14 = vmul.f32 %v2047_v7, %v2041_v11  ;;  %v44_v7 = vld [vmem:[%s3699_s1 + $0xdd] sm:$0xff] }
0x3a47   :  { %2458 = vmatpush.msrb.mxu1 %v44_v7 }
0x3a48   :  { %2051 = vrot.lane.b32.xlu0 %v2049_v14, %s2985_s10  ;;  %v42_v14 = vld [vmem:[%s3699_s1 + $0xcd] sm:$0xff] }
0x3aba   :  { %v2052_v15 = vpop.permute.xlu0 %2051 }
0x3abb   :  { %v2054_v16 = vadd.f32 %v2052_v15, %v2044_v10  ;;  %v41_v10 = vld [vmem:[%s3699_s1 + $0xc5] sm:$0xff] }
0x3abd   :  { %2892 = vtanh.f32 %v2054_v16 }
0x3ac3   :  { %v2893_v21 = vpop.eup %2892 }
0x3ac4   :  { %2057 = vrot.lane.b32.xlu1 %v2893_v21, %s2984_s9  ;;  %v39_v21 = vld [vmem:[%s3699_s1 + $0xb5] sm:$0xff] }
0x3b36   :  { %v2058_v22 = vpop.permute.xlu1 %2057 }
0x3b37   :  { %v2060_v23 = vmul.f32 %v2058_v22, %v2041_v11  ;;  %v43_v11 = vld [vmem:[%s3699_s1 + $0xd5] sm:$0xff]  ;;  %v38_v22 = vld [vmem:[%s3699_s1 + $0xad] sm:$0xff] }
0x3b38   :  { %2459 = vmatpush.msrb.mxu1 %v43_v11 }
0x3b39   :  { %2063 = vrot.lane.b32.xlu2 %v2060_v23, %s2985_s10  ;;  %v37_v23 = vld [vmem:[%s3699_s1 + $0xa5] sm:$0xff] }
0x3b3a   :  { %2460 = vmatpush.msrb.mxu1 %v42_v14 }
0x3b3c   :  { %2461 = vmatpush.msrb.mxu1 %v41_v10 }
0x3b93   :  { %v2064_v24 = vpop.permute.xlu2 %2063 }
0x3b94   :  { %2651 = vmatmul.msk.f32.vlgmr.msrb.gmra.mxu2 %vm208_vm13, %v2064_v24 }
0x3c17   :  { %v2084_v25 = vpop.f32.mrf.mxu2 }
0x3c18   :  { %v2087_v26 = vadd.f32 %v2084_v25, %v2061_v13 }
0x3c1a   :  { %2894 = vtanh.f32 %v2087_v26  ;;  %v2652_v17 = vmul.f32 -1.442695, %v2087_v26 }
0x3c1c   :  { %2896 = vpow2.f32 %v2652_v17 }
0x3c20   :  { %v2895_v27 = vpop.eup %2894 }
0x3c21   :  { %2110 = vrot.lane.b32.xlu0 %v2895_v27, %s2984_s9 }
0x3c22   :  { %v2897_v18 = vpop.eup %2896 }
0x3c23   :  { %v2091_v19 = vadd.f32 1.0, %v2897_v18 }
0x3c25   :  { %2898 = vrcp.f32 %v2091_v19  ;;  %v2103_v31 = vand.u32 2147483648, %v2091_v19  ;;  %vm2097_vm3 = vweird.f32 %v2091_v19  ;;  %v2101_v2 = vand.u32 2147483647, %v2091_v19 }
0x3c27   :  { %v2104_v8 = vor.u32 1.1754944e-38, %v2103_v31  ;;  %vm2102_vm7 = vcmp.eq.f32.partialorder %v2101_v2, 8.507059e+37 }
0x3c2b   :  { %v2899_v20 = vpop.eup %2898 }
0x3c2c   :  { %v2093_v28 = vmul.f32 %v2899_v20, %v2091_v19  ;;  %vm2098_vm2 = vweird.f32 %v2899_v20 }
0x3c2d   :  { %vm2099_vm4 = vmor %vm2097_vm3, %vm2098_vm2 }
0x3c2e   :  { %v2094_v29 = vsub.f32 1.0, %v2093_v28 }
0x3c30   :  { %v2095_v30 = vmul.f32 %v2899_v20, %v2094_v29 }
0x3c32   :  { %v2096_v0 = vadd.f32 %v2899_v20, %v2095_v30 }
0x3c34   :  { %v2100_v5 = vsel %vm2099_vm4, %v2899_v20, %v2096_v0 }
0x3c35   :  { %v2105_v32 = vsel %vm2102_vm7, %v2104_v8, %v2100_v5 }
0x3c36   :  { %v2108_v33 = vmul.f32 %v2105_v32, %v2054_v16  ;;  %v40_v16 = vld [vmem:[%s3699_s1 + $0xbd] sm:$0xff] }
0x3c37   :  { %2462 = vmatpush.msrb.mxu1 %v40_v16 }
0x3c39   :  { %2463 = vmatpush.msrb.mxu1 %v39_v21 }
0x3c3b   :  { %2464 = vmatpush.msrb.mxu1 %v38_v22 }
0x3c3d   :  { %2465 = vmatpush.msrb.mxu1 %v37_v23 }
0x3c93   :  { %v2111_v9 = vpop.permute.xlu0 %2110 }
0x3c94   :  { %v2113_v40 = vmul.f32 %v2111_v9, %v2105_v32 }
0x3c96   :  { %2115 = vrot.lane.b32.xlu1 %v2113_v40, %s2985_s10 }
0x3d08   :  { %v2116_v41 = vpop.permute.xlu1 %2115 }
0x3d09   :  { %v2118_v34 = vadd.f32 %v2116_v41, %v2108_v33 }
0x3d0b   :  { %2900 = vtanh.f32 %v2118_v34 }
0x3d11   :  { %v2901_v42 = vpop.eup %2900 }
0x3d12   :  { %2121 = vrot.lane.b32.xlu2 %v2901_v42, %s2984_s9 }
0x3d6c   :  { %v2122_v43 = vpop.permute.xlu2 %2121 }
0x3d6d   :  { %v2124_v36 = vmul.f32 %v2122_v43, %v2105_v32 }
0x3d6f   :  { %2127 = vrot.lane.b32.xlu0 %v2124_v36, %s2985_s10 }
0x3de1   :  { %v2128_v37 = vpop.permute.xlu0 %2127 }
0x3de2   :  { %2653 = vmatmul.msk.f32.vlgmr.msrb.gmra.mxu3 %vm208_vm13, %v2128_v37 }
0x3e65   :  { %v2148_v39 = vpop.f32.mrf.mxu3 }
0x3e66   :  { %v2151_v12 = vadd.f32 %v2148_v39, %v2125_v38 }
0x3e68   :  { %2902 = vtanh.f32 %v2151_v12  ;;  %v2654_v45 = vmul.f32 -1.442695, %v2151_v12 }
0x3e6a   :  { %2904 = vpow2.f32 %v2654_v45 }
0x3e6e   :  { %v2903_v44 = vpop.eup %2902 }
0x3e6f   :  { %2174 = vrot.lane.b32.xlu1 %v2903_v44, %s2984_s9 }
0x3e70   :  { %v2905_v46 = vpop.eup %2904 }
0x3e71   :  { %v2155_v48 = vadd.f32 1.0, %v2905_v46 }
0x3e73   :  { %2906 = vrcp.f32 %v2155_v48  ;;  %v2167_v54 = vand.u32 2147483648, %v2155_v48  ;;  %vm2161_vm9 = vweird.f32 %v2155_v48  ;;  %v2165_v55 = vand.u32 2147483647, %v2155_v48 }
0x3e75   :  { %v2168_v57 = vor.u32 1.1754944e-38, %v2167_v54  ;;  %vm2166_vm14 = vcmp.eq.f32.partialorder %v2165_v55, 8.507059e+37 }
0x3e77   :  { %1365 = vrot.lane.b32.xlu1 %v3419_v35, %s2985_s10 }
0x3e79   :  { %v2907_v49 = vpop.eup %2906 }
0x3e7a   :  { %v2157_v50 = vmul.f32 %v2907_v49, %v2155_v48  ;;  %vm2162_vm8 = vweird.f32 %v2907_v49 }
0x3e7b   :  { %vm2163_vm10 = vmor %vm2161_vm9, %vm2162_vm8 }
0x3e7c   :  { %v2158_v51 = vsub.f32 1.0, %v2157_v50 }
0x3e7e   :  { %v2159_v52 = vmul.f32 %v2907_v49, %v2158_v51 }
0x3e80   :  { %v2160_v53 = vadd.f32 %v2907_v49, %v2159_v52 }
0x3e82   :  { %v2164_v56 = vsel %vm2163_vm10, %v2907_v49, %v2160_v53 }
0x3e83   :  { %v2169_v35 = vsel %vm2166_vm14, %v2168_v57, %v2164_v56 }
0x3e84   :  { %v2172_v62 = vmul.f32 %v2169_v35, %v2118_v34 }
0x3ee1   :  { %v2175_v58 = vpop.permute.xlu1 %2174 }
0x3ee2   :  { %v2177_v59 = vmul.f32 %v2175_v58, %v2169_v35 }
0x3ee4   :  { %2179 = vrot.lane.b32.xlu2 %v2177_v59, %s2985_s10 }
0x3ee9   :  { %v1366_v60 = vpop.permute.xlu1 %1365 }
0x3eea   :  { %1368 = vst.msk [vmem:[#allocation4 + $0x1e] sm:$0x3] %vm195_vm11, %v1366_v60 }
0x3ef1   :  { %v1376_v61 = vld [vmem:[#allocation4 + $0x18] sm:$0xff] }
0x3ef2   :  { %2631 = vmatmul.msk.f32.gmra.mxu0 %vm129_vm5, %v1376_v61  ;;  %v2445_v13 = vld [vmem:[#allocation4 + $0x1e] sm:$0x3] }
0x3f3e   :  { %v2180_v63 = vpop.permute.xlu2 %2179 }
0x3f3f   :  { %v2182_v1 = vadd.f32 %v2180_v63, %v2172_v62 }
0x3f41   :  { %2908 = vtanh.f32 %v2182_v1 }
0x3f47   :  { %v2909_v3 = vpop.eup %2908 }
0x3f48   :  { %2185 = vrot.lane.b32.xlu0 %v2909_v3, %s2984_s9 }
0x3f6f   :  { %v1416_v4 = vpop.f32.mrf.mxu0 }
0x3f70   :  { %v1417_v6 = vadd.f32 %v3495_v47, %v1416_v4 }
0x3f72   :  { %1422 = vst [vmem:[#allocation5 + $0x18] sm:$0xff] %v1417_v6 }
0x3f79   :  { %v2189_v25 = vld [vmem:[#allocation5 + $0x18] sm:$0x3]  ;;  %v2253_v39 = vld [vmem:[#allocation5 + $0x1a] sm:$0x3]  ;;  %v2317_v7 = vld [vmem:[#allocation5 + $0x1c] sm:$0x3] }
0x3fba   :  { %v2186_v47 = vpop.permute.xlu0 %2185 }
0x3fbb   :  { %v2188_v15 = vmul.f32 %v2186_v47, %v2169_v35 }
0x3fbd   :  { %2191 = vrot.lane.b32.xlu2 %v2188_v15, %s2985_s10 }
0x4017   :  { %v2192_v24 = vpop.permute.xlu2 %2191 }
0x4018   :  { %2655 = vmatmul.msk.f32.vlgmr.msra.gmra.mxu1 %vm208_vm13, %v2192_v24 }
0x4020   :  { %2663 = vmatmul.msk.f32.vlgmr.msrb.gmra.mxu1 %vm129_vm5, %v2445_v13 }
0x4095   :  { %v2212_v26 = vpop.f32.mrf.mxu1 }
0x4096   :  { %v2215_v27 = vadd.f32 %v2212_v26, %v2189_v25 }
0x4098   :  { %2910 = vtanh.f32 %v2215_v27  ;;  %v2656_v18 = vmul.f32 -1.442695, %v2215_v27 }
0x409a   :  { %2912 = vpow2.f32 %v2656_v18 }
0x409e   :  { %v2911_v17 = vpop.eup %2910 }
0x409f   :  { %2238 = vrot.lane.b32.xlu0 %v2911_v17, %s2984_s9 }
0x40a0   :  { %v2913_v19 = vpop.eup %2912 }
0x40a1   :  { %v2219_v20 = vadd.f32 1.0, %v2913_v19 }
0x40a3   :  { %2914 = vrcp.f32 %v2219_v20  ;;  %v2231_v2 = vand.u32 2147483648, %v2219_v20  ;;  %vm2225_vm5 = vweird.f32 %v2219_v20  ;;  %v2229_v5 = vand.u32 2147483647, %v2219_v20 }
0x40a5   :  { %v2232_v9 = vor.u32 1.1754944e-38, %v2231_v2  ;;  %vm2230_vm0 = vcmp.eq.f32.partialorder %v2229_v5, 8.507059e+37  ;;  %v2467_v2 = vpop.f32.mrf.mxu1 }
0x40a9   :  { %v2915_v28 = vpop.eup %2914 }
0x40aa   :  { %v2221_v29 = vmul.f32 %v2915_v28, %v2219_v20  ;;  %vm2226_vm11 = vweird.f32 %v2915_v28 }
0x40ab   :  { %vm2227_vm15 = vmor %vm2225_vm5, %vm2226_vm11 }
0x40ac   :  { %v2222_v30 = vsub.f32 1.0, %v2221_v29 }
0x40ae   :  { %v2223_v0 = vmul.f32 %v2915_v28, %v2222_v30 }
0x40b0   :  { %v2224_v31 = vadd.f32 %v2915_v28, %v2223_v0 }
0x40b2   :  { %v2228_v8 = vsel %vm2227_vm15, %v2915_v28, %v2224_v31  ;;  %v2683_v31 = vld [vmem:[%s3699_s1 + $0xe5] ss:$0 sm:$0xff] }
0x40b3   :  { %v2233_v40 = vsel %vm2230_vm0, %v2232_v9, %v2228_v8  ;;  %v2468_v5 = vadd.f32 %v2683_v31, %v2467_v2  ;;  %v2684_v31 = vld [vmem:[%s3699_s1 + $0x126] ss:$0 sm:$0xff] }
0x40b4   :  { %v2236_v41 = vmul.f32 %v2233_v40, %v2182_v1 }
0x4111   :  { %v2239_v32 = vpop.permute.xlu0 %2238 }
0x4112   :  { %v2241_v33 = vmul.f32 %v2239_v32, %v2233_v40 }
0x4114   :  { %2243 = vrot.lane.b32.xlu1 %v2241_v33, %s2985_s10  ;;  %v2381_v33 = vld [vmem:[#allocation5 + $0x1e] sm:$0x3] }
0x4186   :  { %v2244_v34 = vpop.permute.xlu1 %2243 }
0x4187   :  { %v2246_v42 = vadd.f32 %v2244_v34, %v2236_v41 }
0x4189   :  { %2916 = vtanh.f32 %v2246_v42 }
0x418f   :  { %v2917_v43 = vpop.eup %2916 }
0x4190   :  { %2249 = vrot.lane.b32.xlu2 %v2917_v43, %s2984_s9  ;;  %v2664_v43 = vmul.f32 -1.442695, %v2468_v5 }
0x41ea   :  { %v2250_v36 = vpop.permute.xlu2 %2249 }
0x41eb   :  { %v2252_v37 = vmul.f32 %v2250_v36, %v2233_v40 }
0x41ed   :  { %2255 = vrot.lane.b32.xlu0 %v2252_v37, %s2985_s10 }
0x425f   :  { %v2256_v38 = vpop.permute.xlu0 %2255 }
0x4260   :  { %2657 = vmatmul.msk.f32.vlgmr.msra.gmra.mxu2 %vm208_vm13, %v2256_v38 }
0x42e3   :  { %v2276_v12 = vpop.f32.mrf.mxu2 }
0x42e4   :  { %v2279_v44 = vadd.f32 %v2276_v12, %v2253_v39 }
0x42e6   :  { %2918 = vtanh.f32 %v2279_v44  ;;  %v2658_v46 = vmul.f32 -1.442695, %v2279_v44 }
0x42e8   :  { %2920 = vpow2.f32 %v2658_v46 }
0x42ec   :  { %v2919_v45 = vpop.eup %2918 }
0x42ed   :  { %2302 = vrot.lane.b32.xlu1 %v2919_v45, %s2984_s9 }
0x42ee   :  { %v2921_v48 = vpop.eup %2920 }
0x42ef   :  { %v2283_v49 = vadd.f32 1.0, %v2921_v48 }
0x42f1   :  { %2922 = vrcp.f32 %v2283_v49  ;;  %v2295_v55 = vand.u32 2147483648, %v2283_v49  ;;  %vm2289_vm1 = vweird.f32 %v2283_v49  ;;  %v2293_v56 = vand.u32 2147483647, %v2283_v49 }
0x42f3   :  { %v2296_v58 = vor.u32 1.1754944e-38, %v2295_v55  ;;  %vm2294_vm2 = vcmp.eq.f32.partialorder %v2293_v56, 8.507059e+37 }
0x42f7   :  { %v2923_v50 = vpop.eup %2922 }
0x42f8   :  { %v2285_v51 = vmul.f32 %v2923_v50, %v2283_v49  ;;  %vm2290_vm6 = vweird.f32 %v2923_v50 }
0x42f9   :  { %vm2291_vm12 = vmor %vm2289_vm1, %vm2290_vm6  ;;  %vm2578_vm1 = vcmask 17408  }
0x42fa   :  { %v2286_v52 = vsub.f32 1.0, %v2285_v51 }
0x42fc   :  { %v2287_v53 = vmul.f32 %v2923_v50, %v2286_v52 }
0x42fe   :  { %v2288_v54 = vadd.f32 %v2923_v50, %v2287_v53 }
0x4300   :  { %v2292_v57 = vsel %vm2291_vm12, %v2923_v50, %v2288_v54 }
0x4301   :  { %v2297_v59 = vsel %vm2294_vm2, %v2296_v58, %v2292_v57 }
0x4302   :  { %v2300_v61 = vmul.f32 %v2297_v59, %v2246_v42 }
0x435f   :  { %v2303_v35 = vpop.permute.xlu1 %2302 }
0x4360   :  { %v2305_v60 = vmul.f32 %v2303_v35, %v2297_v59 }
0x4362   :  { %2307 = vrot.lane.b32.xlu2 %v2305_v60, %s2985_s10 }
0x43bc   :  { %v2308_v62 = vpop.permute.xlu2 %2307 }
0x43bd   :  { %v2310_v63 = vadd.f32 %v2308_v62, %v2300_v61 }
0x43bf   :  { %2924 = vtanh.f32 %v2310_v63 }
0x43c5   :  { %v2925_v1 = vpop.eup %2924 }
0x43c6   :  { %2313 = vrot.lane.b32.xlu0 %v2925_v1, %s2984_s9 }
0x4438   :  { %v2314_v3 = vpop.permute.xlu0 %2313 }
0x4439   :  { %v2316_v4 = vmul.f32 %v2314_v3, %v2297_v59 }
0x443b   :  { %2319 = vrot.lane.b32.xlu1 %v2316_v4, %s2985_s10 }
0x44ad   :  { %v2320_v6 = vpop.permute.xlu1 %2319 }
0x44ae   :  { %2659 = vmatmul.msk.f32.vlgmr.msra.gmra.mxu3 %vm208_vm13, %v2320_v6 }
0x4531   :  { %v2340_v11 = vpop.f32.mrf.mxu3 }
0x4532   :  { %v2343_v14 = vadd.f32 %v2340_v11, %v2317_v7  ;;  %v53_v11 = vld [vmem:[%s3699_s1 + $0x11e] sm:$0xff] }
0x4533   :  { %2518 = vmatpush.msrb.mxu2 %v53_v11 }
0x4534   :  { %2926 = vtanh.f32 %v2343_v14  ;;  %v2660_v47 = vmul.f32 -1.442695, %v2343_v14  ;;  %v52_v14 = vld [vmem:[%s3699_s1 + $0x116] sm:$0xff] }
0x4535   :  { %2519 = vmatpush.msrb.mxu2 %v52_v14 }
0x4536   :  { %2928 = vpow2.f32 %v2660_v47  ;;  %v50_v47 = vld [vmem:[%s3699_s1 + $0x106] sm:$0xff] }
0x453a   :  { %v2927_v10 = vpop.eup %2926 }
0x453b   :  { %2366 = vrot.lane.b32.xlu2 %v2927_v10, %s2984_s9  ;;  %v51_v10 = vld [vmem:[%s3699_s1 + $0x10e] sm:$0xff] }
0x453c   :  { %v2929_v15 = vpop.eup %2928  ;;  %2520 = vmatpush.msrb.mxu2 %v51_v10 }
0x453d   :  { %v2347_v16 = vadd.f32 1.0, %v2929_v15 }
0x453e   :  { %2521 = vmatpush.msrb.mxu2 %v50_v47 }
0x453f   :  { %2930 = vrcp.f32 %v2347_v16  ;;  %v2359_v25 = vand.u32 2147483648, %v2347_v16  ;;  %vm2353_vm4 = vweird.f32 %v2347_v16  ;;  %v2357_v26 = vand.u32 2147483647, %v2347_v16 }
0x4541   :  { %v2360_v17 = vor.u32 1.1754944e-38, %v2359_v25  ;;  %vm2358_vm8 = vcmp.eq.f32.partialorder %v2357_v26, 8.507059e+37 }
0x4545   :  { %v2931_v21 = vpop.eup %2930 }
0x4546   :  { %v2349_v22 = vmul.f32 %v2931_v21, %v2347_v16  ;;  %vm2354_vm3 = vweird.f32 %v2931_v21 }
0x4547   :  { %vm2355_vm7 = vmor %vm2353_vm4, %vm2354_vm3 }
0x4548   :  { %v2350_v23 = vsub.f32 1.0, %v2349_v22 }
0x454a   :  { %v2351_v24 = vmul.f32 %v2931_v21, %v2350_v23 }
0x454c   :  { %v2352_v13 = vadd.f32 %v2931_v21, %v2351_v24 }
0x454e   :  { %v2356_v27 = vsel %vm2355_vm7, %v2931_v21, %v2352_v13 }
0x454f   :  { %v2361_v19 = vsel %vm2358_vm8, %v2360_v17, %v2356_v27  ;;  %v49_v27 = vld [vmem:[%s3699_s1 + $0xfe] sm:$0xff]  ;;  %v48_v17 = vld [vmem:[%s3699_s1 + $0xf6] sm:$0xff] }
0x4550   :  { %v2364_v28 = vmul.f32 %v2361_v19, %v2310_v63  ;;  %2543 = vmatpush.msrb.mxu3 %v49_v27 }
0x4552   :  { %2544 = vmatpush.msrb.mxu3 %v48_v17 }
0x4595   :  { %v2367_v18 = vpop.permute.xlu2 %2366 }
0x4596   :  { %v2369_v20 = vmul.f32 %v2367_v18, %v2361_v19  ;;  %v47_v18 = vld [vmem:[%s3699_s1 + $0xee] sm:$0xff] }
0x4597   :  { %2545 = vmatpush.msrb.mxu3 %v47_v18 }
0x4598   :  { %2371 = vrot.lane.b32.xlu0 %v2369_v20, %s2985_s10  ;;  %v58_v20 = vld [vmem:[%s3699_s1 + $0x13f] sm:$0xff] }
0x4599   :  { %2570 = vmatpush.msra.mxu0 %v58_v20 }
0x460a   :  { %v2372_v29 = vpop.permute.xlu0 %2371 }
0x460b   :  { %v3634_v30 = vadd.f32 %v2372_v29, %v2364_v28  ;;  %v57_v29 = vld [vmem:[%s3699_s1 + $0x137] sm:$0xff] }
0x460c   :  { %2571 = vmatpush.msra.mxu0 %v57_v29 }
0x460d   :  { %2932 = vtanh.f32 %v3634_v30 }
0x460e   :  { %2934 = vtanh.f32 %v2468_v5 }
0x4613   :  { %v2933_v0 = vpop.eup %2932 }
0x4614   :  { %2377 = vrot.lane.b32.xlu1 %v2933_v0, %s2984_s9  ;;  %v2935_v32 = vpop.eup %2934  ;;  %v55_v0 = vld [vmem:[%s3699_s1 + $0x127] sm:$0xff] }
0x4686   :  { %v2378_v8 = vpop.permute.xlu1 %2377 }
0x4687   :  { %v2380_v9 = vmul.f32 %v2378_v8, %v2361_v19  ;;  %v46_v19 = vld [vmem:[%s3699_s1 + $0xe6] sm:$0xff] }
0x4688   :  { %2546 = vmatpush.msrb.mxu3 %v46_v19 }
0x4689   :  { %2383 = vrot.lane.b32.xlu2 %v2380_v9, %s2985_s10 }
0x4691   :  { %2491 = vrot.lane.b32.xlu2 %v2935_v32, %s2984_s9 }
0x46e3   :  { %v2384_v40 = vpop.permute.xlu2 %2383 }
0x46e4   :  { %2661 = vmatmul.msk.f32.vlgmr.msrb.gmra.mxu0 %vm208_vm13, %v2384_v40  ;;  %v2685_v40 = vld [vmem:[%s3699_s1 + $0x147] ss:$0 sm:$0xff] }
0x46eb   :  { %v2492_v60 = vpop.permute.xlu2 %2491 }
0x4761   :  { %v2404_v41 = vpop.f32.mrf.mxu0 }
0x4762   :  { %v2407_v34 = vadd.f32 %v2404_v41, %v2381_v33 }
0x4764   :  { %2936 = vtanh.f32 %v2407_v34  ;;  %v2662_v36 = vmul.f32 -1.442695, %v2407_v34 }
0x4765   :  { %2938 = vpow2.f32 %v2664_v43 }
0x4766   :  { %2940 = vpow2.f32 %v2662_v36 }
0x476a   :  { %v2937_v42 = vpop.eup %2936 }
0x476b   :  { %2430 = vrot.lane.b32.xlu0 %v2937_v42, %s2984_s9  ;;  %v2939_v37 = vpop.eup %2938 }
0x476c   :  { %v2941_v38 = vpop.eup %2940  ;;  %v2473_v39 = vadd.f32 1.0, %v2939_v37 }
0x476d   :  { %v2411_v12 = vadd.f32 1.0, %v2941_v38 }
0x476e   :  { %2942 = vrcp.f32 %v2473_v39  ;;  %v2485_v54 = vand.u32 2147483648, %v2473_v39  ;;  %vm2479_vm14 = vweird.f32 %v2473_v39  ;;  %v2483_v56 = vand.u32 2147483647, %v2473_v39 }
0x476f   :  { %2944 = vrcp.f32 %v2411_v12  ;;  %v2423_v57 = vand.u32 2147483648, %v2411_v12  ;;  %vm2417_vm5 = vweird.f32 %v2411_v12  ;;  %v2421_v58 = vand.u32 2147483647, %v2411_v12 }
0x4770   :  { %v2486_v59 = vor.u32 1.1754944e-38, %v2485_v54  ;;  %vm2484_vm0 = vcmp.eq.f32.partialorder %v2483_v56, 8.507059e+37 }
0x4771   :  { %v2424_v62 = vor.u32 1.1754944e-38, %v2423_v57  ;;  %vm2422_vm6 = vcmp.eq.f32.partialorder %v2421_v58, 8.507059e+37 }
0x4774   :  { %v2943_v44 = vpop.eup %2942 }
0x4775   :  { %v2945_v45 = vpop.eup %2944  ;;  %v2475_v46 = vmul.f32 %v2943_v44, %v2473_v39  ;;  %vm2480_vm9 = vweird.f32 %v2943_v44 }
0x4776   :  { %v2413_v48 = vmul.f32 %v2945_v45, %v2411_v12  ;;  %vm2418_vm10 = vweird.f32 %v2945_v45  ;;  %vm2481_vm11 = vmor %vm2479_vm14, %vm2480_vm9 }
0x4777   :  { %v2476_v49 = vsub.f32 1.0, %v2475_v46  ;;  %vm2419_vm15 = vmor %vm2417_vm5, %vm2418_vm10 }
0x4778   :  { %v2414_v50 = vsub.f32 1.0, %v2413_v48 }
0x4779   :  { %v2477_v51 = vmul.f32 %v2943_v44, %v2476_v49 }
0x477a   :  { %v2415_v52 = vmul.f32 %v2945_v45, %v2414_v50 }
0x477b   :  { %v2478_v53 = vadd.f32 %v2943_v44, %v2477_v51 }
0x477c   :  { %v2416_v55 = vadd.f32 %v2945_v45, %v2415_v52 }
0x477d   :  { %v2482_v35 = vsel %vm2481_vm11, %v2943_v44, %v2478_v53 }
0x477e   :  { %v2420_v61 = vsel %vm2419_vm15, %v2945_v45, %v2416_v55  ;;  %v2487_v63 = vsel %vm2484_vm0, %v2486_v59, %v2482_v35 }
0x477f   :  { %v2494_v1 = vmul.f32 %v2492_v60, %v2487_v63  ;;  %v2425_v4 = vsel %vm2422_vm6, %v2424_v62, %v2420_v61 }
0x4780   :  { %v2428_v15 = vmul.f32 %v2425_v4, %v3634_v30  ;;  %v56_v30 = vld [vmem:[%s3699_s1 + $0x12f] sm:$0xff] }
0x4781   :  { %2946 = vtanh.f32 %v2494_v1  ;;  %2572 = vmatpush.msra.mxu0 %v56_v30 }
0x4783   :  { %2573 = vmatpush.msra.mxu0 %v55_v0 }
0x4787   :  { %v2947_v7 = vpop.eup %2946 }
0x47dd   :  { %v2431_v3 = vpop.permute.xlu0 %2430 }
0x47de   :  { %v2433_v6 = vmul.f32 %v2431_v3, %v2425_v4 }
0x47e0   :  { %2435 = vrot.lane.b32.xlu1 %v2433_v6, %s2985_s10 }
0x47e8   :  { %2497 = vrot.lane.b32.xlu1 %v2947_v7, %s2986_s0  ;;  %s2987_s0 = smov [#allocation6]  }
0x47e9   :  { %s2585_s15 = sshll.u32 %s2987_s0, 4  ;;  %s2586_s15 = int_to_ptr.vmem [resolvable:$true] %s2585_s15 }
0x4852   :  { %v2436_v16 = vpop.permute.xlu1 %2435 }
0x4853   :  { %v2438_v21 = vadd.f32 %v2436_v16, %v2428_v15 }
0x4855   :  { %2948 = vtanh.f32 %v2438_v21 }
0x485a   :  { %v2498_v22 = vpop.permute.xlu1 %2497 }
0x485b   :  { %v2949_v23 = vpop.eup %2948  ;;  %v2500_v24 = vmul.f32 %v2498_v22, %v2487_v63 }
0x485c   :  { %2441 = vrot.lane.b32.xlu0 %v2949_v23, %s2984_s9 }
0x485d   :  { %2502 = vrot.lane.b32.xlu2 %v2500_v24, %s2985_s10 }
0x48b7   :  { %v2503_v13 = vpop.permute.xlu2 %2502 }
0x48b8   :  { %2665 = vmatmul.msk.f32.vlgmr.msrb.gmra.mxu2 %vm208_vm13, %v2503_v13 }
0x48ce   :  { %v2442_v25 = vpop.permute.xlu0 %2441 }
0x48cf   :  { %v2444_v26 = vmul.f32 %v2442_v25, %v2425_v4 }
0x48d1   :  { %2527 = vrot.lane.b32.xlu0 %v2444_v26, %s2985_s10 }
0x493b   :  { %v2523_v2 = vpop.f32.mrf.mxu2 }
0x4943   :  { %v2528_v28 = vpop.permute.xlu0 %2527 }
0x4944   :  { %2666 = vmatmul.msk.f32.vlgmr.msrb.gmra.mxu3 %vm208_vm13, %v2528_v28 }
0x49c7   :  { %v2548_v5 = vpop.f32.mrf.mxu3 }
0x49c8   :  { %v2549_v8 = vadd.f32 %v2548_v5, %v2523_v2 }
0x49ca   :  { %v2552_v9 = vadd.f32 %v2684_v31, %v2549_v8 }
0x49cc   :  { %v2553_v32 = vmax.f32 %v2552_v9, 0.0 }
0x49ce   :  { %2667 = vmatmul.msk.f32.vlgmr.msra.gmra.mxu0 %vm208_vm13, %v2553_v32 }
0x4a4b   :  { %v2575_v33 = vpop.f32.mrf.mxu0 }
0x4a4c   :  { %v2576_v41 = vadd.f32 %v2685_v40, %v2575_v33 }
0x4a4e   :  { %2579 = vst.msk [vmem:[#allocation6] sm:$0x3] %vm2578_vm1, %v2576_v41 }
0x4a4f   :  { %2590 = dma.vmem_to_hbm [thread:$0]  %s2586_s15, 32, %s2588_s18, [#allocation7]  }
0x4a50   :  { %2979 = dma.done.wait [#allocation7], 32  }
0x4a51   :  { %2980 = vsyncadd [#allocation7], 4294967264 }
0x4a52   :  { %2595 = vsyncpa [#allocation7], 1 }

</bundles_post_ra>
